<compile_context>
chip_gen: v7x
topology: tpu7x:2x2x1
jax: 0.10.0
libtpu: 0.0.40
codegen_flags: <defaults>
</compile_context>

<pallas_src>
import math

import jax
import jax.numpy as jnp
import numpy as np
from jax.experimental import pallas as pl
from jax.experimental.pallas import tpu as pltpu

# ----------------------------- configuration --------------------------------
DIM = 32          # model dim (c)
DEPTH = 2
HEADS = 4
DIM_HEAD = 8
MLP_DIM = 64
SCALE = 16        # rotary scale (per layer, all equal)
MIN_FREQ = 1.0 / 64.0
REL_EMB_DIM = 2   # 2-D coordinates
B = 2
N = 64            # number of tokens / grid points

INNER = HEADS * DIM_HEAD              # 32 (== DIM)
WIDE = 2 * INNER                      # 64: merged q|k and k|v lane width
ROT_BLOCK = DIM_HEAD // REL_EMB_DIM   # per-axis rotary width (4)
INV_FREQ = [1.0 / (10000.0 ** (i / ROT_BLOCK)) for i in range(0, ROT_BLOCK, 2)]
ROT_SCALE = SCALE / MIN_FREQ          # t = coord * (scale / min_freq)
EPS = 1e-5                            # InstanceNorm1d default eps

LANES = 128
TOK_BLOCKS = LANES // DIM             # tokens packed per 128-lane row (4)
ROWS = N // TOK_BLOCKS                # sublane rows per batch element (16)

# packed weight slab layout (per layer, row offsets; all multiples of 8)
LAYER_ROWS = 184
OFF_WQKV, OFF_WOUT, OFF_W1, OFF_W2 = 0, 32, 64, 96
OFF_BOUT, OFF_B1, OFF_B2 = 160, 168, 176

assert INNER == DIM
assert LANES % DIM == 0 and N % TOK_BLOCKS == 0


# ------------------- precomputed head-structure constants -------------------
def _head_constants():
    r = np.arange(INNER)[:, None]
    c = np.arange(INNER)[None, :]
    same_head = (r // DIM_HEAD) == (c // DIM_HEAD)
    head_avg = same_head.astype(np.float32) / DIM_HEAD       # per-head mean
    mask_n = same_head.astype(np.float32) / N                 # mask * 1/N
    hr = ROT_BLOCK // 2
    same_rot = (r // ROT_BLOCK) == (c // ROT_BLOCK)
    rl, cl = r % ROT_BLOCK, c % ROT_BLOCK
    rot = ((same_rot & (cl == rl + hr)).astype(np.float32)
           - (same_rot & (cl + hr == rl)).astype(np.float32))  # t@rot == rotate_half(t)
    z = np.zeros_like(rot)
    rot2 = np.block([[rot, z], [z, rot]]).astype(np.float32)   # for merged q|k
    za = np.zeros_like(head_avg)
    avg2 = np.block([[head_avg, za], [za, head_avg]]).astype(np.float32)  # merged k|v
    return jnp.asarray(rot2), jnp.asarray(avg2), jnp.asarray(mask_n)


# ------------------------------ Pallas kernel -------------------------------
def make_fused_kernel(batch_blocks):
    """batch_blocks = number of batch elements folded into the row (M) dim."""
    inv_sqrt2 = 1.0 / math.sqrt(2.0)

    def unflatten(flat):
        # [batch_blocks*ROWS, 128] lane-blocked -> [batch_blocks*N, DIM] token-major
        parts = []
        for bb in range(batch_blocks):
            blk = flat[bb * ROWS:(bb + 1) * ROWS, :]
            parts += [blk[:, j * DIM:(j + 1) * DIM] for j in range(TOK_BLOCKS)]
        return jnp.concatenate(parts, axis=0)

    def flatten(tok):
        # inverse of unflatten
        rows = []
        for bb in range(batch_blocks):
            base = bb * N
            rows.append(jnp.concatenate(
                [tok[base + j * ROWS: base + (j + 1) * ROWS, :]
                 for j in range(TOK_BLOCKS)], axis=1))
        return rows[0] if batch_blocks == 1 else jnp.concatenate(rows, axis=0)

    def kernel(x_ref, cos_ref, sin_ref, rot2_ref, avg2_ref, maskn_ref,
               w_ref, o_ref):
        x = unflatten(x_ref[...])          # [M, DIM]
        cos = cos_ref[...]                 # [M, 64]  (token-major, pre-tiled)
        sin = sin_ref[...]                 # [M, 64]
        rot2 = rot2_ref[...]               # [64, 64]
        avg2 = avg2_ref[...]               # [64, 64]
        mask_n = maskn_ref[...]            # [32, 32] (block-diag * 1/N)

        for li in range(DEPTH):            # static unroll: x stays resident
            base = li * LAYER_ROWS
            wqkv = w_ref[base + OFF_WQKV: base + OFF_WQKV + DIM, 0:3 * INNER]
            wout = w_ref[base + OFF_WOUT: base + OFF_WOUT + INNER, 0:DIM]
            w1 = w_ref[base + OFF_W1: base + OFF_W1 + DIM, 0:MLP_DIM]
            w2 = w_ref[base + OFF_W2: base + OFF_W2 + MLP_DIM, 0:DIM]
            bout = w_ref[base + OFF_BOUT: base + OFF_BOUT + 1, 0:DIM]
            b1 = w_ref[base + OFF_B1: base + OFF_B1 + 1, 0:MLP_DIM]
            b2 = w_ref[base + OFF_B2: base + OFF_B2 + 1, 0:DIM]

            qkv = jnp.dot(x, wqkv, preferred_element_type=jnp.float32)  # [M,96]
            qk = qkv[:, :WIDE]             # [M, 64]  (q | k)
            v = qkv[:, WIDE:3 * INNER]     # [M, 32]

            # merged 2-D rotary on q and k (one matmul, 64-lane wide)
            rot = jnp.dot(qk, rot2, preferred_element_type=jnp.float32)
            qk = qk * cos + rot * sin
            q = qk[:, :INNER]
            k = qk[:, INNER:WIDE]

            # merged per-head InstanceNorm1d on k and v (biased var, eps=1e-5)
            kv = jnp.concatenate([k, v], axis=1)                 # [M, 64]
            mu = jnp.dot(kv, avg2, preferred_element_type=jnp.float32)
            d = kv - mu
            var = jnp.dot(d * d, avg2, preferred_element_type=jnp.float32)
            kv = d * jax.lax.rsqrt(var + EPS)
            k = kv[:, :INNER]
            v = kv[:, INNER:WIDE]

            # galerkin linear attention, all heads at once, per batch block
            attn_parts = []
            for bb in range(batch_blocks):
                r0 = bb * N
                kb = k[r0:r0 + N]
                vb = v[r0:r0 + N]
                qb = q[r0:r0 + N]
                dots = jax.lax.dot_general(                      # k^T v [32,32]
                    kb, vb, (((0,), (0,)), ((), ())),
                    preferred_element_type=jnp.float32)
                attn_parts.append(jnp.dot(qb, dots * mask_n,     # 1/N folded in
                                          preferred_element_type=jnp.float32))
            attn = (attn_parts[0] if batch_blocks == 1
                    else jnp.concatenate(attn_parts, axis=0))

            x = x + (jnp.dot(attn, wout, preferred_element_type=jnp.float32)
                     + bout)

            # FeedForward: Linear -> exact GELU -> Linear (+ residual)
            h1 = jnp.dot(x, w1, preferred_element_type=jnp.float32) + b1
            h1 = 0.5 * h1 * (1.0 + jax.lax.erf(h1 * inv_sqrt2))
            x = x + (jnp.dot(h1, w2, preferred_element_type=jnp.float32) + b2)

        o_ref[...] = flatten(x)            # lane-dense [rows, 128] store

    return kernel


# ------------------------------- wrapper -------------------------------------
def build_rope_tables(pos):
    # pos: [B, N, 2] -> cos, sin [B, N, 64] (tiled across heads AND q|k merge)
    inv = jnp.asarray(INV_FREQ, jnp.float32)

    def freqs(coord):                                    # [B, N]
        t = coord * ROT_SCALE
        fr = t[..., None] * inv                          # [B, N, rot/2]
        return jnp.concatenate([fr, fr], axis=-1)        # [B, N, rot]

    f = jnp.concatenate([freqs(pos[..., 0]), freqs(pos[..., 1])],
                        axis=-1)                         # [B, N, dim_head]
    f = jnp.tile(f, (1, 1, 2 * HEADS))                   # [B, N, 64]
    return jnp.cos(f), jnp.sin(f)


def to_lane_blocked(a):
    # [B, N, C] -> [B, ROWS, 128]; token t = j*ROWS + i -> [i, j*C:(j+1)*C]
    b, n, c = a.shape
    return (a.reshape(b, TOK_BLOCKS, ROWS, c)
             .transpose(0, 2, 1, 3)
             .reshape(b, ROWS, TOK_BLOCKS * c))


def from_lane_blocked(a):
    b = a.shape[0]
    return (a.reshape(b, ROWS, TOK_BLOCKS, DIM)
             .transpose(0, 2, 1, 3)
             .reshape(b, N, DIM))


def pack_weights(layer_params):
    # one contiguous [DEPTH*LAYER_ROWS, 128] slab -> a single weight DMA
    def pad(a, r):
        out = jnp.zeros((r, LANES), jnp.float32)
        return out.at[:a.shape[0], :a.shape[1]].set(a.astype(jnp.float32))

    blocks = []
    for p in layer_params:
        blocks += [pad(p["w_qkv"], 32), pad(p["w_out"], 32), pad(p["w1"], 32),
                   pad(p["w2"], 64), pad(p["b_out"], 8), pad(p["b1"], 8),
                   pad(p["b2"], 8)]
    return jnp.concatenate(blocks, axis=0)


def _single_tensorcore_chip():
    # v5e / v6e: 1 TC per chip -> fold the batch.  v7x: 2 TCs -> keep grid=(B,)
    try:
        kind = jax.devices()[0].device_kind.lower()
        return "v7" not in kind
    except Exception:  # pragma: no cover
        return True


def spatial_encoder_forward(x, pos, layer_params, fold_batch=None):
    b, n, c = x.shape
    assert b == B and n == N and c == DIM
    if fold_batch is None:
        fold_batch = _single_tensorcore_chip()

    cos, sin = build_rope_tables(pos)            # [B, N, 64] token-major
    x_f = to_lane_blocked(x)                     # [B, ROWS, 128]
    rot2, avg2, mask_n = _head_constants()
    wslab = pack_weights(layer_params)           # [DEPTH*184, 128]

    def full(a):
        nd = a.ndim
        return pl.BlockSpec(a.shape, lambda i: (0,) * nd)

    if fold_batch:
        # single grid step, batch folded into M = B*N = 128 rows
        kernel = make_fused_kernel(B)
        x_in = x_f.reshape(B * ROWS, LANES)
        cos_in = cos.reshape(B * N, WIDE)
        sin_in = sin.reshape(B * N, WIDE)
        out_f = pl.pallas_call(
            kernel,
            out_shape=jax.ShapeDtypeStruct((B * ROWS, LANES), jnp.float32),
            grid_spec=pltpu.PrefetchScalarGridSpec(
                num_scalar_prefetch=0,
                grid=(1,),
                in_specs=[full(x_in), full(cos_in), full(sin_in),
                          full(rot2), full(avg2), full(mask_n), full(wslab)],
                out_specs=pl.BlockSpec((B * ROWS, LANES), lambda i: (0, 0))),
            compiler_params=pltpu.CompilerParams(
                dimension_semantics=("arbitrary",)),
        )(x_in, cos_in, sin_in, rot2, avg2, mask_n, wslab)
        return from_lane_blocked(out_f.reshape(B, ROWS, LANES))

    # megacore path: one batch element per TensorCore
    kernel = make_fused_kernel(1)
    io_spec = pl.BlockSpec((pl.Squeezed(), ROWS, LANES), lambda i: (i, 0, 0))
    cs_spec = pl.BlockSpec((pl.Squeezed(), N, WIDE), lambda i: (i, 0, 0))
    out_f = pl.pallas_call(
        kernel,
        out_shape=jax.ShapeDtypeStruct((B, ROWS, LANES), jnp.float32),
        grid_spec=pltpu.PrefetchScalarGridSpec(
            num_scalar_prefetch=0,
            grid=(B,),
            in_specs=[io_spec, cs_spec, cs_spec,
                      full(rot2), full(avg2), full(mask_n), full(wslab)],
            out_specs=io_spec),
        compiler_params=pltpu.CompilerParams(
            dimension_semantics=("parallel",)),
    )(x_f, cos, sin, rot2, avg2, mask_n, wslab)
    return from_lane_blocked(out_f)


# ------------------------- pure-JAX reference (checks) ----------------------
def ref_layer(x, pos, p):
    b, n, c = x.shape
    half = DIM_HEAD // 2
    qkv = x @ p["w_qkv"]
    q, k, v = jnp.split(qkv, 3, axis=-1)
    to_heads = lambda t: t.reshape(b, n, HEADS, DIM_HEAD).transpose(0, 2, 1, 3)
    q, k, v = map(to_heads, (q, k, v))                         # [b,h,n,d]

    def freqs(coord):                                          # [b,n]
        t = coord * ROT_SCALE
        fr = t[..., None] * jnp.asarray(INV_FREQ, jnp.float32)
        fr = jnp.concatenate([fr, fr], axis=-1)                # [b,n,half]
        return fr[:, None]                                     # [b,1,n,half]

    fx, fy = freqs(pos[..., 0]), freqs(pos[..., 1])

    def rotate_half(t):
        d2 = t.shape[-1] // 2
        return jnp.concatenate([-t[..., d2:], t[..., :d2]], axis=-1)

    def apply_rot(t, f):
        return t * jnp.cos(f) + rotate_half(t) * jnp.sin(f)

    def rot2d(t):
        return jnp.concatenate([apply_rot(t[..., :half], fx),
                                apply_rot(t[..., half:], fy)], axis=-1)

    q, k = rot2d(q), rot2d(k)

    def inorm(t):
        mu = t.mean(-1, keepdims=True)
        var = ((t - mu) ** 2).mean(-1, keepdims=True)
        return (t - mu) / jnp.sqrt(var + EPS)

    k, v = inorm(k), inorm(v)
    dots = jnp.einsum("bhnd,bhne->bhde", k, v)
    out = jnp.einsum("bhnd,bhde->bhne", q, dots) * (1.0 / n)
    out = out.transpose(0, 2, 1, 3).reshape(b, n, HEADS * DIM_HEAD)
    x = x + (out @ p["w_out"] + p["b_out"][0])
    h1 = x @ p["w1"] + p["b1"][0]
    h1 = 0.5 * h1 * (1.0 + jax.lax.erf(h1 / jnp.sqrt(2.0)))
    return x + (h1 @ p["w2"] + p["b2"][0])


def ref_forward(x, pos, layer_params):
    for p in layer_params:
        x = ref_layer(x, pos, p)
    return x


# --------------------------------- main --------------------------------------
def init_layer_params(key):
    # TODO(synk): original code uses per-head orthogonal init with a diagonal
    # bias term; here we use deterministic gaussian init (synthetic weights).
    ks = jax.random.split(key, 8)
    f32 = jnp.float32
    return {
        "w_qkv": (jax.random.normal(ks[0], (DIM, 3 * INNER), f32)
                  / np.sqrt(DIM)),
        "w_out": (jax.random.normal(ks[1], (INNER, DIM), f32)
                  / np.sqrt(INNER)),
        "b_out": jax.random.normal(ks[2], (1, DIM), f32) * 0.02,
        "w1": jax.random.normal(ks[3], (DIM, MLP_DIM), f32) / np.sqrt(DIM),
        "b1": jax.random.normal(ks[4], (1, MLP_DIM), f32) * 0.02,
        "w2": jax.random.normal(ks[5], (MLP_DIM, DIM), f32) / np.sqrt(MLP_DIM),
        "b2": jax.random.normal(ks[6], (1, DIM), f32) * 0.02,
    }


if __name__ == "__main__":
    key = jax.random.PRNGKey(0)
    kx, kp, kw = jax.random.split(key, 3)

    x = jax.random.normal(kx, (B, N, DIM), jnp.float32)
    pos_embedding = jax.random.uniform(kp, (B, N, REL_EMB_DIM), jnp.float32)

    layer_params = [init_layer_params(k)
                    for k in jax.random.split(kw, DEPTH)]

    fwd = jax.jit(spatial_encoder_forward, static_argnames=("fold_batch",))

    # default path for this chip (folded single grid step on v5e/v6e,
    # megacore grid=(B,) on v7x)
    out = jax.block_until_ready(
        fwd(x, pos_embedding, layer_params,
            fold_batch=_single_tensorcore_chip()))

    # validate BOTH code paths against the pure-JAX reference
    out_fold = jax.block_until_ready(
        fwd(x, pos_embedding, layer_params, fold_batch=True))
    out_grid = jax.block_until_ready(
        fwd(x, pos_embedding, layer_params, fold_batch=False))

    with jax.default_matmul_precision("highest"):
        ref = jax.block_until_ready(ref_forward(x, pos_embedding, layer_params))

    assert out.shape == (B, N, DIM)
    assert bool(jnp.all(jnp.isfinite(out)))
    np.testing.assert_allclose(np.asarray(out_fold), np.asarray(ref),
                               rtol=2e-3, atol=2e-3)
    np.testing.assert_allclose(np.asarray(out_grid), np.asarray(ref),
                               rtol=2e-3, atol=2e-3)
    print("KERNEL_OK")
</pallas_src>

<mosaic_0001>
module attributes {stable_mosaic.version = 11 : i64} {
  func.func @kernel(%arg0: i32, %arg1: memref<32x128xf32, #tpu.memory_space<vmem>>, %arg2: memref<128x64xf32, #tpu.memory_space<vmem>>, %arg3: memref<128x64xf32, #tpu.memory_space<vmem>>, %arg4: memref<64x64xf32, #tpu.memory_space<vmem>>, %arg5: memref<64x64xf32, #tpu.memory_space<vmem>>, %arg6: memref<32x32xf32, #tpu.memory_space<vmem>>, %arg7: memref<368x128xf32, #tpu.memory_space<vmem>>, %arg8: memref<32x128xf32, #tpu.memory_space<vmem>>) attributes {dimension_semantics = [#tpu.dimension_semantics<arbitrary>], iteration_bounds = array<i64: 1>, scalar_prefetch = 0 : i64, scratch_operands = 0 : i64, tpu.core_type = #tpu.core_type<tc>, window_params = [{pipeline_mode = #tpu.pipeline_mode<synchronous>, transform_indices = @transform_0, window_bounds = array<i64: 32, 128>}, {pipeline_mode = #tpu.pipeline_mode<synchronous>, transform_indices = @transform_1, window_bounds = array<i64: 128, 64>}, {pipeline_mode = #tpu.pipeline_mode<synchronous>, transform_indices = @transform_2, window_bounds = array<i64: 128, 64>}, {pipeline_mode = #tpu.pipeline_mode<synchronous>, transform_indices = @transform_3, window_bounds = array<i64: 64, 64>}, {pipeline_mode = #tpu.pipeline_mode<synchronous>, transform_indices = @transform_4, window_bounds = array<i64: 64, 64>}, {pipeline_mode = #tpu.pipeline_mode<synchronous>, transform_indices = @transform_5, window_bounds = array<i64: 32, 32>}, {pipeline_mode = #tpu.pipeline_mode<synchronous>, transform_indices = @transform_6, window_bounds = array<i64: 368, 128>}, {pipeline_mode = #tpu.pipeline_mode<synchronous>, transform_indices = @transform_7, window_bounds = array<i64: 32, 128>}]} {
    %c0 = arith.constant 0 : index
    %c0_0 = arith.constant 0 : index
    %0 = vector.load %arg1[%c0, %c0_0] : memref<32x128xf32, #tpu.memory_space<vmem>>, vector<32x128xf32>
    %1 = vector.extract_strided_slice %0 {offsets = [0, 0], sizes = [16, 128], strides = [1, 1]} : vector<32x128xf32> to vector<16x128xf32>
    %2 = vector.extract_strided_slice %1 {offsets = [0, 0], sizes = [16, 32], strides = [1, 1]} : vector<16x128xf32> to vector<16x32xf32>
    %3 = vector.extract_strided_slice %1 {offsets = [0, 32], sizes = [16, 32], strides = [1, 1]} : vector<16x128xf32> to vector<16x32xf32>
    %4 = vector.extract_strided_slice %1 {offsets = [0, 64], sizes = [16, 32], strides = [1, 1]} : vector<16x128xf32> to vector<16x32xf32>
    %5 = vector.extract_strided_slice %1 {offsets = [0, 96], sizes = [16, 32], strides = [1, 1]} : vector<16x128xf32> to vector<16x32xf32>
    %6 = vector.extract_strided_slice %0 {offsets = [16, 0], sizes = [16, 128], strides = [1, 1]} : vector<32x128xf32> to vector<16x128xf32>
    %7 = vector.extract_strided_slice %6 {offsets = [0, 0], sizes = [16, 32], strides = [1, 1]} : vector<16x128xf32> to vector<16x32xf32>
    %8 = vector.extract_strided_slice %6 {offsets = [0, 32], sizes = [16, 32], strides = [1, 1]} : vector<16x128xf32> to vector<16x32xf32>
    %9 = vector.extract_strided_slice %6 {offsets = [0, 64], sizes = [16, 32], strides = [1, 1]} : vector<16x128xf32> to vector<16x32xf32>
    %10 = vector.extract_strided_slice %6 {offsets = [0, 96], sizes = [16, 32], strides = [1, 1]} : vector<16x128xf32> to vector<16x32xf32>
    %11 = tpu.concatenate %2, %3, %4, %5, %7, %8, %9, %10 in 0 : vector<16x32xf32>, vector<16x32xf32>, vector<16x32xf32>, vector<16x32xf32>, vector<16x32xf32>, vector<16x32xf32>, vector<16x32xf32>, vector<16x32xf32> -> vector<128x32xf32>
    %c0_1 = arith.constant 0 : index
    %c0_2 = arith.constant 0 : index
    %12 = vector.load %arg2[%c0_1, %c0_2] : memref<128x64xf32, #tpu.memory_space<vmem>>, vector<128x64xf32>
    %c0_3 = arith.constant 0 : index
    %c0_4 = arith.constant 0 : index
    %13 = vector.load %arg3[%c0_3, %c0_4] : memref<128x64xf32, #tpu.memory_space<vmem>>, vector<128x64xf32>
    %c0_5 = arith.constant 0 : index
    %c0_6 = arith.constant 0 : index
    %14 = vector.load %arg4[%c0_5, %c0_6] : memref<64x64xf32, #tpu.memory_space<vmem>>, vector<64x64xf32>
    %c0_7 = arith.constant 0 : index
    %c0_8 = arith.constant 0 : index
    %15 = vector.load %arg5[%c0_7, %c0_8] : memref<64x64xf32, #tpu.memory_space<vmem>>, vector<64x64xf32>
    %c0_9 = arith.constant 0 : index
    %c0_10 = arith.constant 0 : index
    %16 = vector.load %arg6[%c0_9, %c0_10] : memref<32x32xf32, #tpu.memory_space<vmem>>, vector<32x32xf32>
    %c0_11 = arith.constant 0 : index
    %c0_12 = arith.constant 0 : index
    %17 = vector.load %arg7[%c0_11, %c0_12] : memref<368x128xf32, #tpu.memory_space<vmem>>, vector<32x96xf32>
    %c32 = arith.constant 32 : index
    %c0_13 = arith.constant 0 : index
    %18 = vector.load %arg7[%c32, %c0_13] : memref<368x128xf32, #tpu.memory_space<vmem>>, vector<32x32xf32>
    %c64 = arith.constant 64 : index
    %c0_14 = arith.constant 0 : index
    %19 = vector.load %arg7[%c64, %c0_14] : memref<368x128xf32, #tpu.memory_space<vmem>>, vector<32x64xf32>
    %c96 = arith.constant 96 : index
    %c0_15 = arith.constant 0 : index
    %20 = vector.load %arg7[%c96, %c0_15] : memref<368x128xf32, #tpu.memory_space<vmem>>, vector<64x32xf32>
    %c160 = arith.constant 160 : index
    %c0_16 = arith.constant 0 : index
    %21 = vector.load %arg7[%c160, %c0_16] : memref<368x128xf32, #tpu.memory_space<vmem>>, vector<1x32xf32>
    %c168 = arith.constant 168 : index
    %c0_17 = arith.constant 0 : index
    %22 = vector.load %arg7[%c168, %c0_17] : memref<368x128xf32, #tpu.memory_space<vmem>>, vector<1x64xf32>
    %c176 = arith.constant 176 : index
    %c0_18 = arith.constant 0 : index
    %23 = vector.load %arg7[%c176, %c0_18] : memref<368x128xf32, #tpu.memory_space<vmem>>, vector<1x32xf32>
    %cst = arith.constant dense<0.000000e+00> : vector<128x96xf32>
    %24 = tpu.matmul %11, %17, %cst {dimension_numbers = #tpu.dot_dimension_numbers<[1], [0], [0], [1], [0, 0, 1, 1], [], []>} : vector<128x32xf32>, vector<32x96xf32>, vector<128x96xf32> -> vector<128x96xf32>
    %25 = vector.extract_strided_slice %24 {offsets = [0, 0], sizes = [128, 64], strides = [1, 1]} : vector<128x96xf32> to vector<128x64xf32>
    %26 = vector.extract_strided_slice %24 {offsets = [0, 64], sizes = [128, 32], strides = [1, 1]} : vector<128x96xf32> to vector<128x32xf32>
    %cst_19 = arith.constant dense<0.000000e+00> : vector<128x64xf32>
    %27 = tpu.matmul %25, %14, %cst_19 {dimension_numbers = #tpu.dot_dimension_numbers<[1], [0], [0], [1], [0, 0, 1, 1], [], []>} : vector<128x64xf32>, vector<64x64xf32>, vector<128x64xf32> -> vector<128x64xf32>
    %28 = arith.mulf %25, %12 : vector<128x64xf32>
    %29 = arith.mulf %27, %13 : vector<128x64xf32>
    %30 = arith.addf %28, %29 : vector<128x64xf32>
    %31 = vector.extract_strided_slice %30 {offsets = [0, 0], sizes = [128, 32], strides = [1, 1]} : vector<128x64xf32> to vector<128x32xf32>
    %32 = vector.extract_strided_slice %30 {offsets = [0, 32], sizes = [128, 32], strides = [1, 1]} : vector<128x64xf32> to vector<128x32xf32>
    %33 = tpu.concatenate %32, %26 in 1 : vector<128x32xf32>, vector<128x32xf32> -> vector<128x64xf32>
    %cst_20 = arith.constant dense<0.000000e+00> : vector<128x64xf32>
    %34 = tpu.matmul %33, %15, %cst_20 {dimension_numbers = #tpu.dot_dimension_numbers<[1], [0], [0], [1], [0, 0, 1, 1], [], []>} : vector<128x64xf32>, vector<64x64xf32>, vector<128x64xf32> -> vector<128x64xf32>
    %35 = arith.subf %33, %34 : vector<128x64xf32>
    %36 = arith.mulf %35, %35 : vector<128x64xf32>
    %cst_21 = arith.constant dense<0.000000e+00> : vector<128x64xf32>
    %37 = tpu.matmul %36, %15, %cst_21 {dimension_numbers = #tpu.dot_dimension_numbers<[1], [0], [0], [1], [0, 0, 1, 1], [], []>} : vector<128x64xf32>, vector<64x64xf32>, vector<128x64xf32> -> vector<128x64xf32>
    %cst_22 = arith.constant 9.99999974E-6 : f32
    %38 = vector.broadcast %cst_22 : f32 to vector<128x64xf32>
    %39 = arith.addf %37, %38 : vector<128x64xf32>
    %40 = math.rsqrt %39 : vector<128x64xf32>
    %41 = arith.mulf %35, %40 : vector<128x64xf32>
    %42 = vector.extract_strided_slice %41 {offsets = [0, 0], sizes = [128, 32], strides = [1, 1]} : vector<128x64xf32> to vector<128x32xf32>
    %43 = vector.extract_strided_slice %41 {offsets = [0, 32], sizes = [128, 32], strides = [1, 1]} : vector<128x64xf32> to vector<128x32xf32>
    %44 = vector.extract_strided_slice %42 {offsets = [0, 0], sizes = [64, 32], strides = [1, 1]} : vector<128x32xf32> to vector<64x32xf32>
    %45 = vector.extract_strided_slice %43 {offsets = [0, 0], sizes = [64, 32], strides = [1, 1]} : vector<128x32xf32> to vector<64x32xf32>
    %46 = vector.extract_strided_slice %31 {offsets = [0, 0], sizes = [64, 32], strides = [1, 1]} : vector<128x32xf32> to vector<64x32xf32>
    %cst_23 = arith.constant dense<0.000000e+00> : vector<32x32xf32>
    %47 = tpu.matmul %44, %45, %cst_23 {dimension_numbers = #tpu.dot_dimension_numbers<[0], [0], [1], [1], [0, 1, 1, 1], [], []>} : vector<64x32xf32>, vector<64x32xf32>, vector<32x32xf32> -> vector<32x32xf32>
    %48 = arith.mulf %47, %16 : vector<32x32xf32>
    %cst_24 = arith.constant dense<0.000000e+00> : vector<64x32xf32>
    %49 = tpu.matmul %46, %48, %cst_24 {dimension_numbers = #tpu.dot_dimension_numbers<[1], [0], [0], [1], [0, 0, 1, 1], [], []>} : vector<64x32xf32>, vector<32x32xf32>, vector<64x32xf32> -> vector<64x32xf32>
    %50 = vector.extract_strided_slice %42 {offsets = [64, 0], sizes = [64, 32], strides = [1, 1]} : vector<128x32xf32> to vector<64x32xf32>
    %51 = vector.extract_strided_slice %43 {offsets = [64, 0], sizes = [64, 32], strides = [1, 1]} : vector<128x32xf32> to vector<64x32xf32>
    %52 = vector.extract_strided_slice %31 {offsets = [64, 0], sizes = [64, 32], strides = [1, 1]} : vector<128x32xf32> to vector<64x32xf32>
    %cst_25 = arith.constant dense<0.000000e+00> : vector<32x32xf32>
    %53 = tpu.matmul %50, %51, %cst_25 {dimension_numbers = #tpu.dot_dimension_numbers<[0], [0], [1], [1], [0, 1, 1, 1], [], []>} : vector<64x32xf32>, vector<64x32xf32>, vector<32x32xf32> -> vector<32x32xf32>
    %54 = arith.mulf %53, %16 : vector<32x32xf32>
    %cst_26 = arith.constant dense<0.000000e+00> : vector<64x32xf32>
    %55 = tpu.matmul %52, %54, %cst_26 {dimension_numbers = #tpu.dot_dimension_numbers<[1], [0], [0], [1], [0, 0, 1, 1], [], []>} : vector<64x32xf32>, vector<32x32xf32>, vector<64x32xf32> -> vector<64x32xf32>
    %56 = tpu.concatenate %49, %55 in 0 : vector<64x32xf32>, vector<64x32xf32> -> vector<128x32xf32>
    %cst_27 = arith.constant dense<0.000000e+00> : vector<128x32xf32>
    %57 = tpu.matmul %56, %18, %cst_27 {dimension_numbers = #tpu.dot_dimension_numbers<[1], [0], [0], [1], [0, 0, 1, 1], [], []>} : vector<128x32xf32>, vector<32x32xf32>, vector<128x32xf32> -> vector<128x32xf32>
    %58 = vector.broadcast %21 : vector<1x32xf32> to vector<128x32xf32>
    %59 = arith.addf %57, %58 : vector<128x32xf32>
    %60 = arith.addf %11, %59 : vector<128x32xf32>
    %cst_28 = arith.constant dense<0.000000e+00> : vector<128x64xf32>
    %61 = tpu.matmul %60, %19, %cst_28 {dimension_numbers = #tpu.dot_dimension_numbers<[1], [0], [0], [1], [0, 0, 1, 1], [], []>} : vector<128x32xf32>, vector<32x64xf32>, vector<128x64xf32> -> vector<128x64xf32>
    %62 = vector.broadcast %22 : vector<1x64xf32> to vector<128x64xf32>
    %63 = arith.addf %61, %62 : vector<128x64xf32>
    %cst_29 = arith.constant 5.000000e-01 : f32
    %64 = vector.broadcast %cst_29 : f32 to vector<128x64xf32>
    %65 = arith.mulf %64, %63 : vector<128x64xf32>
    %cst_30 = arith.constant 0.707106769 : f32
    %66 = vector.broadcast %cst_30 : f32 to vector<128x64xf32>
    %67 = arith.mulf %63, %66 : vector<128x64xf32>
    %68 = math.erf %67 : vector<128x64xf32>
    %cst_31 = arith.constant 1.000000e+00 : f32
    %69 = vector.broadcast %cst_31 : f32 to vector<128x64xf32>
    %70 = arith.addf %69, %68 : vector<128x64xf32>
    %71 = arith.mulf %65, %70 : vector<128x64xf32>
    %cst_32 = arith.constant dense<0.000000e+00> : vector<128x32xf32>
    %72 = tpu.matmul %71, %20, %cst_32 {dimension_numbers = #tpu.dot_dimension_numbers<[1], [0], [0], [1], [0, 0, 1, 1], [], []>} : vector<128x64xf32>, vector<64x32xf32>, vector<128x32xf32> -> vector<128x32xf32>
    %73 = vector.broadcast %23 : vector<1x32xf32> to vector<128x32xf32>
    %74 = arith.addf %72, %73 : vector<128x32xf32>
    %75 = arith.addf %60, %74 : vector<128x32xf32>
    %c184 = arith.constant 184 : index
    %c0_33 = arith.constant 0 : index
    %76 = vector.load %arg7[%c184, %c0_33] : memref<368x128xf32, #tpu.memory_space<vmem>>, vector<32x96xf32>
    %c216 = arith.constant 216 : index
    %c0_34 = arith.constant 0 : index
    %77 = vector.load %arg7[%c216, %c0_34] : memref<368x128xf32, #tpu.memory_space<vmem>>, vector<32x32xf32>
    %c248 = arith.constant 248 : index
    %c0_35 = arith.constant 0 : index
    %78 = vector.load %arg7[%c248, %c0_35] : memref<368x128xf32, #tpu.memory_space<vmem>>, vector<32x64xf32>
    %c280 = arith.constant 280 : index
    %c0_36 = arith.constant 0 : index
    %79 = vector.load %arg7[%c280, %c0_36] : memref<368x128xf32, #tpu.memory_space<vmem>>, vector<64x32xf32>
    %c344 = arith.constant 344 : index
    %c0_37 = arith.constant 0 : index
    %80 = vector.load %arg7[%c344, %c0_37] : memref<368x128xf32, #tpu.memory_space<vmem>>, vector<1x32xf32>
    %c352 = arith.constant 352 : index
    %c0_38 = arith.constant 0 : index
    %81 = vector.load %arg7[%c352, %c0_38] : memref<368x128xf32, #tpu.memory_space<vmem>>, vector<1x64xf32>
    %c360 = arith.constant 360 : index
    %c0_39 = arith.constant 0 : index
    %82 = vector.load %arg7[%c360, %c0_39] : memref<368x128xf32, #tpu.memory_space<vmem>>, vector<1x32xf32>
    %cst_40 = arith.constant dense<0.000000e+00> : vector<128x96xf32>
    %83 = tpu.matmul %75, %76, %cst_40 {dimension_numbers = #tpu.dot_dimension_numbers<[1], [0], [0], [1], [0, 0, 1, 1], [], []>} : vector<128x32xf32>, vector<32x96xf32>, vector<128x96xf32> -> vector<128x96xf32>
    %84 = vector.extract_strided_slice %83 {offsets = [0, 0], sizes = [128, 64], strides = [1, 1]} : vector<128x96xf32> to vector<128x64xf32>
    %85 = vector.extract_strided_slice %83 {offsets = [0, 64], sizes = [128, 32], strides = [1, 1]} : vector<128x96xf32> to vector<128x32xf32>
    %cst_41 = arith.constant dense<0.000000e+00> : vector<128x64xf32>
    %86 = tpu.matmul %84, %14, %cst_41 {dimension_numbers = #tpu.dot_dimension_numbers<[1], [0], [0], [1], [0, 0, 1, 1], [], []>} : vector<128x64xf32>, vector<64x64xf32>, vector<128x64xf32> -> vector<128x64xf32>
    %87 = arith.mulf %84, %12 : vector<128x64xf32>
    %88 = arith.mulf %86, %13 : vector<128x64xf32>
    %89 = arith.addf %87, %88 : vector<128x64xf32>
    %90 = vector.extract_strided_slice %89 {offsets = [0, 0], sizes = [128, 32], strides = [1, 1]} : vector<128x64xf32> to vector<128x32xf32>
    %91 = vector.extract_strided_slice %89 {offsets = [0, 32], sizes = [128, 32], strides = [1, 1]} : vector<128x64xf32> to vector<128x32xf32>
    %92 = tpu.concatenate %91, %85 in 1 : vector<128x32xf32>, vector<128x32xf32> -> vector<128x64xf32>
    %cst_42 = arith.constant dense<0.000000e+00> : vector<128x64xf32>
    %93 = tpu.matmul %92, %15, %cst_42 {dimension_numbers = #tpu.dot_dimension_numbers<[1], [0], [0], [1], [0, 0, 1, 1], [], []>} : vector<128x64xf32>, vector<64x64xf32>, vector<128x64xf32> -> vector<128x64xf32>
    %94 = arith.subf %92, %93 : vector<128x64xf32>
    %95 = arith.mulf %94, %94 : vector<128x64xf32>
    %cst_43 = arith.constant dense<0.000000e+00> : vector<128x64xf32>
    %96 = tpu.matmul %95, %15, %cst_43 {dimension_numbers = #tpu.dot_dimension_numbers<[1], [0], [0], [1], [0, 0, 1, 1], [], []>} : vector<128x64xf32>, vector<64x64xf32>, vector<128x64xf32> -> vector<128x64xf32>
    %cst_44 = arith.constant 9.99999974E-6 : f32
    %97 = vector.broadcast %cst_44 : f32 to vector<128x64xf32>
    %98 = arith.addf %96, %97 : vector<128x64xf32>
    %99 = math.rsqrt %98 : vector<128x64xf32>
    %100 = arith.mulf %94, %99 : vector<128x64xf32>
    %101 = vector.extract_strided_slice %100 {offsets = [0, 0], sizes = [128, 32], strides = [1, 1]} : vector<128x64xf32> to vector<128x32xf32>
    %102 = vector.extract_strided_slice %100 {offsets = [0, 32], sizes = [128, 32], strides = [1, 1]} : vector<128x64xf32> to vector<128x32xf32>
    %103 = vector.extract_strided_slice %101 {offsets = [0, 0], sizes = [64, 32], strides = [1, 1]} : vector<128x32xf32> to vector<64x32xf32>
    %104 = vector.extract_strided_slice %102 {offsets = [0, 0], sizes = [64, 32], strides = [1, 1]} : vector<128x32xf32> to vector<64x32xf32>
    %105 = vector.extract_strided_slice %90 {offsets = [0, 0], sizes = [64, 32], strides = [1, 1]} : vector<128x32xf32> to vector<64x32xf32>
    %cst_45 = arith.constant dense<0.000000e+00> : vector<32x32xf32>
    %106 = tpu.matmul %103, %104, %cst_45 {dimension_numbers = #tpu.dot_dimension_numbers<[0], [0], [1], [1], [0, 1, 1, 1], [], []>} : vector<64x32xf32>, vector<64x32xf32>, vector<32x32xf32> -> vector<32x32xf32>
    %107 = arith.mulf %106, %16 : vector<32x32xf32>
    %cst_46 = arith.constant dense<0.000000e+00> : vector<64x32xf32>
    %108 = tpu.matmul %105, %107, %cst_46 {dimension_numbers = #tpu.dot_dimension_numbers<[1], [0], [0], [1], [0, 0, 1, 1], [], []>} : vector<64x32xf32>, vector<32x32xf32>, vector<64x32xf32> -> vector<64x32xf32>
    %109 = vector.extract_strided_slice %101 {offsets = [64, 0], sizes = [64, 32], strides = [1, 1]} : vector<128x32xf32> to vector<64x32xf32>
    %110 = vector.extract_strided_slice %102 {offsets = [64, 0], sizes = [64, 32], strides = [1, 1]} : vector<128x32xf32> to vector<64x32xf32>
    %111 = vector.extract_strided_slice %90 {offsets = [64, 0], sizes = [64, 32], strides = [1, 1]} : vector<128x32xf32> to vector<64x32xf32>
    %cst_47 = arith.constant dense<0.000000e+00> : vector<32x32xf32>
    %112 = tpu.matmul %109, %110, %cst_47 {dimension_numbers = #tpu.dot_dimension_numbers<[0], [0], [1], [1], [0, 1, 1, 1], [], []>} : vector<64x32xf32>, vector<64x32xf32>, vector<32x32xf32> -> vector<32x32xf32>
    %113 = arith.mulf %112, %16 : vector<32x32xf32>
    %cst_48 = arith.constant dense<0.000000e+00> : vector<64x32xf32>
    %114 = tpu.matmul %111, %113, %cst_48 {dimension_numbers = #tpu.dot_dimension_numbers<[1], [0], [0], [1], [0, 0, 1, 1], [], []>} : vector<64x32xf32>, vector<32x32xf32>, vector<64x32xf32> -> vector<64x32xf32>
    %115 = tpu.concatenate %108, %114 in 0 : vector<64x32xf32>, vector<64x32xf32> -> vector<128x32xf32>
    %cst_49 = arith.constant dense<0.000000e+00> : vector<128x32xf32>
    %116 = tpu.matmul %115, %77, %cst_49 {dimension_numbers = #tpu.dot_dimension_numbers<[1], [0], [0], [1], [0, 0, 1, 1], [], []>} : vector<128x32xf32>, vector<32x32xf32>, vector<128x32xf32> -> vector<128x32xf32>
    %117 = vector.broadcast %80 : vector<1x32xf32> to vector<128x32xf32>
    %118 = arith.addf %116, %117 : vector<128x32xf32>
    %119 = arith.addf %75, %118 : vector<128x32xf32>
    %cst_50 = arith.constant dense<0.000000e+00> : vector<128x64xf32>
    %120 = tpu.matmul %119, %78, %cst_50 {dimension_numbers = #tpu.dot_dimension_numbers<[1], [0], [0], [1], [0, 0, 1, 1], [], []>} : vector<128x32xf32>, vector<32x64xf32>, vector<128x64xf32> -> vector<128x64xf32>
    %121 = vector.broadcast %81 : vector<1x64xf32> to vector<128x64xf32>
    %122 = arith.addf %120, %121 : vector<128x64xf32>
    %cst_51 = arith.constant 5.000000e-01 : f32
    %123 = vector.broadcast %cst_51 : f32 to vector<128x64xf32>
    %124 = arith.mulf %123, %122 : vector<128x64xf32>
    %cst_52 = arith.constant 0.707106769 : f32
    %125 = vector.broadcast %cst_52 : f32 to vector<128x64xf32>
    %126 = arith.mulf %122, %125 : vector<128x64xf32>
    %127 = math.erf %126 : vector<128x64xf32>
    %cst_53 = arith.constant 1.000000e+00 : f32
    %128 = vector.broadcast %cst_53 : f32 to vector<128x64xf32>
    %129 = arith.addf %128, %127 : vector<128x64xf32>
    %130 = arith.mulf %124, %129 : vector<128x64xf32>
    %cst_54 = arith.constant dense<0.000000e+00> : vector<128x32xf32>
    %131 = tpu.matmul %130, %79, %cst_54 {dimension_numbers = #tpu.dot_dimension_numbers<[1], [0], [0], [1], [0, 0, 1, 1], [], []>} : vector<128x64xf32>, vector<64x32xf32>, vector<128x32xf32> -> vector<128x32xf32>
    %132 = vector.broadcast %82 : vector<1x32xf32> to vector<128x32xf32>
    %133 = arith.addf %131, %132 : vector<128x32xf32>
    %134 = arith.addf %119, %133 : vector<128x32xf32>
    %135 = vector.extract_strided_slice %134 {offsets = [0, 0], sizes = [16, 32], strides = [1, 1]} : vector<128x32xf32> to vector<16x32xf32>
    %136 = vector.extract_strided_slice %134 {offsets = [16, 0], sizes = [16, 32], strides = [1, 1]} : vector<128x32xf32> to vector<16x32xf32>
    %137 = vector.extract_strided_slice %134 {offsets = [32, 0], sizes = [16, 32], strides = [1, 1]} : vector<128x32xf32> to vector<16x32xf32>
    %138 = vector.extract_strided_slice %134 {offsets = [48, 0], sizes = [16, 32], strides = [1, 1]} : vector<128x32xf32> to vector<16x32xf32>
    %139 = tpu.concatenate %135, %136, %137, %138 in 1 : vector<16x32xf32>, vector<16x32xf32>, vector<16x32xf32>, vector<16x32xf32> -> vector<16x128xf32>
    %140 = vector.extract_strided_slice %134 {offsets = [64, 0], sizes = [16, 32], strides = [1, 1]} : vector<128x32xf32> to vector<16x32xf32>
    %141 = vector.extract_strided_slice %134 {offsets = [80, 0], sizes = [16, 32], strides = [1, 1]} : vector<128x32xf32> to vector<16x32xf32>
    %142 = vector.extract_strided_slice %134 {offsets = [96, 0], sizes = [16, 32], strides = [1, 1]} : vector<128x32xf32> to vector<16x32xf32>
    %143 = vector.extract_strided_slice %134 {offsets = [112, 0], sizes = [16, 32], strides = [1, 1]} : vector<128x32xf32> to vector<16x32xf32>
    %144 = tpu.concatenate %140, %141, %142, %143 in 1 : vector<16x32xf32>, vector<16x32xf32>, vector<16x32xf32>, vector<16x32xf32> -> vector<16x128xf32>
    %145 = tpu.concatenate %139, %144 in 0 : vector<16x128xf32>, vector<16x128xf32> -> vector<32x128xf32>
    %c0_55 = arith.constant 0 : index
    %c0_56 = arith.constant 0 : index
    %146 = vector.load %arg8[%c0_55, %c0_56] : memref<32x128xf32, #tpu.memory_space<vmem>>, vector<32x128xf32>
    tpu.vector_store %arg8[%c0_55, %c0_56], %145 {strides = array<i32>} : memref<32x128xf32, #tpu.memory_space<vmem>>, vector<32x128xf32>,
    return
  }
  func.func @transform_0(%arg0: i32) -> (i32, i32) {
    %c0_i32 = arith.constant 0 : i32
    %c0_i32_0 = arith.constant 0 : i32
    %c0_i32_1 = arith.constant 0 : i32
    return %c0_i32, %c0_i32_0 : i32, i32
  }
  func.func @transform_1(%arg0: i32) -> (i32, i32) {
    %c0_i32 = arith.constant 0 : i32
    %c0_i32_0 = arith.constant 0 : i32
    %c0_i32_1 = arith.constant 0 : i32
    return %c0_i32, %c0_i32_0 : i32, i32
  }
  func.func @transform_2(%arg0: i32) -> (i32, i32) {
    %c0_i32 = arith.constant 0 : i32
    %c0_i32_0 = arith.constant 0 : i32
    %c0_i32_1 = arith.constant 0 : i32
    return %c0_i32, %c0_i32_0 : i32, i32
  }
  func.func @transform_3(%arg0: i32) -> (i32, i32) {
    %c0_i32 = arith.constant 0 : i32
    %c0_i32_0 = arith.constant 0 : i32
    %c0_i32_1 = arith.constant 0 : i32
    return %c0_i32, %c0_i32_0 : i32, i32
  }
  func.func @transform_4(%arg0: i32) -> (i32, i32) {
    %c0_i32 = arith.constant 0 : i32
    %c0_i32_0 = arith.constant 0 : i32
    %c0_i32_1 = arith.constant 0 : i32
    return %c0_i32, %c0_i32_0 : i32, i32
  }
  func.func @transform_5(%arg0: i32) -> (i32, i32) {
    %c0_i32 = arith.constant 0 : i32
    %c0_i32_0 = arith.constant 0 : i32
    %c0_i32_1 = arith.constant 0 : i32
    return %c0_i32, %c0_i32_0 : i32, i32
  }
  func.func @transform_6(%arg0: i32) -> (i32, i32) {
    %c0_i32 = arith.constant 0 : i32
    %c0_i32_0 = arith.constant 0 : i32
    %c0_i32_1 = arith.constant 0 : i32
    return %c0_i32, %c0_i32_0 : i32, i32
  }
  func.func @transform_7(%arg0: i32) -> (i32, i32) {
    %c0_i32 = arith.constant 0 : i32
    %c0_i32_0 = arith.constant 0 : i32
    %c0_i32_1 = arith.constant 0 : i32
    return %c0_i32, %c0_i32_0 : i32, i32
  }
}

</mosaic_0001>

<bundles_post_ra>
// kernel: spatial_encoder_forward.1
= control target key start
LH: loop header
LB: loop body
LE: loop exit
PB: predicated region body
PF: predicated region fallthrough
CT: control target
= control target key end

     0   :  { %vm145_vm0 = vcmask 261120   ;;  %s6691_s30 = smov 96   ;;  %s6692_s8 = smov 64   ;;  %vm323_vm1 = vcmask 523264   ;;  %vm4756_vm2 = vcmask 785408   ;;  %s8483_s0 = inlined_call_operand.vmem [shape: f32[32,128], index: 0, kind: input, shape index: {}]   ;;  %s8484_s6 = inlined_call_operand.vmem [shape: f32[368,128], index: 6, kind: input, shape index: {}]   ;;  %s8485_s3 = inlined_call_operand.vmem [shape: f32[64,64], index: 3, kind: input, shape index: {}]   ;;  %s8486_s4 = inlined_call_operand.vmem [shape: f32[64,64], index: 4, kind: input, shape index: {}]   ;;  %s8487_s1 = inlined_call_operand.vmem [shape: f32[128,64], index: 1, kind: input, shape index: {}]   ;;  %s8488_s2 = inlined_call_operand.vmem [shape: f32[128,64], index: 2, kind: input, shape index: {}]   ;;  %s8489_s5 = inlined_call_operand.vmem [shape: f32[32,32], index: 5, kind: input, shape index: {}]   ;;  %s8490_s7 = inlined_call_operand.vmem [shape: f32[32,128], index: 7, kind: output, shape index: {}]  }
   0x1   :  { %v26_v0 = vld [vmem:[%s8483_s0] sm:$0xff]  ;;  %v123_v2 = vld [vmem:[%s8484_s6 + $0x8] sm:$0xff]  ;;  %v124_v4 = vld [vmem:[%s8484_s6 + $0x10] sm:$0xff]  ;;  %s6693_s17 = smov 32  }
   0x2   :  { %v122_v1 = vld [vmem:[%s8484_s6] sm:$0xff]  ;;  %32 = vrot.lane.b32.xlu0 %v26_v0, %s6691_s30  ;;  %38 = vrot.lane.b32.xlu1 %v26_v0, %s6692_s8  ;;  %v27_v5 = vld [vmem:[%s8483_s0 + $0x8] sm:$0xff] }
   0x3   :  { %v6163_v3 = vpack.c.bf16 %v123_v2, %v122_v1  ;;  %v125_v6 = vld [vmem:[%s8484_s6 + $0x18] sm:$0xff]  ;;  %5491 = vmatprep.mubr.msk.f32.mxu0 %vm145_vm0, %v26_v0  ;;  %v28_v8 = vld [vmem:[%s8483_s0 + $0x10] sm:$0xff]  ;;  %v102_v10 = vld [vmem:[%s8485_s3] sm:$0xff] }
   0x4   :  { %v6167_v7 = vpack.c.bf16 %v125_v6, %v124_v4  ;;  %5503 = vmatprep.mubr.msk.f32.mxu1 %vm145_vm0, %v28_v8  ;;  %v29_v9 = vld [vmem:[%s8483_s0 + $0x18] sm:$0xff]  ;;  %v103_v11 = vld [vmem:[%s8485_s3 + $0x8] sm:$0xff]  ;;  %v104_v12 = vld [vmem:[%s8485_s3 + $0x10] sm:$0xff] }
   0x5   :  { %6164 = vmatprep.subr.bf16.mxu0 %v6163_v3  ;;  %6435 = vmatprep.subr.bf16.mxu1 %v6163_v3  ;;  %v6777_v13 = vpack.c.bf16 %v103_v11, %v102_v10  ;;  %v105_v14 = vld [vmem:[%s8485_s3 + $0x18] sm:$0xff]  ;;  %v106_v16 = vld [vmem:[%s8485_s3 + $0x20] sm:$0xff]  ;;  %v107_v17 = vld [vmem:[%s8485_s3 + $0x28] sm:$0xff] }
   0x6   :  { %6166 = vmatpush3.bf16.msra.mxu0 %v6163_v3  ;;  %6437 = vmatpush3.bf16.msra.mxu1 %v6163_v3  ;;  %v6782_v15 = vpack.c.bf16 %v105_v14, %v104_v12  ;;  %v6795_v18 = vpack.c.bf16 %v107_v17, %v106_v16  ;;  %v108_v19 = vld [vmem:[%s8485_s3 + $0x30] sm:$0xff]  ;;  %v109_v20 = vld [vmem:[%s8485_s3 + $0x38] sm:$0xff]  ;;  %v110_v50 = vld [vmem:[%s8486_s4] sm:$0xff] }
   0x7   :  { %34 = vrot.lane.b32.xlu0 %v27_v5, %s6691_s30  ;;  %40 = vrot.lane.b32.xlu1 %v27_v5, %s6692_s8  ;;  %v6807_v21 = vpack.c.bf16 %v109_v20, %v108_v19  ;;  %v111_v51 = vld [vmem:[%s8486_s4 + $0x8] sm:$0xff]  ;;  %v112_v53 = vld [vmem:[%s8486_s4 + $0x10] sm:$0xff] }
   0x8   :  { %6168 = vmatprep.subr.bf16.mxu0 %v6167_v7  ;;  %6436 = vmatprep.subr.bf16.mxu1 %v6167_v7  ;;  %v6964_v52 = vpack.c.bf16 %v111_v51, %v110_v50  ;;  %v113_v54 = vld [vmem:[%s8486_s4 + $0x18] sm:$0xff]  ;;  %v114_v56 = vld [vmem:[%s8486_s4 + $0x20] sm:$0xff]  ;;  %v115_v57 = vld [vmem:[%s8486_s4 + $0x28] sm:$0xff] }
   0x9   :  { %8499 = vst [vmem:[#allocation2_spill] sm:$0xff] %v6807_v21  ;;  %v6976_v55 = vpack.c.bf16 %v113_v54, %v112_v53  ;;  %v6988_v58 = vpack.c.bf16 %v115_v57, %v114_v56  ;;  %v116_v59 = vld [vmem:[%s8486_s4 + $0x30] sm:$0xff]  ;;  %v117_v60 = vld [vmem:[%s8486_s4 + $0x38] sm:$0xff]  ;;  %v71_v62 = vld [vmem:[%s8487_s1 + $0x8] sm:$0xff] }
   0xa   :  { %6170 = vmatpush3.bf16.msra.mxu0 %v6167_v7  ;;  %6438 = vmatpush3.bf16.msra.mxu1 %v6167_v7  ;;  %v7000_v61 = vpack.c.bf16 %v117_v60, %v116_v59  ;;  %v87_v63 = vld [vmem:[%s8488_s2 + $0x8] sm:$0xff]  ;;  %v86_v1 = vld [vmem:[%s8488_s2] sm:$0xff]  ;;  %v73_v10 = vld [vmem:[%s8487_s1 + $0x18] sm:$0xff] }
   0xb   :  { %44 = vrot.lane.b32.xlu0 %v26_v0, %s6693_s17  ;;  %46 = vrot.lane.b32.xlu1 %v27_v5, %s6693_s17  ;;  %8500 = vst [vmem:[#allocation3_spill] sm:$0xff] %v6976_v55  ;;  %8501 = vst [vmem:[#allocation4_spill] sm:$0xff] %v6988_v58  ;;  %v70_v0 = vld [vmem:[%s8487_s1] sm:$0xff]  ;;  %v89_v11 = vld [vmem:[%s8488_s2 + $0x18] sm:$0xff] }
   0xc   :  { %6172 = vmatprep.subr.bf16.mxu1 %v6777_v13  ;;  %6188 = vmatprep.subr.bf16.mxu0 %v6964_v52  ;;  %8502 = vst [vmem:[#allocation5_spill] sm:$0xff] %v7000_v61  ;;  %v72_v12 = vld [vmem:[%s8487_s1 + $0x10] sm:$0xff]  ;;  %v91_v53 = vld [vmem:[%s8488_s2 + $0x28] sm:$0xff]  ;;  %v74_v54 = vld [vmem:[%s8487_s1 + $0x20] sm:$0xff] }
   0xd   :  { %5492 = vmatmul.mubr.msk.f32.vlgmr.msra.gmra.mrb[0].mxu0 %vm145_vm0, %v27_v5  ;;  %5504 = vmatmul.mubr.msk.f32.vlgmr.msra.gmra.mrb[0].mxu1 %vm145_vm0, %v29_v9  ;;  %v88_v14 = vld [vmem:[%s8488_s2 + $0x10] sm:$0xff] }
   0xe   :  { %6174 = vmatpush3.bf16.msra.mxu1 %v6777_v13  ;;  %6190 = vmatpush3.bf16.msra.mxu0 %v6964_v52 }
   0xf   :  { %52 = vrot.lane.b32.xlu0 %v28_v8, %s6691_s30  ;;  %54 = vrot.lane.b32.xlu1 %v29_v9, %s6691_s30 }
  0x10   :  { %6176 = vmatprep.subr.bf16.mxu1 %v6782_v15  ;;  %6192 = vmatprep.subr.bf16.mxu0 %v6976_v55 }
  0x12   :  { %6178 = vmatpush3.bf16.msra.mxu1 %v6782_v15  ;;  %6194 = vmatpush3.bf16.msra.mxu0 %v6976_v55 }
  0x13   :  { %58 = vrot.lane.b32.xlu0 %v28_v8, %s6692_s8  ;;  %60 = vrot.lane.b32.xlu1 %v29_v9, %s6692_s8 }
  0x14   :  { %6180 = vmatprep.subr.bf16.mxu1 %v6795_v18  ;;  %6196 = vmatprep.subr.bf16.mxu0 %v6988_v58 }
  0x16   :  { %6182 = vmatpush3.bf16.msra.mxu1 %v6795_v18  ;;  %6198 = vmatpush3.bf16.msra.mxu0 %v6988_v58 }
  0x17   :  { %64 = vrot.lane.b32.xlu0 %v28_v8, %s6693_s17  ;;  %66 = vrot.lane.b32.xlu1 %v29_v9, %s6693_s17 }
  0x18   :  { %6184 = vmatprep.subr.bf16.mxu1 %v6807_v21  ;;  %6200 = vmatprep.subr.bf16.mxu0 %v7000_v61 }
  0x1a   :  { %6186 = vmatpush3.bf16.msra.mxu1 %v6807_v21  ;;  %6202 = vmatpush3.bf16.msra.mxu0 %v7000_v61 }
  0x1b   :  { %6204 = vmatprep.subr.bf16.mxu1 %v6964_v52 }
  0x74   :  { %v6814_v22 = vpop.permute.xlu0 %32  ;;  %v6816_v23 = vpop.permute.xlu1 %38 }
  0x75   :  { %5494 = vmatprep.mubr.msk.f32.mxu0 %vm145_vm0, %v6814_v22 }
  0x79   :  { %v6820_v24 = vpop.permute.xlu0 %34  ;;  %v6822_v25 = vpop.permute.xlu1 %40 }
  0x7a   :  { %5495 = vmatmul.mubr.msk.f32.gmra.mrb[2].mxu0 %vm145_vm0, %v6820_v24 }
  0x7b   :  { %5497 = vmatprep.mubr.msk.f32.mxu0 %vm145_vm0, %v6816_v23 }
  0x7d   :  { %v6828_v26 = vpop.permute.xlu0 %44  ;;  %v6830_v27 = vpop.permute.xlu1 %46 }
  0x7e   :  { %5498 = vmatmul.mubr.msk.f32.gmra.mrb[4].mxu0 %vm145_vm0, %v6822_v25 }
  0x7f   :  { %5500 = vmatprep.mubr.msk.f32.mxu0 %vm145_vm0, %v6828_v26 }
  0x81   :  { %v6836_v28 = vpop.permute.xlu0 %52  ;;  %v6838_v29 = vpop.permute.xlu1 %54 }
  0x82   :  { %5501 = vmatmul.mubr.msk.f32.gmra.mrb[6].mxu0 %vm145_vm0, %v6830_v27  ;;  %5506 = vmatprep.mubr.msk.f32.mxu1 %vm145_vm0, %v6836_v28 }
  0x83   :  { %5507 = vmatmul.mubr.msk.f32.gmra.mrb[2].mxu1 %vm145_vm0, %v6838_v29 }
  0x85   :  { %v6846_v30 = vpop.permute.xlu0 %58  ;;  %v6848_v31 = vpop.permute.xlu1 %60 }
  0x86   :  { %5509 = vmatprep.mubr.msk.f32.mxu1 %vm145_vm0, %v6846_v30 }
  0x87   :  { %5510 = vmatmul.mubr.msk.f32.gmra.mrb[4].mxu1 %vm145_vm0, %v6848_v31 }
  0x89   :  { %v6854_v32 = vpop.permute.xlu0 %64  ;;  %v6856_v33 = vpop.permute.xlu1 %66 }
  0x8a   :  { %5512 = vmatprep.mubr.msk.f32.mxu1 %vm145_vm0, %v6854_v32 }
  0x8b   :  { %5513 = vmatmul.mubr.msk.f32.gmra.mrb[6].mxu1 %vm145_vm0, %v6856_v33 }
  0xe0   :  { %v6862_v34 = vpop.f32.mrb[0].mxu0  ;;  %v6864_v35 = vpop.f32.mrb[0].mxu1 }
  0xe1   :  { %v6866_v36 = vpop.f32.mrb[1].mxu0  ;;  %631 = vrot.lane.b32.xlu1 %v6862_v34, %s6691_s30  ;;  %v6870_v37 = vpop.f32.mrb[1].mxu1  ;;  %v518_v3 = vmul.f32 %v6862_v34, %v71_v62 }
  0xe2   :  { %5531 = vmatprep.mubr.msk.f32.mxu1 %vm323_vm1, %v6866_v36  ;;  %v517_v6 = vmul.f32 %v6866_v36, %v70_v0  ;;  %v77_v0 = vld [vmem:[%s8487_s1 + $0x38] sm:$0xff] }
  0xe3   :  { %5532 = vmatmul.mubr.msk.f32.vlgmr.msra.gmra.mrb[8].mxu1 %vm323_vm1, %v6862_v34 }
  0xe4   :  { %6206 = vmatpush3.bf16.msra.mxu1 %v6964_v52 }
  0xe5   :  { %647 = vrot.lane.b32.xlu1 %v6864_v35, %s6691_s30  ;;  %6208 = vmatprep.subr.bf16.mxu1 %v6976_v55 }
  0xe8   :  { %6210 = vmatpush3.bf16.msra.mxu1 %v6976_v55 }
  0xe9   :  { %629 = vrot.lane.b32.xlu1 %v6866_v36, %s6691_s30  ;;  %6212 = vmatprep.subr.bf16.mxu1 %v6988_v58  ;;  %v75_v36 = vld [vmem:[%s8487_s1 + $0x28] sm:$0xff] }
  0xec   :  { %6214 = vmatpush3.bf16.msra.mxu1 %v6988_v58 }
  0xed   :  { %645 = vrot.lane.b32.xlu1 %v6870_v37, %s6691_s30  ;;  %6216 = vmatprep.subr.bf16.mxu1 %v7000_v61 }
  0xf0   :  { %6218 = vmatpush3.bf16.msra.mxu1 %v7000_v61 }
 0x14d   :  { %v6882_v38 = vpop.f32.mrb[2].mxu0 }
 0x14e   :  { %635 = vrot.lane.b32.xlu1 %v6882_v38, %s6691_s30  ;;  %v6886_v39 = vpop.f32.mrb[3].mxu0  ;;  %v520_v17 = vmul.f32 %v6882_v38, %v73_v10 }
 0x14f   :  { %5534 = vmatprep.mubr.msk.f32.mxu1 %vm323_vm1, %v6886_v39  ;;  %v519_v34 = vmul.f32 %v6886_v39, %v72_v12  ;;  %v79_v12 = vld [vmem:[%s8487_s1 + $0x48] sm:$0xff] }
 0x150   :  { %5535 = vmatmul.mubr.msk.f32.gmra.mrb[10].mxu1 %vm323_vm1, %v6882_v38  ;;  %v90_v38 = vld [vmem:[%s8488_s2 + $0x20] sm:$0xff] }
 0x151   :  { %v6892_v40 = vpop.f32.mrb[4].mxu0 }
 0x152   :  { %633 = vrot.lane.b32.xlu1 %v6886_v39, %s6691_s30  ;;  %v6896_v41 = vpop.f32.mrb[5].mxu0  ;;  %v522_v59 = vmul.f32 %v6892_v40, %v75_v36 }
 0x153   :  { %5537 = vmatprep.mubr.msk.f32.mxu1 %vm323_vm1, %v6896_v41  ;;  %v632_v50 = vpop.permute.xlu1 %631 }
 0x154   :  { %5538 = vmatmul.mubr.msk.f32.gmra.mrb[12].mxu1 %vm323_vm1, %v6892_v40 }
 0x155   :  { %v6902_v42 = vpop.f32.mrb[6].mxu0 }
 0x156   :  { %v6904_v43 = vpop.f32.mrb[7].mxu0  ;;  %v6906_v44 = vpop.f32.mrb[2].mxu1 }
 0x157   :  { %v6908_v45 = vpop.f32.mrb[3].mxu1  ;;  %5540 = vmatprep.mubr.msk.f32.mxu1 %vm323_vm1, %v6904_v43 }
 0x158   :  { %649 = vrot.lane.b32.xlu1 %v6908_v45, %s6691_s30  ;;  %5541 = vmatmul.mubr.msk.f32.gmra.mrb[14].mxu1 %vm323_vm1, %v6902_v42 }
 0x159   :  { %5543 = vmatprep.mubr.msk.f32.mxu1 %vm323_vm1, %v6870_v37 }
 0x15a   :  { %v6918_v46 = vpop.f32.mrb[4].mxu1 }
 0x15b   :  { %v6920_v47 = vpop.f32.mrb[5].mxu1 }
 0x15c   :  { %639 = vrot.lane.b32.xlu1 %v6892_v40, %s6691_s30  ;;  %5544 = vmatmul.mubr.msk.f32.gmra.mrb[16].mxu1 %vm323_vm1, %v6864_v35  ;;  %v76_v40 = vld [vmem:[%s8487_s1 + $0x30] sm:$0xff] }
 0x15d   :  { %5546 = vmatprep.mubr.msk.f32.mxu1 %vm323_vm1, %v6908_v45 }
 0x15e   :  { %v6928_v48 = vpop.f32.mrb[6].mxu1 }
 0x15f   :  { %v6930_v49 = vpop.f32.mrb[7].mxu1 }
 0x160   :  { %637 = vrot.lane.b32.xlu1 %v6896_v41, %s6691_s30  ;;  %5547 = vmatmul.mubr.msk.f32.gmra.mrb[18].mxu1 %vm323_vm1, %v6906_v44 }
 0x161   :  { %5549 = vmatprep.mubr.msk.f32.mxu1 %vm323_vm1, %v6920_v47 }
 0x164   :  { %643 = vrot.lane.b32.xlu1 %v6902_v42, %s6691_s30  ;;  %5550 = vmatmul.mubr.msk.f32.gmra.mrb[20].mxu1 %vm323_vm1, %v6918_v46 }
 0x165   :  { %5552 = vmatprep.mubr.msk.f32.mxu1 %vm323_vm1, %v6930_v49 }
 0x168   :  { %641 = vrot.lane.b32.xlu1 %v6904_v43, %s6691_s30  ;;  %5553 = vmatmul.mubr.msk.f32.gmra.mrb[22].mxu1 %vm323_vm1, %v6928_v48 }
 0x16c   :  { %651 = vrot.lane.b32.xlu1 %v6906_v44, %s6691_s30 }
 0x170   :  { %653 = vrot.lane.b32.xlu1 %v6920_v47, %s6691_s30 }
 0x174   :  { %655 = vrot.lane.b32.xlu1 %v6918_v46, %s6691_s30 }
 0x178   :  { %657 = vrot.lane.b32.xlu1 %v6930_v49, %s6691_s30 }
 0x17c   :  { %659 = vrot.lane.b32.xlu1 %v6928_v48, %s6691_s30 }
 0x1b6   :  { %v5533_v2 = vpop.f32.mrb[8].mxu1 }
 0x1b7   :  { %v534_v4 = vmul.f32 %v5533_v2, %v87_v63  ;;  %v438_v5 = vpop.f32.mrb[9].mxu1  ;;  %v521_v63 = vmul.f32 %v6896_v41, %v74_v54  ;;  %v93_v2 = vld [vmem:[%s8488_s2 + $0x38] sm:$0xff]  ;;  %v7076_v41 = vpop.permute.xlu1 %647 }
 0x1b8   :  { %v533_v7 = vmul.f32 %v438_v5, %v86_v1 }
 0x1b9   :  { %v7020_v8 = vadd.f32 %v534_v4, %v518_v3  ;;  %v92_v4 = vld [vmem:[%s8488_s2 + $0x30] sm:$0xff] }
 0x1ba   :  { %v7022_v9 = vadd.f32 %v533_v7, %v517_v6  ;;  %v524_v7 = vmul.f32 %v6902_v42, %v77_v0  ;;  %v78_v42 = vld [vmem:[%s8487_s1 + $0x40] sm:$0xff] }
 0x1bb   :  { %583 = vrot.lane.b32.xlu0 %v7020_v8, %s6691_s30 }
 0x1bf   :  { %581 = vrot.lane.b32.xlu0 %v7022_v9, %s6691_s30 }
 0x223   :  { %v5536_v16 = vpop.f32.mrb[10].mxu1 }
 0x224   :  { %v536_v19 = vmul.f32 %v5536_v16, %v89_v11  ;;  %v448_v20 = vpop.f32.mrb[11].mxu1 }
 0x225   :  { %v535_v51 = vmul.f32 %v448_v20, %v88_v14  ;;  %v523_v14 = vmul.f32 %v6904_v43, %v76_v40  ;;  %v526_v43 = vmul.f32 %v6864_v35, %v79_v12  ;;  %v80_v35 = vld [vmem:[%s8487_s1 + $0x50] sm:$0xff] }
 0x226   :  { %v7051_v56 = vadd.f32 %v536_v19, %v520_v17  ;;  %v95_v19 = vld [vmem:[%s8488_s2 + $0x48] sm:$0xff] }
 0x227   :  { %v7056_v39 = vadd.f32 %v535_v51, %v519_v34  ;;  %v5539_v57 = vpop.f32.mrb[12].mxu1  ;;  %v94_v34 = vld [vmem:[%s8488_s2 + $0x40] sm:$0xff] }
 0x228   :  { %v538_v60 = vmul.f32 %v5539_v57, %v91_v53  ;;  %587 = vrot.lane.b32.xlu0 %v7051_v56, %s6691_s30  ;;  %v458_v62 = vpop.f32.mrb[13].mxu1  ;;  %v81_v57 = vld [vmem:[%s8487_s1 + $0x58] sm:$0xff] }
 0x229   :  { %v537_v1 = vmul.f32 %v458_v62, %v90_v38  ;;  %v525_v38 = vmul.f32 %v6870_v37, %v78_v42  ;;  %v96_v37 = vld [vmem:[%s8488_s2 + $0x50] sm:$0xff] }
 0x22a   :  { %v7071_v3 = vadd.f32 %v538_v60, %v522_v59  ;;  %v630_v59 = vpop.permute.xlu1 %629 }
 0x22b   :  { %v7078_v5 = vadd.f32 %v537_v1, %v521_v63  ;;  %v5542_v6 = vpop.f32.mrb[14].mxu1  ;;  %v97_v63 = vld [vmem:[%s8488_s2 + $0x58] sm:$0xff] }
 0x22c   :  { %v540_v10 = vmul.f32 %v5542_v6, %v93_v2  ;;  %585 = vrot.lane.b32.xlu0 %v7056_v39, %s6691_s30  ;;  %v468_v11 = vpop.f32.mrb[15].mxu1  ;;  %v528_v6 = vmul.f32 %v6906_v44, %v81_v57  ;;  %v82_v44 = vld [vmem:[%s8487_s1 + $0x60] sm:$0xff] }
 0x22d   :  { %v539_v16 = vmul.f32 %v468_v11, %v92_v4  ;;  %v584_v17 = vpop.permute.xlu0 %583  ;;  %v527_v11 = vmul.f32 %v6908_v45, %v80_v35 }
 0x22e   :  { %v7093_v20 = vadd.f32 %v540_v10, %v524_v7  ;;  %v7122_v2 = vsel %vm145_vm0, %v584_v17, %v632_v50  ;;  %v83_v50 = vld [vmem:[%s8487_s1 + $0x68] sm:$0xff]  ;;  %v98_v17 = vld [vmem:[%s8488_s2 + $0x60] sm:$0xff] }
 0x22f   :  { %v7098_v36 = vadd.f32 %v539_v16, %v523_v14  ;;  %v5545_v51 = vpop.f32.mrb[16].mxu1  ;;  %v99_v14 = vld [vmem:[%s8488_s2 + $0x68] sm:$0xff]  ;;  %v530_v42 = vmul.f32 %v6918_v46, %v83_v50  ;;  %v84_v46 = vld [vmem:[%s8487_s1 + $0x70] sm:$0xff] }
 0x230   :  { %v542_v53 = vmul.f32 %v5545_v51, %v95_v19  ;;  %591 = vrot.lane.b32.xlu0 %v7071_v3, %s6691_s30  ;;  %v478_v54 = vpop.f32.mrb[17].mxu1 }
 0x231   :  { %v541_v60 = vmul.f32 %v478_v54, %v94_v34  ;;  %v582_v62 = vpop.permute.xlu0 %581 }
 0x232   :  { %v7113_v0 = vadd.f32 %v542_v53, %v526_v43  ;;  %v7116_v1 = vsel %vm145_vm0, %v582_v62, %v630_v59  ;;  %v529_v43 = vmul.f32 %v6920_v47, %v82_v44  ;;  %v85_v53 = vld [vmem:[%s8487_s1 + $0x78] sm:$0xff]  ;;  %v100_v59 = vld [vmem:[%s8488_s2 + $0x70] sm:$0xff] }
 0x233   :  { %v7124_v40 = vadd.f32 %v541_v60, %v525_v38  ;;  %v5548_v4 = vpop.f32.mrb[18].mxu1  ;;  %5571 = vmatprep.mubr.msk.f32.mxu0 %vm323_vm1, %v7116_v1  ;;  %v101_v38 = vld [vmem:[%s8488_s2 + $0x78] sm:$0xff]  ;;  %v532_v62 = vmul.f32 %v6928_v48, %v85_v53  ;;  %v646_v48 = vpop.permute.xlu1 %645 }
 0x234   :  { %v544_v7 = vmul.f32 %v5548_v4, %v97_v63  ;;  %5572 = vmatmul.mubr.msk.f32.vlgmr.msra.gmra.mrb[8].mxu0 %vm323_vm1, %v7122_v2  ;;  %589 = vrot.lane.b32.xlu0 %v7078_v5, %s6691_s30  ;;  %v488_v10 = vpop.f32.mrb[19].mxu1 }
 0x235   :  { %v543_v12 = vmul.f32 %v488_v10, %v96_v37  ;;  %v531_v37 = vmul.f32 %v6930_v49, %v84_v46 }
 0x236   :  { %v7143_v16 = vadd.f32 %v544_v7, %v528_v6 }
 0x237   :  { %v7148_v45 = vadd.f32 %v543_v12, %v527_v11  ;;  %v5551_v19 = vpop.f32.mrb[20].mxu1  ;;  %v636_v49 = vpop.permute.xlu1 %635 }
 0x238   :  { %v546_v34 = vmul.f32 %v5551_v19, %v99_v14  ;;  %595 = vrot.lane.b32.xlu0 %v7093_v20, %s6691_s30  ;;  %v498_v51 = vpop.f32.mrb[21].mxu1 }
 0x239   :  { %v545_v54 = vmul.f32 %v498_v51, %v98_v17 }
 0x23a   :  { %v7163_v57 = vadd.f32 %v546_v34, %v530_v42 }
 0x23b   :  { %v7168_v47 = vadd.f32 %v545_v54, %v529_v43  ;;  %v5554_v60 = vpop.f32.mrb[22].mxu1  ;;  %v634_v10 = vpop.permute.xlu1 %633 }
 0x23c   :  { %v548_v63 = vmul.f32 %v5554_v60, %v101_v38  ;;  %593 = vrot.lane.b32.xlu0 %v7098_v36, %s6691_s30  ;;  %v508_v35 = vpop.f32.mrb[23].mxu1 }
 0x23d   :  { %v547_v4 = vmul.f32 %v508_v35, %v100_v59 }
 0x23e   :  { %v7174_v6 = vadd.f32 %v548_v63, %v532_v62 }
 0x23f   :  { %v7176_v7 = vadd.f32 %v547_v4, %v531_v37  ;;  %v650_v11 = vpop.permute.xlu1 %649 }
 0x240   :  { %599 = vrot.lane.b32.xlu0 %v7113_v0, %s6691_s30 }
 0x243   :  { %v640_v12 = vpop.permute.xlu1 %639 }
 0x244   :  { %597 = vrot.lane.b32.xlu0 %v7124_v40, %s6691_s30 }
 0x247   :  { %v638_v19 = vpop.permute.xlu1 %637 }
 0x248   :  { %603 = vrot.lane.b32.xlu0 %v7143_v16, %s6691_s30 }
 0x24b   :  { %v644_v43 = vpop.permute.xlu1 %643 }
 0x24c   :  { %601 = vrot.lane.b32.xlu0 %v7148_v45, %s6691_s30 }
 0x24f   :  { %v642_v38 = vpop.permute.xlu1 %641 }
 0x250   :  { %607 = vrot.lane.b32.xlu0 %v7163_v57, %s6691_s30 }
 0x253   :  { %v652_v37 = vpop.permute.xlu1 %651 }
 0x254   :  { %605 = vrot.lane.b32.xlu0 %v7168_v47, %s6691_s30 }
 0x258   :  { %609 = vrot.lane.b32.xlu0 %v7176_v7, %s6691_s30 }
 0x25c   :  { %611 = vrot.lane.b32.xlu0 %v7174_v6, %s6691_s30 }
 0x29a   :  { %v588_v50 = vpop.permute.xlu0 %587 }
 0x29b   :  { %v680_v17 = vsel %vm145_vm0, %v588_v50, %v636_v49 }
 0x29e   :  { %v586_v14 = vpop.permute.xlu0 %585 }
 0x29f   :  { %v679_v44 = vsel %vm145_vm0, %v586_v14, %v634_v10  ;;  %v654_v10 = vpop.permute.xlu1 %653 }
 0x2a0   :  { %5574 = vmatprep.mubr.msk.f32.mxu0 %vm323_vm1, %v679_v44 }
 0x2a1   :  { %5575 = vmatmul.mubr.msk.f32.gmra.mrb[10].mxu0 %vm323_vm1, %v680_v17 }
 0x2a2   :  { %v592_v42 = vpop.permute.xlu0 %591 }
 0x2a3   :  { %v682_v53 = vsel %vm145_vm0, %v592_v42, %v640_v12 }
 0x2a6   :  { %v590_v34 = vpop.permute.xlu0 %589 }
 0x2a7   :  { %v681_v51 = vsel %vm145_vm0, %v590_v34, %v638_v19  ;;  %v656_v19 = vpop.permute.xlu1 %655 }
 0x2a8   :  { %5577 = vmatprep.mubr.msk.f32.mxu0 %vm323_vm1, %v681_v51 }
 0x2a9   :  { %5578 = vmatmul.mubr.msk.f32.gmra.mrb[12].mxu0 %vm323_vm1, %v682_v53 }
 0x2aa   :  { %v596_v54 = vpop.permute.xlu0 %595 }
 0x2ab   :  { %v684_v60 = vsel %vm145_vm0, %v596_v54, %v644_v43  ;;  %v658_v34 = vpop.permute.xlu1 %657 }
 0x2ae   :  { %v594_v46 = vpop.permute.xlu0 %593 }
 0x2af   :  { %v683_v59 = vsel %vm145_vm0, %v594_v46, %v642_v38  ;;  %v660_v38 = vpop.permute.xlu1 %659 }
 0x2b0   :  { %5580 = vmatprep.mubr.msk.f32.mxu0 %vm323_vm1, %v683_v59 }
 0x2b1   :  { %5581 = vmatmul.mubr.msk.f32.gmra.mrb[14].mxu0 %vm323_vm1, %v684_v60 }
 0x2b2   :  { %v600_v62 = vpop.permute.xlu0 %599 }
 0x2b3   :  { %v686_v4 = vsel %vm145_vm0, %v600_v62, %v7076_v41 }
 0x2b6   :  { %v598_v63 = vpop.permute.xlu0 %597 }
 0x2b7   :  { %v685_v35 = vsel %vm145_vm0, %v598_v63, %v646_v48 }
 0x2b8   :  { %5583 = vmatprep.mubr.msk.f32.mxu0 %vm323_vm1, %v685_v35 }
 0x2b9   :  { %5584 = vmatmul.mubr.msk.f32.gmra.mrb[16].mxu0 %vm323_vm1, %v686_v4 }
 0x2ba   :  { %v604_v49 = vpop.permute.xlu0 %603 }
 0x2bb   :  { %v688_v14 = vsel %vm145_vm0, %v604_v49, %v652_v37 }
 0x2be   :  { %v602_v50 = vpop.permute.xlu0 %601 }
 0x2bf   :  { %v687_v12 = vsel %vm145_vm0, %v602_v50, %v650_v11 }
 0x2c0   :  { %5586 = vmatprep.mubr.msk.f32.mxu0 %vm323_vm1, %v687_v12 }
 0x2c1   :  { %5587 = vmatmul.mubr.msk.f32.gmra.mrb[18].mxu0 %vm323_vm1, %v688_v14 }
 0x2c2   :  { %v608_v48 = vpop.permute.xlu0 %607 }
 0x2c3   :  { %v690_v43 = vsel %vm145_vm0, %v608_v48, %v656_v19 }
 0x2c6   :  { %v606_v42 = vpop.permute.xlu0 %605 }
 0x2c7   :  { %v7216_v41 = vsel %vm145_vm0, %v606_v42, %v654_v10 }
 0x2c8   :  { %5589 = vmatprep.mubr.msk.f32.mxu0 %vm323_vm1, %v7216_v41 }
 0x2c9   :  { %5590 = vmatmul.mubr.msk.f32.gmra.mrb[20].mxu0 %vm323_vm1, %v690_v43 }
 0x2ca   :  { %v610_v11 = vpop.permute.xlu0 %609 }
 0x2cb   :  { %v7223_v54 = vsel %vm145_vm0, %v610_v11, %v658_v34 }
 0x2cc   :  { %5592 = vmatprep.mubr.msk.f32.mxu0 %vm323_vm1, %v7223_v54 }
 0x2ce   :  { %v612_v46 = vpop.permute.xlu0 %611 }
 0x2cf   :  { %v692_v62 = vsel %vm145_vm0, %v612_v46, %v660_v38 }
 0x2d0   :  { %5593 = vmatmul.mubr.msk.f32.gmra.mrb[22].mxu0 %vm323_vm1, %v692_v62 }
 0x307   :  { %v5573_v63 = vpop.f32.mrb[8].mxu0 }
 0x308   :  { %v7230_v37 = vsub.f32 %v7122_v2, %v5573_v63  ;;  %v807_v49 = vpop.f32.mrb[9].mxu0 }
 0x309   :  { %v7233_v10 = vsub.f32 %v7116_v1, %v807_v49 }
 0x30a   :  { %v903_v48 = vmul.f32 %v7230_v37, %v7230_v37 }
 0x30b   :  { %v902_v50 = vmul.f32 %v7233_v10, %v7233_v10 }
 0x30d   :  { %5611 = vmatprep.mubr.msk.f32.mxu1 %vm323_vm1, %v902_v50 }
 0x30e   :  { %5612 = vmatmul.mubr.msk.f32.vlgmr.msra.gmra.mrb[24].mxu1 %vm323_vm1, %v903_v48 }
 0x374   :  { %v5576_v19 = vpop.f32.mrb[10].mxu0 }
 0x375   :  { %v7241_v42 = vsub.f32 %v680_v17, %v5576_v19  ;;  %v817_v34 = vpop.f32.mrb[11].mxu0 }
 0x376   :  { %v7243_v2 = vsub.f32 %v679_v44, %v817_v34 }
 0x377   :  { %v905_v11 = vmul.f32 %v7241_v42, %v7241_v42 }
 0x378   :  { %v904_v1 = vmul.f32 %v7243_v2, %v7243_v2 }
 0x37a   :  { %5614 = vmatprep.mubr.msk.f32.mxu1 %vm323_vm1, %v904_v1 }
 0x37b   :  { %5615 = vmatmul.mubr.msk.f32.gmra.mrb[26].mxu1 %vm323_vm1, %v905_v11 }
 0x37c   :  { %v5579_v38 = vpop.f32.mrb[12].mxu0 }
 0x37d   :  { %v7251_v46 = vsub.f32 %v682_v53, %v5579_v38  ;;  %v827_v63 = vpop.f32.mrb[13].mxu0 }
 0x37e   :  { %v7253_v49 = vsub.f32 %v681_v51, %v827_v63 }
 0x37f   :  { %v907_v17 = vmul.f32 %v7251_v46, %v7251_v46 }
 0x380   :  { %v906_v44 = vmul.f32 %v7253_v49, %v7253_v49 }
 0x382   :  { %5617 = vmatprep.mubr.msk.f32.mxu1 %vm323_vm1, %v906_v44 }
 0x383   :  { %5618 = vmatmul.mubr.msk.f32.gmra.mrb[28].mxu1 %vm323_vm1, %v907_v17 }
 0x384   :  { %v5582_v50 = vpop.f32.mrb[14].mxu0 }
 0x385   :  { %v7261_v48 = vsub.f32 %v684_v60, %v5582_v50  ;;  %v837_v19 = vpop.f32.mrb[15].mxu0 }
 0x386   :  { %v7263_v34 = vsub.f32 %v683_v59, %v837_v19 }
 0x387   :  { %v909_v53 = vmul.f32 %v7261_v48, %v7261_v48 }
 0x388   :  { %v908_v51 = vmul.f32 %v7263_v34, %v7263_v34 }
 0x38a   :  { %5620 = vmatprep.mubr.msk.f32.mxu1 %vm323_vm1, %v908_v51 }
 0x38b   :  { %5621 = vmatmul.mubr.msk.f32.gmra.mrb[30].mxu1 %vm323_vm1, %v909_v53 }
 0x38c   :  { %v5585_v1 = vpop.f32.mrb[16].mxu0 }
 0x38d   :  { %v7271_v11 = vsub.f32 %v686_v4, %v5585_v1  ;;  %v847_v38 = vpop.f32.mrb[17].mxu0 }
 0x38e   :  { %v7273_v63 = vsub.f32 %v685_v35, %v847_v38 }
 0x38f   :  { %v911_v60 = vmul.f32 %v7271_v11, %v7271_v11 }
 0x390   :  { %v910_v59 = vmul.f32 %v7273_v63, %v7273_v63 }
 0x392   :  { %5623 = vmatprep.mubr.msk.f32.mxu1 %vm323_vm1, %v910_v59 }
 0x393   :  { %5624 = vmatmul.mubr.msk.f32.gmra.mrb[32].mxu1 %vm323_vm1, %v911_v60 }
 0x394   :  { %v5588_v44 = vpop.f32.mrb[18].mxu0 }
 0x395   :  { %v7281_v17 = vsub.f32 %v688_v14, %v5588_v44  ;;  %v857_v50 = vpop.f32.mrb[19].mxu0 }
 0x396   :  { %v7283_v19 = vsub.f32 %v687_v12, %v857_v50 }
 0x397   :  { %v913_v4 = vmul.f32 %v7281_v17, %v7281_v17 }
 0x398   :  { %v912_v35 = vmul.f32 %v7283_v19, %v7283_v19 }
 0x39a   :  { %5626 = vmatprep.mubr.msk.f32.mxu1 %vm323_vm1, %v912_v35 }
 0x39b   :  { %5627 = vmatmul.mubr.msk.f32.gmra.mrb[34].mxu1 %vm323_vm1, %v913_v4 }
 0x39c   :  { %v5591_v51 = vpop.f32.mrb[20].mxu0 }
 0x39d   :  { %v7291_v53 = vsub.f32 %v690_v43, %v5591_v51  ;;  %v867_v1 = vpop.f32.mrb[21].mxu0 }
 0x39e   :  { %v7294_v14 = vsub.f32 %v7216_v41, %v867_v1 }
 0x39f   :  { %v915_v38 = vmul.f32 %v7291_v53, %v7291_v53 }
 0x3a0   :  { %v914_v12 = vmul.f32 %v7294_v14, %v7294_v14 }
 0x3a2   :  { %5629 = vmatprep.mubr.msk.f32.mxu1 %vm323_vm1, %v914_v12 }
 0x3a3   :  { %v5594_v59 = vpop.f32.mrb[22].mxu0  ;;  %5630 = vmatmul.mubr.msk.f32.gmra.mrb[36].mxu1 %vm323_vm1, %v915_v38 }
 0x3a4   :  { %v7302_v60 = vsub.f32 %v692_v62, %v5594_v59  ;;  %v877_v44 = vpop.f32.mrb[23].mxu0 }
 0x3a5   :  { %v7305_v43 = vsub.f32 %v7223_v54, %v877_v44 }
 0x3a6   :  { %v917_v50 = vmul.f32 %v7302_v60, %v7302_v60 }
 0x3a7   :  { %v916_v41 = vmul.f32 %v7305_v43, %v7305_v43 }
 0x3a9   :  { %5632 = vmatprep.mubr.msk.f32.mxu1 %vm323_vm1, %v916_v41 }
 0x3aa   :  { %5633 = vmatmul.mubr.msk.f32.gmra.mrb[38].mxu1 %vm323_vm1, %v917_v50 }
 0x3e1   :  { %v5613_v35 = vpop.f32.mrb[24].mxu1 }
 0x3e2   :  { %v1038_v4 = vadd.f32 1e-05, %v5613_v35  ;;  %v1032_v51 = vpop.f32.mrb[25].mxu1 }
 0x3e3   :  { %v1033_v1 = vadd.f32 1e-05, %v1032_v51 }
 0x3e4   :  { %6523 = vrsqrt.f32 %v1038_v4 }
 0x3e5   :  { %6525 = vrsqrt.f32 %v1033_v1 }
 0x3ee   :  { %v6524_v62 = vpop.eup %6523 }
 0x3ef   :  { %v6526_v12 = vpop.eup %6525  ;;  %v7314_v54 = vmul.f32 %v6524_v62, %v7230_v37 }
 0x3f0   :  { %v7317_v38 = vmul.f32 %v6526_v12, %v7233_v10 }
 0x3f2   :  { %v6443_v59 = vpack.i.bf16 %v7314_v54, %v7317_v38 }
 0x3f4   :  { %6444 = vrot.lane.b32.xlu0 %v6443_v59, %s6691_s30 }
 0x44e   :  { %v5616_v44 = vpop.f32.mrb[26].mxu1 }
 0x44f   :  { %v1048_v41 = vadd.f32 1e-05, %v5616_v44  ;;  %v1042_v50 = vpop.f32.mrb[27].mxu1 }
 0x450   :  { %v1043_v35 = vadd.f32 1e-05, %v1042_v50 }
 0x451   :  { %6527 = vrsqrt.f32 %v1048_v41 }
 0x452   :  { %6529 = vrsqrt.f32 %v1043_v35 }
 0x456   :  { %v5619_v4 = vpop.f32.mrb[28].mxu1 }
 0x457   :  { %v1058_v51 = vadd.f32 1e-05, %v5619_v4  ;;  %v1052_v1 = vpop.f32.mrb[29].mxu1 }
 0x458   :  { %v1053_v61 = vadd.f32 1e-05, %v1052_v1 }
 0x459   :  { %6531 = vrsqrt.f32 %v1058_v51 }
 0x45a   :  { %6533 = vrsqrt.f32 %v1053_v61 }
 0x45b   :  { %v6528_v37 = vpop.eup %6527 }
 0x45c   :  { %v6530_v10 = vpop.eup %6529  ;;  %v7323_v62 = vmul.f32 %v6528_v37, %v7241_v42 }
 0x45d   :  { %v7326_v12 = vmul.f32 %v6530_v10, %v7243_v2 }
 0x45e   :  { %v5622_v59 = vpop.f32.mrb[30].mxu1 }
 0x45f   :  { %v1068_v44 = vadd.f32 1e-05, %v5622_v59  ;;  %v1062_v58 = vpop.f32.mrb[31].mxu1  ;;  %v6448_v41 = vpack.i.bf16 %v7323_v62, %v7326_v12 }
 0x460   :  { %v1063_v50 = vadd.f32 1e-05, %v1062_v58 }
 0x461   :  { %6535 = vrsqrt.f32 %v1068_v44  ;;  %6449 = vrot.lane.b32.xlu1 %v6448_v41, %s6691_s30 }
 0x462   :  { %6537 = vrsqrt.f32 %v1063_v50 }
 0x463   :  { %v6532_v61 = vpop.eup %6531 }
 0x464   :  { %v6534_v35 = vpop.eup %6533  ;;  %v7332_v4 = vmul.f32 %v6532_v61, %v7251_v46 }
 0x465   :  { %v7335_v42 = vmul.f32 %v6534_v35, %v7253_v49 }
 0x466   :  { %v5625_v2 = vpop.f32.mrb[32].mxu1  ;;  %v6445_v51 = vpop.permute.xlu0 %6444 }
 0x467   :  { %v1078_v1 = vadd.f32 1e-05, %v5625_v2  ;;  %v6447_v37 = vunpack.i.h.bf16 %v6445_v51  ;;  %v6446_v10 = vunpack.i.l.bf16 %v6445_v51  ;;  %v1072_v59 = vpop.f32.mrb[33].mxu1  ;;  %v6453_v58 = vpack.i.bf16 %v7332_v4, %v7335_v42 }
 0x468   :  { %v1073_v44 = vadd.f32 1e-05, %v1072_v59 }
 0x469   :  { %6539 = vrsqrt.f32 %v1078_v1  ;;  %v6219_v41 = vpack.c.bf16 %v6447_v37, %v6446_v10  ;;  %6454 = vrot.lane.b32.xlu0 %v6453_v58, %s6691_s30 }
 0x46a   :  { %6541 = vrsqrt.f32 %v1073_v44 }
 0x46b   :  { %v6536_v46 = vpop.eup %6535  ;;  %6220 = vmatprep.subr.bf16.mxu0 %v6219_v41 }
 0x46c   :  { %v6538_v50 = vpop.eup %6537  ;;  %6222 = vmatpush3.bf16.msra.mxu0 %v6219_v41  ;;  %v1134_v49 = vmul.f32 %v6536_v46, %v7261_v48 }
 0x46d   :  { %v1133_v61 = vmul.f32 %v6538_v50, %v7263_v34 }
 0x46e   :  { %v5628_v35 = vpop.f32.mrb[34].mxu1 }
 0x46f   :  { %v1088_v2 = vadd.f32 1e-05, %v5628_v35  ;;  %v1082_v51 = vpop.f32.mrb[35].mxu1  ;;  %v6458_v55 = vpack.i.bf16 %v1134_v49, %v1133_v61 }
 0x470   :  { %v1083_v21 = vadd.f32 1e-05, %v1082_v51 }
 0x471   :  { %6543 = vrsqrt.f32 %v1088_v2  ;;  %6459 = vrot.lane.b32.xlu1 %v6458_v55, %s6691_s30 }
 0x472   :  { %6545 = vrsqrt.f32 %v1083_v21 }
 0x473   :  { %v6540_v1 = vpop.eup %6539 }
 0x474   :  { %v6542_v37 = vpop.eup %6541  ;;  %v1136_v10 = vmul.f32 %v6540_v1, %v7271_v11 }
 0x475   :  { %v1135_v59 = vmul.f32 %v6542_v37, %v7273_v63 }
 0x476   :  { %v5631_v58 = vpop.f32.mrb[36].mxu1 }
 0x477   :  { %v1098_v44 = vadd.f32 1e-05, %v5631_v58  ;;  %v1092_v48 = vpop.f32.mrb[37].mxu1  ;;  %v6463_v41 = vpack.i.bf16 %v1136_v10, %v1135_v59 }
 0x478   :  { %v1093_v34 = vadd.f32 1e-05, %v1092_v48 }
 0x479   :  { %6547 = vrsqrt.f32 %v1098_v44  ;;  %6464 = vrot.lane.b32.xlu0 %v6463_v41, %s6691_s30 }
 0x47a   :  { %6549 = vrsqrt.f32 %v1093_v34 }
 0x47b   :  { %v6544_v46 = vpop.eup %6543 }
 0x47c   :  { %v6546_v50 = vpop.eup %6545  ;;  %v1138_v55 = vmul.f32 %v6544_v46, %v7281_v17 }
 0x47d   :  { %v5634_v21 = vpop.f32.mrb[38].mxu1  ;;  %v1137_v35 = vmul.f32 %v6546_v50, %v7283_v19 }
 0x47e   :  { %v1108_v2 = vadd.f32 1e-05, %v5634_v21  ;;  %v1102_v11 = vpop.f32.mrb[39].mxu1 }
 0x47f   :  { %v1103_v51 = vadd.f32 1e-05, %v1102_v11  ;;  %v6468_v63 = vpack.i.bf16 %v1138_v55, %v1137_v35 }
 0x480   :  { %6551 = vrsqrt.f32 %v1108_v2 }
 0x481   :  { %6553 = vrsqrt.f32 %v1103_v51  ;;  %6469 = vrot.lane.b32.xlu1 %v6468_v63, %s6691_s30 }
 0x483   :  { %v6548_v1 = vpop.eup %6547 }
 0x484   :  { %v6550_v37 = vpop.eup %6549  ;;  %v1140_v58 = vmul.f32 %v6548_v1, %v7291_v53 }
 0x485   :  { %v1139_v44 = vmul.f32 %v6550_v37, %v7294_v14 }
 0x487   :  { %v6473_v48 = vpack.i.bf16 %v1140_v58, %v1139_v44 }
 0x489   :  { %6474 = vrot.lane.b32.xlu0 %v6473_v48, %s6691_s30 }
 0x48a   :  { %v6552_v17 = vpop.eup %6551 }
 0x48b   :  { %v6554_v41 = vpop.eup %6553  ;;  %v1142_v19 = vmul.f32 %v6552_v17, %v7302_v60 }
 0x48c   :  { %v1141_v34 = vmul.f32 %v6554_v41, %v7305_v43 }
 0x48e   :  { %v6478_v46 = vpack.i.bf16 %v1142_v19, %v1141_v34 }
 0x490   :  { %6479 = vrot.lane.b32.xlu1 %v6478_v46, %s6691_s30 }
 0x4a7   :  { %1143 = vxpose.xlu0.b32.start [1/8] (short) (narrow) %v7317_v38, 32 }
 0x4ab   :  { %1144 = vxpose.xlu0.b32.cont [2/8] (short) (narrow) %v7314_v54, 32 }
 0x4af   :  { %1145 = vxpose.xlu0.b32.cont [3/8] (short) (narrow) %v7326_v12, 32 }
 0x4b3   :  { %1146 = vxpose.xlu0.b32.cont [4/8] (short) (narrow) %v7323_v62, 32 }
 0x4b7   :  { %1147 = vxpose.xlu0.b32.cont [5/8] (short) (narrow) %v7335_v42, 32 }
 0x4b9   :  { %1429 = vxpose.xlu1.b32.start [1/8] (short) (narrow) %v1135_v59, 32 }
 0x4bb   :  { %1148 = vxpose.xlu0.b32.cont [6/8] (short) (narrow) %v7332_v4, 32 }
 0x4bd   :  { %1430 = vxpose.xlu1.b32.cont [2/8] (short) (narrow) %v1136_v10, 32 }
 0x4bf   :  { %1149 = vxpose.xlu0.b32.cont [7/8] (short) (narrow) %v1133_v61, 32 }
 0x4c1   :  { %1431 = vxpose.xlu1.b32.cont [3/8] (short) (narrow) %v1137_v35, 32 }
 0x4c3   :  { %1150 = vxpose.xlu0.b32.end [8/8] (short) (narrow) %v1134_v49, 32 }
 0x4c5   :  { %1432 = vxpose.xlu1.b32.cont [4/8] (short) (narrow) %v1138_v55, 32 }
 0x4c9   :  { %1433 = vxpose.xlu1.b32.cont [5/8] (short) (narrow) %v1139_v44, 32 }
 0x4cd   :  { %1434 = vxpose.xlu1.b32.cont [6/8] (short) (narrow) %v1140_v58, 32 }
 0x4d1   :  { %1435 = vxpose.xlu1.b32.cont [7/8] (short) (narrow) %v1141_v34, 32 }
 0x4d3   :  { %v6450_v53 = vpop.permute.xlu1 %6449 }
 0x4d4   :  { %v6452_v14 = vunpack.i.h.bf16 %v6450_v53  ;;  %v6451_v60 = vunpack.i.l.bf16 %v6450_v53 }
 0x4d5   :  { %1436 = vxpose.xlu1.b32.end [8/8] (short) (narrow) %v1142_v19, 32 }
 0x4d6   :  { %v6223_v43 = vpack.c.bf16 %v6452_v14, %v6451_v60 }
 0x4d8   :  { %6224 = vmatprep.subr.bf16.mxu0 %v6223_v43 }
 0x4d9   :  { %6226 = vmatpush3.bf16.msra.mxu0 %v6223_v43 }
 0x4db   :  { %v6455_v54 = vpop.permute.xlu0 %6454 }
 0x4dc   :  { %v6457_v38 = vunpack.i.h.bf16 %v6455_v54  ;;  %v6456_v62 = vunpack.i.l.bf16 %v6455_v54  ;;  %v119_v54 = vld [vmem:[%s8489_s5 + $0x8] sm:$0xff] }
 0x4de   :  { %v6227_v12 = vpack.c.bf16 %v6457_v38, %v6456_v62 }
 0x4e0   :  { %6228 = vmatprep.subr.bf16.mxu0 %v6227_v12 }
 0x4e1   :  { %6230 = vmatpush3.bf16.msra.mxu0 %v6227_v12 }
 0x4e3   :  { %v6460_v4 = vpop.permute.xlu1 %6459 }
 0x4e4   :  { %v6462_v42 = vunpack.i.h.bf16 %v6460_v4  ;;  %v6461_v49 = vunpack.i.l.bf16 %v6460_v4 }
 0x4e6   :  { %v6231_v61 = vpack.c.bf16 %v6462_v42, %v6461_v49  ;;  %v121_v49 = vld [vmem:[%s8489_s5 + $0x18] sm:$0xff] }
 0x4e8   :  { %6232 = vmatprep.subr.bf16.mxu0 %v6231_v61 }
 0x4e9   :  { %6234 = vmatpush3.bf16.msra.mxu0 %v6231_v61 }
 0x4eb   :  { %v6465_v10 = vpop.permute.xlu0 %6464 }
 0x4ec   :  { %v6467_v59 = vunpack.i.h.bf16 %v6465_v10  ;;  %v6466_v50 = vunpack.i.l.bf16 %v6465_v10 }
 0x4ee   :  { %v6243_v55 = vpack.c.bf16 %v6467_v59, %v6466_v50  ;;  %v126_v50 = vld [vmem:[%s8484_s6 + $0x20] sm:$0xff] }
 0x4f0   :  { %6244 = vmatprep.subr.bf16.mxu1 %v6243_v55 }
 0x4f1   :  { %6246 = vmatpush3.bf16.msra.mxu1 %v6243_v55  ;;  %v127_v55 = vld [vmem:[%s8484_s6 + $0x28] sm:$0xff] }
 0x4f3   :  { %v6470_v21 = vpop.permute.xlu1 %6469 }
 0x4f4   :  { %v6472_v35 = vunpack.i.h.bf16 %v6470_v21  ;;  %v6471_v2 = vunpack.i.l.bf16 %v6470_v21 }
 0x4f6   :  { %v6247_v11 = vpack.c.bf16 %v6472_v35, %v6471_v2  ;;  %v6267_v2 = vpack.c.bf16 %v127_v55, %v126_v50  ;;  %v6651_v50 = vld [vmem:[%s8483_s0] sm:$0xff] }
 0x4f8   :  { %6248 = vmatprep.subr.bf16.mxu1 %v6247_v11 }
 0x4f9   :  { %6250 = vmatpush3.bf16.msra.mxu1 %v6247_v11  ;;  %v128_v11 = vld [vmem:[%s8484_s6 + $0x30] sm:$0xff] }
 0x4fb   :  { %v6475_v51 = vpop.permute.xlu0 %6474 }
 0x4fc   :  { %v6477_v63 = vunpack.i.h.bf16 %v6475_v51  ;;  %v6476_v1 = vunpack.i.l.bf16 %v6475_v51  ;;  %v129_v51 = vld [vmem:[%s8484_s6 + $0x38] sm:$0xff] }
 0x4fe   :  { %v6251_v37 = vpack.c.bf16 %v6477_v63, %v6476_v1  ;;  %v6271_v63 = vpack.c.bf16 %v129_v51, %v128_v11 }
 0x500   :  { %6252 = vmatprep.subr.bf16.mxu1 %v6251_v37 }
 0x501   :  { %6254 = vmatpush3.bf16.msra.mxu1 %v6251_v37 }
 0x502   :  { %v6480_v58 = vpop.permute.xlu1 %6479 }
 0x503   :  { %v6482_v44 = vunpack.i.h.bf16 %v6480_v58  ;;  %v6481_v48 = vunpack.i.l.bf16 %v6480_v58 }
 0x505   :  { %v6255_v17 = vpack.c.bf16 %v6482_v44, %v6481_v48 }
 0x507   :  { %6256 = vmatprep.subr.bf16.mxu1 %v6255_v17 }
 0x508   :  { %6258 = vmatpush3.bf16.msra.mxu1 %v6255_v17 }
 0x527   :  { %v1159_v41 = vpop.trf.xlu0 }
 0x528   :  { %5651 = vmatprep.mubr.msk.f32.mxu0 %vm323_vm1, %v1159_v41 }
 0x52b   :  { %v1160_v19 = vpop.trf.xlu0 }
 0x52c   :  { %5652 = vmatmul.mubr.msk.f32.vlgmr.msra.gmra.mrb[24].mxu0 %vm323_vm1, %v1160_v19 }
 0x52f   :  { %v1161_v34 = vpop.trf.xlu0 }
 0x530   :  { %5654 = vmatprep.mubr.msk.f32.mxu0 %vm323_vm1, %v1161_v34 }
 0x533   :  { %v1162_v46 = vpop.trf.xlu0 }
 0x534   :  { %5655 = vmatmul.mubr.msk.f32.gmra.mrb[26].mxu0 %vm323_vm1, %v1162_v46 }
 0x535   :  { %5665 = vmatprep.mubr.msk.f32.mxu0 %vm145_vm0, %v7022_v9  ;;  %v118_v9 = vld [vmem:[%s8489_s5] sm:$0xff] }
 0x539   :  { %v1445_v53 = vpop.trf.xlu1 }
 0x53a   :  { %5693 = vmatprep.mubr.msk.f32.mxu1 %vm323_vm1, %v1445_v53 }
 0x53d   :  { %v1446_v14 = vpop.trf.xlu1 }
 0x53e   :  { %5694 = vmatmul.mubr.msk.f32.vlgmr.msra.gmra.mrb[40].mxu1 %vm323_vm1, %v1446_v14 }
 0x541   :  { %v1447_v60 = vpop.trf.xlu1 }
 0x542   :  { %5696 = vmatprep.mubr.msk.f32.mxu1 %vm323_vm1, %v1447_v60 }
 0x545   :  { %v1448_v43 = vpop.trf.xlu1 }
 0x546   :  { %5697 = vmatmul.mubr.msk.f32.gmra.mrb[42].mxu1 %vm323_vm1, %v1448_v43 }
 0x547   :  { %5707 = vmatprep.mubr.msk.f32.mxu1 %vm145_vm0, %v7124_v40  ;;  %v120_v40 = vld [vmem:[%s8489_s5 + $0x10] sm:$0xff] }
 0x5ff   :  { %v5653_v38 = vpop.f32.mrb[24].mxu0 }
 0x600   :  { %v1305_v62 = vmul.f32 %v5653_v38, %v119_v54  ;;  %v1285_v12 = vpop.f32.mrb[25].mxu0  ;;  %v133_v38 = vld [vmem:[%s8484_s6 + $0x58] sm:$0xff] }
 0x601   :  { %v1304_v4 = vmul.f32 %v1285_v12, %v118_v9  ;;  %v134_v12 = vld [vmem:[%s8484_s6 + $0x60] sm:$0xff] }
 0x603   :  { %v6235_v42 = vpack.c.bf16 %v1305_v62, %v1304_v4  ;;  %v135_v4 = vld [vmem:[%s8484_s6 + $0x68] sm:$0xff] }
 0x605   :  { %6236 = vmatprep.subr.bf16.mxu0 %v6235_v42 }
 0x606   :  { %6238 = vmatpush3.bf16.msra.mxu0 %v6235_v42  ;;  %v6283_v42 = vpack.c.bf16 %v135_v4, %v134_v12 }
 0x607   :  { %v5656_v61 = vpop.f32.mrb[26].mxu0 }
 0x608   :  { %v1307_v10 = vmul.f32 %v5656_v61, %v121_v49  ;;  %v1295_v59 = vpop.f32.mrb[27].mxu0 }
 0x609   :  { %v1306_v21 = vmul.f32 %v1295_v59, %v120_v40 }
 0x60b   :  { %v6239_v35 = vpack.c.bf16 %v1307_v10, %v1306_v21 }
 0x60d   :  { %6240 = vmatprep.subr.bf16.mxu0 %v6239_v35 }
 0x60e   :  { %6242 = vmatpush3.bf16.msra.mxu0 %v6239_v35  ;;  %v6652_v35 = vld [vmem:[%s8483_s0 + $0x8] sm:$0xff] }
 0x60f   :  { %6268 = vmatprep.subr.bf16.mxu0 %v6267_v2 }
 0x611   :  { %5666 = vmatmul.mubr.msk.f32.vlgmr.msra.gmra.mrb[28].mxu0 %vm145_vm0, %v7020_v8  ;;  %v5695_v1 = vpop.f32.mrb[40].mxu1 }
 0x612   :  { %5668 = vmatprep.mubr.msk.f32.mxu0 %vm145_vm0, %v7056_v39  ;;  %v1591_v37 = vmul.f32 %v5695_v1, %v119_v54  ;;  %v1571_v58 = vpop.f32.mrb[41].mxu1  ;;  %6270 = vmatpush3.bf16.msra.mxu0 %v6267_v2 }
 0x613   :  { %v1590_v44 = vmul.f32 %v1571_v58, %v118_v9  ;;  %6272 = vmatprep.subr.bf16.mxu0 %v6271_v63  ;;  %v132_v9 = vld [vmem:[%s8484_s6 + $0x50] sm:$0xff] }
 0x614   :  { %v6279_v62 = vpack.c.bf16 %v133_v38, %v132_v9 }
 0x615   :  { %5669 = vmatmul.mubr.msk.f32.gmra.mrb[30].mxu0 %vm145_vm0, %v7051_v56  ;;  %v6259_v48 = vpack.c.bf16 %v1591_v37, %v1590_v44  ;;  %v130_v56 = vld [vmem:[%s8484_s6 + $0x40] sm:$0xff] }
 0x616   :  { %5671 = vmatprep.mubr.msk.f32.mxu0 %vm145_vm0, %v7078_v5  ;;  %6274 = vmatpush3.bf16.msra.mxu0 %v6271_v63 }
 0x617   :  { %6260 = vmatprep.subr.bf16.mxu1 %v6259_v48  ;;  %6284 = vmatprep.subr.bf16.mxu0 %v6283_v42 }
 0x618   :  { %6262 = vmatpush3.bf16.msra.mxu1 %v6259_v48 }
 0x619   :  { %5672 = vmatmul.mubr.msk.f32.gmra.mrb[32].mxu0 %vm145_vm0, %v7071_v3  ;;  %v5698_v8 = vpop.f32.mrb[42].mxu1  ;;  %v131_v3 = vld [vmem:[%s8484_s6 + $0x48] sm:$0xff] }
 0x61a   :  { %v1593_v39 = vmul.f32 %v5698_v8, %v121_v49  ;;  %5674 = vmatprep.mubr.msk.f32.mxu0 %vm145_vm0, %v7098_v36  ;;  %v1581_v17 = vpop.f32.mrb[43].mxu1  ;;  %v6275_v5 = vpack.c.bf16 %v131_v3, %v130_v56  ;;  %v4885_v49 = vld [vmem:[%s8484_s6 + $0xa0] ss:$0 sm:$0xff] }
 0x61b   :  { %v1592_v41 = vmul.f32 %v1581_v17, %v120_v40 }
 0x61d   :  { %v6263_v19 = vpack.c.bf16 %v1593_v39, %v1592_v41  ;;  %5675 = vmatmul.mubr.msk.f32.gmra.mrb[34].mxu0 %vm145_vm0, %v7093_v20 }
 0x61f   :  { %6264 = vmatprep.subr.bf16.mxu1 %v6263_v19 }
 0x620   :  { %6266 = vmatpush3.bf16.msra.mxu1 %v6263_v19 }
 0x621   :  { %6276 = vmatprep.subr.bf16.mxu1 %v6275_v5 }
 0x623   :  { %5708 = vmatmul.mubr.msk.f32.vlgmr.msra.gmra.mrb[44].mxu1 %vm145_vm0, %v7113_v0 }
 0x624   :  { %5710 = vmatprep.mubr.msk.f32.mxu1 %vm145_vm0, %v7148_v45  ;;  %6278 = vmatpush3.bf16.msra.mxu1 %v6275_v5 }
 0x625   :  { %6280 = vmatprep.subr.bf16.mxu1 %v6279_v62 }
 0x627   :  { %5711 = vmatmul.mubr.msk.f32.gmra.mrb[46].mxu1 %vm145_vm0, %v7143_v16 }
 0x628   :  { %5713 = vmatprep.mubr.msk.f32.mxu1 %vm145_vm0, %v7168_v47  ;;  %6282 = vmatpush3.bf16.msra.mxu1 %v6279_v62 }
 0x62b   :  { %5714 = vmatmul.mubr.msk.f32.gmra.mrb[48].mxu1 %vm145_vm0, %v7163_v57 }
 0x62c   :  { %5716 = vmatprep.mubr.msk.f32.mxu1 %vm145_vm0, %v7176_v7 }
 0x62f   :  { %5717 = vmatmul.mubr.msk.f32.gmra.mrb[50].mxu1 %vm145_vm0, %v7174_v6 }
 0x6e4   :  { %v5667_v20 = vpop.f32.mrb[28].mxu0 }
 0x6e5   :  { %v1390_v36 = vpop.f32.mrb[29].mxu0 }
 0x6e6   :  { %5727 = vmatprep.mubr.msk.f32.mxu0 %vm145_vm0, %v1390_v36  ;;  %v6653_v36 = vld [vmem:[%s8483_s0 + $0x10] sm:$0xff] }
 0x6e7   :  { %5728 = vmatmul.mubr.msk.f32.vlgmr.msra.gmra.mrb[36].mxu0 %vm145_vm0, %v5667_v20 }
 0x6e8   :  { %v5670_v0 = vpop.f32.mrb[30].mxu0  ;;  %6286 = vmatpush3.bf16.msra.mxu0 %v6283_v42  ;;  %v140_v42 = vld [vmem:[%s8484_s6 + $0x90] sm:$0xff] }
 0x6e9   :  { %v1400_v16 = vpop.f32.mrb[31].mxu0 }
 0x6ea   :  { %5730 = vmatprep.mubr.msk.f32.mxu0 %vm145_vm0, %v1400_v16 }
 0x6eb   :  { %5731 = vmatmul.mubr.msk.f32.gmra.mrb[38].mxu0 %vm145_vm0, %v5670_v0 }
 0x6ec   :  { %v5673_v45 = vpop.f32.mrb[32].mxu0 }
 0x6ed   :  { %v1410_v57 = vpop.f32.mrb[33].mxu0 }
 0x6ee   :  { %5733 = vmatprep.mubr.msk.f32.mxu0 %vm145_vm0, %v1410_v57 }
 0x6ef   :  { %5734 = vmatmul.mubr.msk.f32.gmra.mrb[40].mxu0 %vm145_vm0, %v5673_v45 }
 0x6f0   :  { %v5676_v47 = vpop.f32.mrb[34].mxu0 }
 0x6f1   :  { %v1420_v6 = vpop.f32.mrb[35].mxu0 }
 0x6f2   :  { %5736 = vmatprep.mubr.msk.f32.mxu0 %vm145_vm0, %v1420_v6 }
 0x6f3   :  { %5737 = vmatmul.mubr.msk.f32.gmra.mrb[42].mxu0 %vm145_vm0, %v5676_v47 }
 0x6f6   :  { %v5709_v7 = vpop.f32.mrb[44].mxu1 }
 0x6f7   :  { %v1676_v34 = vpop.f32.mrb[45].mxu1 }
 0x6f8   :  { %5739 = vmatprep.mubr.msk.f32.mxu0 %vm145_vm0, %v1676_v34 }
 0x6f9   :  { %5740 = vmatmul.mubr.msk.f32.gmra.mrb[44].mxu0 %vm145_vm0, %v5709_v7 }
 0x6fa   :  { %v5712_v46 = vpop.f32.mrb[46].mxu1 }
 0x6fb   :  { %v1686_v53 = vpop.f32.mrb[47].mxu1 }
 0x6fc   :  { %5742 = vmatprep.mubr.msk.f32.mxu0 %vm145_vm0, %v1686_v53 }
 0x6fd   :  { %5743 = vmatmul.mubr.msk.f32.gmra.mrb[46].mxu0 %vm145_vm0, %v5712_v46 }
 0x6fe   :  { %v5715_v14 = vpop.f32.mrb[48].mxu1 }
 0x6ff   :  { %v1696_v60 = vpop.f32.mrb[49].mxu1 }
 0x700   :  { %5745 = vmatprep.mubr.msk.f32.mxu0 %vm145_vm0, %v1696_v60 }
 0x701   :  { %5746 = vmatmul.mubr.msk.f32.gmra.mrb[48].mxu0 %vm145_vm0, %v5715_v14 }
 0x702   :  { %v5718_v43 = vpop.f32.mrb[50].mxu1 }
 0x703   :  { %v1706_v54 = vpop.f32.mrb[51].mxu1 }
 0x704   :  { %5748 = vmatprep.mubr.msk.f32.mxu0 %vm145_vm0, %v1706_v54 }
 0x705   :  { %5749 = vmatmul.mubr.msk.f32.gmra.mrb[50].mxu0 %vm145_vm0, %v5718_v43 }
 0x7ba   :  { %v5729_v40 = vpop.f32.mrb[36].mxu0 }
 0x7bb   :  { %v1839_v61 = vadd.f32 %v5729_v40, %v4885_v49  ;;  %v1833_v10 = vpop.f32.mrb[37].mxu0 }
 0x7bc   :  { %v1834_v59 = vadd.f32 %v4885_v49, %v1833_v10  ;;  %v2419_v10 = vld [vmem:[%s8484_s6 + $0xc0] sm:$0xff] }
 0x7bd   :  { %v7470_v2 = vadd.f32 %v6652_v35, %v1839_v61  ;;  %v2418_v61 = vld [vmem:[%s8484_s6 + $0xb8] sm:$0xff] }
 0x7be   :  { %v7465_v55 = vadd.f32 %v6651_v50, %v1834_v59  ;;  %v5732_v21 = vpop.f32.mrb[38].mxu0  ;;  %v2420_v59 = vld [vmem:[%s8484_s6 + $0xc8] sm:$0xff]  ;;  %v6299_v50 = vpack.c.bf16 %v2419_v10, %v2418_v61 }
 0x7bf   :  { %v1849_v11 = vadd.f32 %v5732_v21, %v4885_v49  ;;  %v1843_v51 = vpop.f32.mrb[39].mxu0  ;;  %v2421_v21 = vld [vmem:[%s8484_s6 + $0xd0] sm:$0xff] }
 0x7c0   :  { %v1844_v63 = vadd.f32 %v4885_v49, %v1843_v51  ;;  %5759 = vmatprep.mubr.msk.f32.mxu1 %vm145_vm0, %v7465_v55  ;;  %v6303_v35 = vpack.c.bf16 %v2421_v21, %v2420_v59  ;;  %6300 = vmatprep.subr.bf16.mxu1 %v6299_v50 }
 0x7c1   :  { %5760 = vmatmul.mubr.msk.f32.vlgmr.msra.gmra.mrb[52].mxu1 %vm145_vm0, %v7470_v2  ;;  %v7480_v58 = vadd.f32 %v1849_v11, %v6820_v24  ;;  %v7585_v11 = vld [vmem:[%s8484_s6 + $0xa8] ss:$0 sm:$0xff] }
 0x7c2   :  { %v7477_v1 = vadd.f32 %v1844_v63, %v6814_v22  ;;  %v5735_v37 = vpop.f32.mrb[40].mxu0  ;;  %6302 = vmatpush3.bf16.msra.mxu1 %v6299_v50 }
 0x7c3   :  { %v1859_v44 = vadd.f32 %v5735_v37, %v4885_v49  ;;  %v1853_v48 = vpop.f32.mrb[41].mxu0  ;;  %6304 = vmatprep.subr.bf16.mxu1 %v6303_v35 }
 0x7c4   :  { %v1854_v8 = vadd.f32 %v4885_v49, %v1853_v48  ;;  %5762 = vmatprep.mubr.msk.f32.mxu1 %vm145_vm0, %v7477_v1 }
 0x7c5   :  { %5763 = vmatmul.mubr.msk.f32.gmra.mrb[54].mxu1 %vm145_vm0, %v7480_v58  ;;  %v7490_v22 = vadd.f32 %v1859_v44, %v6822_v25 }
 0x7c6   :  { %v7487_v39 = vadd.f32 %v1854_v8, %v6816_v23  ;;  %v5738_v17 = vpop.f32.mrb[42].mxu0  ;;  %6306 = vmatpush3.bf16.msra.mxu1 %v6303_v35 }
 0x7c7   :  { %v1869_v41 = vadd.f32 %v5738_v17, %v4885_v49  ;;  %v1863_v19 = vpop.f32.mrb[43].mxu0  ;;  %6324 = vmatprep.subr.bf16.mxu1 %v6964_v52 }
 0x7c8   :  { %v1864_v24 = vadd.f32 %v4885_v49, %v1863_v19  ;;  %5765 = vmatprep.mubr.msk.f32.mxu1 %vm145_vm0, %v7487_v39 }
 0x7c9   :  { %5766 = vmatmul.mubr.msk.f32.gmra.mrb[56].mxu1 %vm145_vm0, %v7490_v22  ;;  %v7500_v3 = vadd.f32 %v1869_v41, %v6830_v27  ;;  %v6654_v27 = vld [vmem:[%s8483_s0 + $0x18] sm:$0xff] }
 0x7ca   :  { %v7497_v56 = vadd.f32 %v1864_v24, %v6828_v26 }
 0x7cc   :  { %v5741_v23 = vpop.f32.mrb[44].mxu0  ;;  %5768 = vmatprep.mubr.msk.f32.mxu1 %vm145_vm0, %v7497_v56 }
 0x7cd   :  { %v1879_v25 = vadd.f32 %v5741_v23, %v4885_v49  ;;  %v1873_v5 = vpop.f32.mrb[45].mxu0  ;;  %5769 = vmatmul.mubr.msk.f32.gmra.mrb[58].mxu1 %vm145_vm0, %v7500_v3 }
 0x7ce   :  { %v1874_v20 = vadd.f32 %v4885_v49, %v1873_v5 }
 0x7cf   :  { %v7514_v16 = vadd.f32 %v6654_v27, %v1879_v25 }
 0x7d0   :  { %v7509_v0 = vadd.f32 %v6653_v36, %v1874_v20  ;;  %v5744_v26 = vpop.f32.mrb[46].mxu0 }
 0x7d1   :  { %v1889_v45 = vadd.f32 %v5744_v26, %v4885_v49  ;;  %v1883_v57 = vpop.f32.mrb[47].mxu0 }
 0x7d2   :  { %v1884_v47 = vadd.f32 %v4885_v49, %v1883_v57  ;;  %5771 = vmatprep.mubr.msk.f32.mxu1 %vm145_vm0, %v7509_v0 }
 0x7d3   :  { %5772 = vmatmul.mubr.msk.f32.gmra.mrb[60].mxu1 %vm145_vm0, %v7514_v16  ;;  %v7524_v34 = vadd.f32 %v1889_v45, %v6838_v29 }
 0x7d4   :  { %v7521_v6 = vadd.f32 %v1884_v47, %v6836_v28  ;;  %v5747_v7 = vpop.f32.mrb[48].mxu0 }
 0x7d5   :  { %v1899_v46 = vadd.f32 %v5747_v7, %v4885_v49  ;;  %v1893_v53 = vpop.f32.mrb[49].mxu0 }
 0x7d6   :  { %v1894_v14 = vadd.f32 %v4885_v49, %v1893_v53  ;;  %5774 = vmatprep.mubr.msk.f32.mxu1 %vm145_vm0, %v7521_v6 }
 0x7d7   :  { %5775 = vmatmul.mubr.msk.f32.gmra.mrb[62].mxu1 %vm145_vm0, %v7524_v34  ;;  %v7534_v28 = vadd.f32 %v1899_v46, %v6848_v31  ;;  %v137_v31 = vld [vmem:[%s8484_s6 + $0x78] sm:$0xff] }
 0x7d8   :  { %v7531_v60 = vadd.f32 %v1894_v14, %v6846_v30  ;;  %v5750_v43 = vpop.f32.mrb[50].mxu0  ;;  %v136_v30 = vld [vmem:[%s8484_s6 + $0x70] sm:$0xff] }
 0x7d9   :  { %v1909_v54 = vadd.f32 %v5750_v43, %v4885_v49  ;;  %v1903_v9 = vpop.f32.mrb[51].mxu0  ;;  %v6287_v12 = vpack.c.bf16 %v137_v31, %v136_v30 }
 0x7da   :  { %v1904_v29 = vadd.f32 %v4885_v49, %v1903_v9  ;;  %5777 = vmatprep.mubr.msk.f32.mxu1 %vm145_vm0, %v7531_v60  ;;  %v141_v49 = vld [vmem:[%s8484_s6 + $0x98] sm:$0xff] }
 0x7db   :  { %5778 = vmatmul.mubr.msk.f32.gmra.mrb[64].mxu1 %vm145_vm0, %v7534_v28  ;;  %v7544_v62 = vadd.f32 %v1909_v54, %v6856_v33  ;;  %6288 = vmatprep.subr.bf16.mxu0 %v6287_v12  ;;  %v139_v33 = vld [vmem:[%s8484_s6 + $0x88] sm:$0xff]  ;;  %v6295_v40 = vpack.c.bf16 %v141_v49, %v140_v42 }
 0x7dc   :  { %v7541_v38 = vadd.f32 %v1904_v29, %v6854_v32  ;;  %6290 = vmatpush3.bf16.msra.mxu0 %v6287_v12  ;;  %v138_v32 = vld [vmem:[%s8484_s6 + $0x80] sm:$0xff] }
 0x7dd   :  { %v6291_v4 = vpack.c.bf16 %v139_v33, %v138_v32 }
 0x7de   :  { %5780 = vmatprep.mubr.msk.f32.mxu1 %vm145_vm0, %v7541_v38 }
 0x7df   :  { %5781 = vmatmul.mubr.msk.f32.gmra.mrb[66].mxu1 %vm145_vm0, %v7544_v62  ;;  %6292 = vmatprep.subr.bf16.mxu0 %v6291_v4 }
 0x7e0   :  { %6294 = vmatpush3.bf16.msra.mxu0 %v6291_v4 }
 0x7e1   :  { %6296 = vmatprep.subr.bf16.mxu0 %v6295_v40 }
 0x7e4   :  { %6298 = vmatpush3.bf16.msra.mxu0 %v6295_v40 }
 0x7e5   :  { %6308 = vmatprep.subr.bf16.mxu0 %v6777_v13 }
 0x894   :  { %v5761_v51 = vpop.f32.mrb[52].mxu1 }
 0x895   :  { %v2052_v63 = vadd.f32 %v5761_v51, %v7585_v11  ;;  %v2046_v37 = vpop.f32.mrb[53].mxu1 }
 0x896   :  { %v2047_v44 = vadd.f32 %v7585_v11, %v2046_v37 }
 0x897   :  { %v2142_v48 = vmul.f32 0.70710677, %v2052_v63  ;;  %v2126_v31 = vmul.f32 0.5, %v2052_v63 }
 0x898   :  { %v2141_v8 = vmul.f32 0.70710677, %v2047_v44  ;;  %v5764_v17 = vpop.f32.mrb[54].mxu1  ;;  %v2125_v29 = vmul.f32 0.5, %v2047_v44 }
 0x899   :  { %6555 = verf.f32 %v2142_v48  ;;  %v2062_v41 = vadd.f32 %v5764_v17, %v7585_v11  ;;  %v2056_v19 = vpop.f32.mrb[55].mxu1 }
 0x89a   :  { %6557 = verf.f32 %v2141_v8  ;;  %v2057_v24 = vadd.f32 %v7585_v11, %v2056_v19 }
 0x89b   :  { %v2144_v23 = vmul.f32 0.70710677, %v2062_v41  ;;  %v2128_v35 = vmul.f32 0.5, %v2062_v41 }
 0x89c   :  { %v2143_v25 = vmul.f32 0.70710677, %v2057_v24  ;;  %v5767_v5 = vpop.f32.mrb[56].mxu1  ;;  %v2127_v59 = vmul.f32 0.5, %v2057_v24 }
 0x89d   :  { %6559 = verf.f32 %v2144_v23  ;;  %v2072_v20 = vadd.f32 %v5767_v5, %v7585_v11  ;;  %v2066_v36 = vpop.f32.mrb[57].mxu1 }
 0x89e   :  { %6561 = verf.f32 %v2143_v25  ;;  %v2067_v26 = vadd.f32 %v7585_v11, %v2066_v36 }
 0x89f   :  { %v2146_v27 = vmul.f32 0.70710677, %v2072_v20  ;;  %v2130_v36 = vmul.f32 0.5, %v2072_v20 }
 0x8a0   :  { %v2145_v45 = vmul.f32 0.70710677, %v2067_v26  ;;  %v5770_v57 = vpop.f32.mrb[58].mxu1  ;;  %v2129_v23 = vmul.f32 0.5, %v2067_v26 }
 0x8a1   :  { %6563 = verf.f32 %v2146_v27  ;;  %v7594_v47 = vadd.f32 %v5770_v57, %v7585_v11  ;;  %v2076_v7 = vpop.f32.mrb[59].mxu1 }
 0x8a2   :  { %6565 = verf.f32 %v2145_v45  ;;  %v2077_v46 = vadd.f32 %v7585_v11, %v2076_v7 }
 0x8a3   :  { %v6556_v53 = vpop.eup %6555  ;;  %v2148_v14 = vmul.f32 0.70710677, %v7594_v47 }
 0x8a4   :  { %v6558_v43 = vpop.eup %6557  ;;  %v2174_v54 = vadd.f32 1.0, %v6556_v53  ;;  %v2147_v9 = vmul.f32 0.70710677, %v2077_v46  ;;  %v2131_v20 = vmul.f32 0.5, %v2077_v46 }
 0x8a5   :  { %v2173_v30 = vadd.f32 1.0, %v6558_v43  ;;  %6567 = verf.f32 %v2148_v14 }
 0x8a6   :  { %6569 = verf.f32 %v2147_v9  ;;  %v5773_v12 = vpop.f32.mrb[60].mxu1  ;;  %v2190_v40 = vmul.f32 %v2174_v54, %v2126_v31 }
 0x8a7   :  { %v6560_v32 = vpop.eup %6559  ;;  %v2189_v33 = vmul.f32 %v2173_v30, %v2125_v29  ;;  %v7599_v4 = vadd.f32 %v5773_v12, %v7585_v11  ;;  %v2086_v42 = vpop.f32.mrb[61].mxu1  ;;  %v2132_v30 = vmul.f32 0.5, %v7594_v47 }
 0x8a8   :  { %v6562_v49 = vpop.eup %6561  ;;  %v2176_v61 = vadd.f32 1.0, %v6560_v32  ;;  %v7602_v10 = vadd.f32 %v7585_v11, %v2086_v42 }
 0x8a9   :  { %v2175_v50 = vadd.f32 1.0, %v6562_v49  ;;  %v2150_v21 = vmul.f32 0.70710677, %v7599_v4  ;;  %5799 = vmatprep.mubr.msk.f32.mxu0 %vm323_vm1, %v2189_v33  ;;  %v8503_v49 = vld [vmem:[#allocation2_spill] sm:$0xff] }
 0x8aa   :  { %v2149_v51 = vmul.f32 0.70710677, %v7602_v10  ;;  %v5776_v63 = vpop.f32.mrb[62].mxu1  ;;  %5800 = vmatmul.mubr.msk.f32.vlgmr.msra.gmra.mrb[52].mxu0 %vm323_vm1, %v2190_v40  ;;  %v2192_v19 = vmul.f32 %v2176_v61, %v2128_v35 }
 0x8ab   :  { %v6564_v37 = vpop.eup %6563  ;;  %v2191_v44 = vmul.f32 %v2175_v50, %v2127_v59  ;;  %6571 = verf.f32 %v2150_v21  ;;  %v7609_v48 = vadd.f32 %v5776_v63, %v7585_v11  ;;  %v2096_v8 = vpop.f32.mrb[63].mxu1  ;;  %6310 = vmatpush3.bf16.msra.mxu0 %v6777_v13  ;;  %v2133_v21 = vmul.f32 0.5, %v7602_v10 }
 0x8ac   :  { %v6566_v17 = vpop.eup %6565  ;;  %v2178_v24 = vadd.f32 1.0, %v6564_v37  ;;  %6573 = verf.f32 %v2149_v51  ;;  %v2097_v41 = vadd.f32 %v7585_v11, %v2096_v8  ;;  %6312 = vmatprep.subr.bf16.mxu0 %v6782_v15 }
 0x8ad   :  { %v2177_v25 = vadd.f32 1.0, %v6566_v17  ;;  %v2152_v5 = vmul.f32 0.70710677, %v7609_v48  ;;  %5802 = vmatprep.mubr.msk.f32.mxu0 %vm323_vm1, %v2191_v44  ;;  %v2136_v10 = vmul.f32 0.5, %v7609_v48 }
 0x8ae   :  { %v2151_v27 = vmul.f32 0.70710677, %v2097_v41  ;;  %v5779_v45 = vpop.f32.mrb[64].mxu1  ;;  %5803 = vmatmul.mubr.msk.f32.gmra.mrb[54].mxu0 %vm323_vm1, %v2192_v19  ;;  %v2194_v26 = vmul.f32 %v2178_v24, %v2130_v36  ;;  %v2135_v8 = vmul.f32 0.5, %v2097_v41 }
 0x8af   :  { %v6568_v13 = vpop.eup %6567  ;;  %v2193_v57 = vmul.f32 %v2177_v25, %v2129_v23  ;;  %6575 = verf.f32 %v2152_v5  ;;  %v2112_v7 = vadd.f32 %v5779_v45, %v7585_v11  ;;  %v2106_v53 = vpop.f32.mrb[65].mxu1  ;;  %6314 = vmatpush3.bf16.msra.mxu0 %v6782_v15 }
 0x8b0   :  { %v6570_v14 = vpop.eup %6569  ;;  %v2180_v43 = vadd.f32 1.0, %v6568_v13  ;;  %6577 = verf.f32 %v2151_v27  ;;  %v2107_v54 = vadd.f32 %v7585_v11, %v2106_v53  ;;  %6316 = vmatprep.subr.bf16.mxu0 %v6795_v18 }
 0x8b1   :  { %v2179_v9 = vadd.f32 1.0, %v6570_v14  ;;  %v2154_v29 = vmul.f32 0.70710677, %v2112_v7  ;;  %5805 = vmatprep.mubr.msk.f32.mxu0 %vm323_vm1, %v2193_v57  ;;  %v2138_v27 = vmul.f32 0.5, %v2112_v7  ;;  %v7646_v7 = vld [vmem:[%s8484_s6 + $0xb0] ss:$0 sm:$0xff] }
 0x8b2   :  { %v2153_v31 = vmul.f32 0.70710677, %v2107_v54  ;;  %v5782_v12 = vpop.f32.mrb[66].mxu1  ;;  %5806 = vmatmul.mubr.msk.f32.gmra.mrb[56].mxu0 %vm323_vm1, %v2194_v26  ;;  %v2196_v42 = vmul.f32 %v2180_v43, %v2132_v30  ;;  %v2137_v5 = vmul.f32 0.5, %v2107_v54 }
 0x8b3   :  { %v2195_v15 = vmul.f32 %v2179_v9, %v2131_v20  ;;  %6579 = verf.f32 %v2154_v29  ;;  %v2122_v32 = vadd.f32 %v5782_v12, %v7585_v11  ;;  %v2116_v33 = vpop.f32.mrb[67].mxu1  ;;  %6318 = vmatpush3.bf16.msra.mxu0 %v6795_v18  ;;  %v2134_v18 = vmul.f32 0.5, %v7599_v4 }
 0x8b4   :  { %6581 = verf.f32 %v2153_v31  ;;  %v2117_v46 = vadd.f32 %v7585_v11, %v2116_v33  ;;  %6320 = vmatprep.subr.bf16.mxu0 %v8503_v49 }
 0x8b5   :  { %v6572_v40 = vpop.eup %6571  ;;  %v2156_v61 = vmul.f32 0.70710677, %v2122_v32  ;;  %5808 = vmatprep.mubr.msk.f32.mxu0 %vm323_vm1, %v2195_v15  ;;  %v2140_v26 = vmul.f32 0.5, %v2122_v32 }
 0x8b6   :  { %v6574_v47 = vpop.eup %6573  ;;  %v2182_v59 = vadd.f32 1.0, %v6572_v40  ;;  %v2155_v50 = vmul.f32 0.70710677, %v2117_v46  ;;  %5809 = vmatmul.mubr.msk.f32.gmra.mrb[58].mxu0 %vm323_vm1, %v2196_v42  ;;  %v2139_v48 = vmul.f32 0.5, %v2117_v46 }
 0x8b7   :  { %v2181_v35 = vadd.f32 1.0, %v6574_v47  ;;  %6583 = verf.f32 %v2156_v61  ;;  %6322 = vmatpush3.bf16.msra.mxu0 %v8503_v49  ;;  %v8504_v61 = vld [vmem:[#allocation3_spill] sm:$0xff] }
 0x8b8   :  { %6585 = verf.f32 %v2155_v50  ;;  %6340 = vmatprep.subr.bf16.mxu0 %v6964_v52  ;;  %v2198_v37 = vmul.f32 %v2182_v59, %v2134_v18 }
 0x8b9   :  { %v6576_v11 = vpop.eup %6575  ;;  %v2197_v51 = vmul.f32 %v2181_v35, %v2133_v21  ;;  %v8505_v35 = vld [vmem:[#allocation4_spill] sm:$0xff] }
 0x8ba   :  { %v6578_v63 = vpop.eup %6577  ;;  %v2184_v44 = vadd.f32 1.0, %v6576_v11  ;;  %v8506_v11 = vld [vmem:[#allocation5_spill] sm:$0xff] }
 0x8bb   :  { %v2183_v17 = vadd.f32 1.0, %v6578_v63  ;;  %5811 = vmatprep.mubr.msk.f32.mxu0 %vm323_vm1, %v2197_v51 }
 0x8bc   :  { %5812 = vmatmul.mubr.msk.f32.gmra.mrb[60].mxu0 %vm323_vm1, %v2198_v37  ;;  %v2200_v4 = vmul.f32 %v2184_v44, %v2136_v10 }
 0x8bd   :  { %v6580_v19 = vpop.eup %6579  ;;  %v2199_v24 = vmul.f32 %v2183_v17, %v2135_v8 }
 0x8be   :  { %v6582_v23 = vpop.eup %6581  ;;  %v2186_v25 = vadd.f32 1.0, %v6580_v19 }
 0x8bf   :  { %v2185_v36 = vadd.f32 1.0, %v6582_v23  ;;  %5814 = vmatprep.mubr.msk.f32.mxu0 %vm323_vm1, %v2199_v24 }
 0x8c0   :  { %5815 = vmatmul.mubr.msk.f32.gmra.mrb[62].mxu0 %vm323_vm1, %v2200_v4  ;;  %v2202_v57 = vmul.f32 %v2186_v25, %v2138_v27 }
 0x8c1   :  { %v6584_v41 = vpop.eup %6583  ;;  %v2201_v45 = vmul.f32 %v2185_v36, %v2137_v5 }
 0x8c2   :  { %v6586_v13 = vpop.eup %6585  ;;  %v2188_v53 = vadd.f32 1.0, %v6584_v41 }
 0x8c3   :  { %v2187_v14 = vadd.f32 1.0, %v6586_v13  ;;  %5817 = vmatprep.mubr.msk.f32.mxu0 %vm323_vm1, %v2201_v45 }
 0x8c4   :  { %5818 = vmatmul.mubr.msk.f32.gmra.mrb[64].mxu0 %vm323_vm1, %v2202_v57  ;;  %v2204_v54 = vmul.f32 %v2188_v53, %v2140_v26 }
 0x8c5   :  { %v2203_v43 = vmul.f32 %v2187_v14, %v2139_v48 }
 0x8c7   :  { %5820 = vmatprep.mubr.msk.f32.mxu0 %vm323_vm1, %v2203_v43 }
 0x8c8   :  { %5821 = vmatmul.mubr.msk.f32.gmra.mrb[66].mxu0 %vm323_vm1, %v2204_v54 }
 0x97d   :  { %v5801_v20 = vpop.f32.mrb[52].mxu0 }
 0x97e   :  { %v2329_v9 = vadd.f32 %v5801_v20, %v7646_v7  ;;  %v2323_v29 = vpop.f32.mrb[53].mxu0 }
 0x97f   :  { %v2324_v30 = vadd.f32 %v7646_v7, %v2323_v29 }
 0x980   :  { %v7654_v15 = vadd.f32 %v2329_v9, %v7470_v2 }
 0x981   :  { %v7651_v31 = vadd.f32 %v2324_v30, %v7465_v55  ;;  %v5804_v12 = vpop.f32.mrb[54].mxu0 }
 0x982   :  { %v2339_v32 = vadd.f32 %v5804_v12, %v7646_v7  ;;  %v2333_v33 = vpop.f32.mrb[55].mxu0  ;;  %v6655_v12 = vld [vmem:[%s8487_s1 + $0x8] sm:$0xff] }
 0x983   :  { %v2334_v42 = vadd.f32 %v7646_v7, %v2333_v33  ;;  %5831 = vmatprep.mubr.msk.f32.mxu1 %vm145_vm0, %v7651_v31  ;;  %v6656_v33 = vld [vmem:[%s8488_s2 + $0x8] sm:$0xff] }
 0x984   :  { %5832 = vmatmul.mubr.msk.f32.vlgmr.msra.gmra.mrb[68].mxu1 %vm145_vm0, %v7654_v15  ;;  %v7667_v2 = vadd.f32 %v2339_v32, %v7480_v58 }
 0x985   :  { %v7663_v46 = vadd.f32 %v2334_v42, %v7477_v1  ;;  %v5807_v55 = vpop.f32.mrb[56].mxu0  ;;  %6326 = vmatpush3.bf16.msra.mxu1 %v6964_v52 }
 0x986   :  { %v2349_v49 = vadd.f32 %v5807_v55, %v7646_v7  ;;  %v2343_v40 = vpop.f32.mrb[57].mxu0  ;;  %6328 = vmatprep.subr.bf16.mxu1 %v8504_v61 }
 0x987   :  { %v2344_v47 = vadd.f32 %v7646_v7, %v2343_v40  ;;  %5834 = vmatprep.mubr.msk.f32.mxu1 %vm145_vm0, %v7663_v46 }
 0x988   :  { %5835 = vmatmul.mubr.msk.f32.gmra.mrb[70].mxu1 %vm145_vm0, %v7667_v2  ;;  %v7681_v58 = vadd.f32 %v2349_v49, %v7490_v22  ;;  %v6657_v49 = vld [vmem:[%s8487_s1] sm:$0xff] }
 0x989   :  { %v7677_v1 = vadd.f32 %v2344_v47, %v7487_v39  ;;  %v5810_v59 = vpop.f32.mrb[58].mxu0  ;;  %6330 = vmatpush3.bf16.msra.mxu1 %v8504_v61 }
 0x98a   :  { %v2359_v50 = vadd.f32 %v5810_v59, %v7646_v7  ;;  %v2353_v21 = vpop.f32.mrb[59].mxu0  ;;  %6332 = vmatprep.subr.bf16.mxu1 %v8505_v35 }
 0x98b   :  { %v2354_v18 = vadd.f32 %v7646_v7, %v2353_v21  ;;  %5837 = vmatprep.mubr.msk.f32.mxu1 %vm145_vm0, %v7677_v1 }
 0x98c   :  { %5838 = vmatmul.mubr.msk.f32.gmra.mrb[72].mxu1 %vm145_vm0, %v7681_v58  ;;  %v7695_v22 = vadd.f32 %v2359_v50, %v7500_v3 }
 0x98d   :  { %v7691_v39 = vadd.f32 %v2354_v18, %v7497_v56  ;;  %6334 = vmatpush3.bf16.msra.mxu1 %v8505_v35 }
 0x98e   :  { %6336 = vmatprep.subr.bf16.mxu1 %v8506_v11 }
 0x98f   :  { %v5813_v51 = vpop.f32.mrb[60].mxu0  ;;  %5840 = vmatprep.mubr.msk.f32.mxu1 %vm145_vm0, %v7691_v39 }
 0x990   :  { %v2369_v63 = vadd.f32 %v5813_v51, %v7646_v7  ;;  %v2363_v37 = vpop.f32.mrb[61].mxu0  ;;  %5841 = vmatmul.mubr.msk.f32.gmra.mrb[74].mxu1 %vm145_vm0, %v7695_v22 }
 0x991   :  { %v2364_v56 = vadd.f32 %v7646_v7, %v2363_v37  ;;  %6338 = vmatpush3.bf16.msra.mxu1 %v8506_v11  ;;  %v6661_v37 = vld [vmem:[%s8487_s1 + $0x10] sm:$0xff] }
 0x992   :  { %v7709_v8 = vadd.f32 %v2369_v63, %v7514_v16 }
 0x993   :  { %v7706_v44 = vadd.f32 %v2364_v56, %v7509_v0  ;;  %v5816_v3 = vpop.f32.mrb[62].mxu0 }
 0x994   :  { %v2379_v17 = vadd.f32 %v5816_v3, %v7646_v7  ;;  %v2373_v10 = vpop.f32.mrb[63].mxu0  ;;  %v6662_v3 = vld [vmem:[%s8488_s2 + $0x10] sm:$0xff] }
 0x995   :  { %v2374_v19 = vadd.f32 %v7646_v7, %v2373_v10  ;;  %5843 = vmatprep.mubr.msk.f32.mxu1 %vm145_vm0, %v7706_v44 }
 0x996   :  { %5844 = vmatmul.mubr.msk.f32.gmra.mrb[76].mxu1 %vm145_vm0, %v7709_v8  ;;  %v7721_v23 = vadd.f32 %v2379_v17, %v7524_v34 }
 0x997   :  { %v7718_v24 = vadd.f32 %v2374_v19, %v7521_v6  ;;  %v5819_v0 = vpop.f32.mrb[64].mxu0 }
 0x998   :  { %v2389_v16 = vadd.f32 %v5819_v0, %v7646_v7  ;;  %v2383_v4 = vpop.f32.mrb[65].mxu0 }
 0x999   :  { %v2384_v25 = vadd.f32 %v7646_v7, %v2383_v4  ;;  %5846 = vmatprep.mubr.msk.f32.mxu1 %vm145_vm0, %v7718_v24 }
 0x99a   :  { %5847 = vmatmul.mubr.msk.f32.gmra.mrb[78].mxu1 %vm145_vm0, %v7721_v23  ;;  %v7733_v36 = vadd.f32 %v2389_v16, %v7534_v28  ;;  %v6663_v16 = vld [vmem:[%s8487_s1 + $0x28] sm:$0xff] }
 0x99b   :  { %v7730_v5 = vadd.f32 %v2384_v25, %v7531_v60  ;;  %v5822_v6 = vpop.f32.mrb[66].mxu0  ;;  %v6664_v25 = vld [vmem:[%s8488_s2 + $0x28] sm:$0xff] }
 0x99c   :  { %v2399_v34 = vadd.f32 %v5822_v6, %v7646_v7  ;;  %v2393_v27 = vpop.f32.mrb[67].mxu0 }
 0x99d   :  { %v2394_v41 = vadd.f32 %v7646_v7, %v2393_v27  ;;  %5849 = vmatprep.mubr.msk.f32.mxu1 %vm145_vm0, %v7730_v5  ;;  %v6665_v27 = vld [vmem:[%s8487_s1 + $0x20] sm:$0xff] }
 0x99e   :  { %5850 = vmatmul.mubr.msk.f32.gmra.mrb[80].mxu1 %vm145_vm0, %v7733_v36  ;;  %v7745_v60 = vadd.f32 %v2399_v34, %v7544_v62 }
 0x99f   :  { %v7742_v45 = vadd.f32 %v2394_v41, %v7541_v38 }
 0x9a1   :  { %5852 = vmatprep.mubr.msk.f32.mxu1 %vm145_vm0, %v7742_v45 }
 0x9a2   :  { %5853 = vmatmul.mubr.msk.f32.gmra.mrb[82].mxu1 %vm145_vm0, %v7745_v60 }
 0xa57   :  { %v5833_v28 = vpop.f32.mrb[68].mxu1 }
 0xa58   :  { %2941 = vrot.lane.b32.xlu1 %v5833_v28, %s6691_s30  ;;  %v2555_v13 = vpop.f32.mrb[69].mxu1  ;;  %v2828_v32 = vmul.f32 %v6655_v12, %v5833_v28 }
 0xa59   :  { %5871 = vmatprep.mubr.msk.f32.mxu0 %vm323_vm1, %v2555_v13  ;;  %v2827_v40 = vmul.f32 %v6657_v49, %v2555_v13  ;;  %v6670_v49 = vld [vmem:[%s8488_s2 + $0x30] sm:$0xff] }
 0xa5a   :  { %5872 = vmatmul.mubr.msk.f32.vlgmr.msra.gmra.mrb[68].mxu0 %vm323_vm1, %v5833_v28  ;;  %v6666_v28 = vld [vmem:[%s8488_s2 + $0x20] sm:$0xff] }
 0xa5b   :  { %v7754_v57 = vpop.f32.mrb[70].mxu1  ;;  %6342 = vmatpush3.bf16.msra.mxu0 %v6964_v52 }
 0xa5c   :  { %2939 = vrot.lane.b32.xlu1 %v2555_v13, %s6691_s30  ;;  %v7758_v38 = vpop.f32.mrb[71].mxu1  ;;  %6344 = vmatprep.subr.bf16.mxu0 %v8504_v61 }
 0xa5d   :  { %5874 = vmatprep.mubr.msk.f32.mxu0 %vm323_vm1, %v7758_v38  ;;  %v2829_v56 = vmul.f32 %v6661_v37, %v7758_v38  ;;  %v6674_v37 = vld [vmem:[%s8488_s2 + $0x40] sm:$0xff] }
 0xa5e   :  { %5875 = vmatmul.mubr.msk.f32.gmra.mrb[70].mxu0 %vm323_vm1, %v7754_v57 }
 0xa5f   :  { %v7765_v62 = vpop.f32.mrb[72].mxu1  ;;  %6346 = vmatpush3.bf16.msra.mxu0 %v8504_v61  ;;  %v6658_v61 = vld [vmem:[%s8488_s2] sm:$0xff] }
 0xa60   :  { %2945 = vrot.lane.b32.xlu1 %v7754_v57, %s6691_s30  ;;  %v7770_v52 = vpop.f32.mrb[73].mxu1  ;;  %6348 = vmatprep.subr.bf16.mxu0 %v8505_v35  ;;  %v2832_v4 = vmul.f32 %v6663_v16, %v7765_v62 }
 0xa61   :  { %5877 = vmatprep.mubr.msk.f32.mxu0 %vm323_vm1, %v7770_v52  ;;  %v2831_v41 = vmul.f32 %v6665_v27, %v7770_v52  ;;  %v6678_v27 = vld [vmem:[%s8488_s2 + $0x50] sm:$0xff] }
 0xa62   :  { %5878 = vmatmul.mubr.msk.f32.gmra.mrb[72].mxu0 %vm323_vm1, %v7765_v62 }
 0xa63   :  { %v7777_v53 = vpop.f32.mrb[74].mxu1  ;;  %6350 = vmatpush3.bf16.msra.mxu0 %v8505_v35  ;;  %v6659_v35 = vld [vmem:[%s8487_s1 + $0x18] sm:$0xff] }
 0xa64   :  { %2943 = vrot.lane.b32.xlu1 %v7758_v38, %s6691_s30  ;;  %v7782_v48 = vpop.f32.mrb[75].mxu1  ;;  %6352 = vmatprep.subr.bf16.mxu0 %v8506_v11  ;;  %v2830_v18 = vmul.f32 %v6659_v35, %v7754_v57 }
 0xa65   :  { %5880 = vmatprep.mubr.msk.f32.mxu0 %vm323_vm1, %v7782_v48 }
 0xa66   :  { %5881 = vmatmul.mubr.msk.f32.gmra.mrb[74].mxu0 %vm323_vm1, %v7777_v53 }
 0xa67   :  { %6354 = vmatpush3.bf16.msra.mxu0 %v8506_v11  ;;  %v6660_v11 = vld [vmem:[%s8488_s2 + $0x18] sm:$0xff] }
 0xa68   :  { %2949 = vrot.lane.b32.xlu1 %v7765_v62, %s6691_s30 }
 0xa69   :  { %v7792_v14 = vpop.f32.mrb[76].mxu1 }
 0xa6a   :  { %v7794_v26 = vpop.f32.mrb[77].mxu1 }
 0xa6b   :  { %5883 = vmatprep.mubr.msk.f32.mxu0 %vm323_vm1, %v7794_v26 }
 0xa6c   :  { %2947 = vrot.lane.b32.xlu1 %v7770_v52, %s6691_s30  ;;  %5884 = vmatmul.mubr.msk.f32.gmra.mrb[76].mxu0 %vm323_vm1, %v7792_v14  ;;  %v6668_v52 = vld [vmem:[%s8488_s2 + $0x38] sm:$0xff] }
 0xa6d   :  { %v7802_v43 = vpop.f32.mrb[78].mxu1 }
 0xa6e   :  { %v7804_v54 = vpop.f32.mrb[79].mxu1 }
 0xa6f   :  { %5886 = vmatprep.mubr.msk.f32.mxu0 %vm323_vm1, %v7804_v54 }
 0xa70   :  { %2953 = vrot.lane.b32.xlu1 %v7777_v53, %s6691_s30  ;;  %5887 = vmatmul.mubr.msk.f32.gmra.mrb[78].mxu0 %vm323_vm1, %v7802_v43 }
 0xa71   :  { %v7812_v7 = vpop.f32.mrb[80].mxu1 }
 0xa72   :  { %v7814_v20 = vpop.f32.mrb[81].mxu1 }
 0xa73   :  { %5889 = vmatprep.mubr.msk.f32.mxu0 %vm323_vm1, %v7814_v20 }
 0xa74   :  { %2951 = vrot.lane.b32.xlu1 %v7782_v48, %s6691_s30  ;;  %5890 = vmatmul.mubr.msk.f32.gmra.mrb[80].mxu0 %vm323_vm1, %v7812_v7 }
 0xa75   :  { %v7822_v9 = vpop.f32.mrb[82].mxu1 }
 0xa76   :  { %v7824_v29 = vpop.f32.mrb[83].mxu1 }
 0xa77   :  { %5892 = vmatprep.mubr.msk.f32.mxu0 %vm323_vm1, %v7824_v29 }
 0xa78   :  { %2957 = vrot.lane.b32.xlu1 %v7792_v14, %s6691_s30  ;;  %5893 = vmatmul.mubr.msk.f32.gmra.mrb[82].mxu0 %vm323_vm1, %v7822_v9 }
 0xa7c   :  { %2955 = vrot.lane.b32.xlu1 %v7794_v26, %s6691_s30 }
 0xa80   :  { %2961 = vrot.lane.b32.xlu1 %v7802_v43, %s6691_s30 }
 0xa84   :  { %2959 = vrot.lane.b32.xlu1 %v7804_v54, %s6691_s30 }
 0xa88   :  { %2965 = vrot.lane.b32.xlu1 %v7812_v7, %s6691_s30 }
 0xa8c   :  { %2963 = vrot.lane.b32.xlu1 %v7814_v20, %s6691_s30 }
 0xa90   :  { %2967 = vrot.lane.b32.xlu1 %v7824_v29, %s6691_s30 }
 0xa94   :  { %2969 = vrot.lane.b32.xlu1 %v7822_v9, %s6691_s30 }
 0xb2d   :  { %v5873_v30 = vpop.f32.mrb[68].mxu0 }
 0xb2e   :  { %v2844_v42 = vmul.f32 %v6656_v33, %v5873_v30  ;;  %v2748_v55 = vpop.f32.mrb[69].mxu0  ;;  %v6667_v30 = vld [vmem:[%s8487_s1 + $0x38] sm:$0xff] }
 0xb2f   :  { %v2843_v47 = vmul.f32 %v6658_v61, %v2748_v55  ;;  %v2834_v12 = vmul.f32 %v6667_v30, %v7777_v53 }
 0xb30   :  { %v7858_v59 = vadd.f32 %v2844_v42, %v2828_v32  ;;  %v6669_v42 = vld [vmem:[%s8487_s1 + $0x30] sm:$0xff] }
 0xb31   :  { %v7860_v50 = vadd.f32 %v2843_v47, %v2827_v40  ;;  %v5876_v21 = vpop.f32.mrb[70].mxu0  ;;  %v2833_v55 = vmul.f32 %v6669_v42, %v7782_v48  ;;  %v6672_v48 = vld [vmem:[%s8488_s2 + $0x48] sm:$0xff]  ;;  %v6682_v42 = vld [vmem:[%s8488_s2 + $0x60] sm:$0xff] }
 0xb32   :  { %v2846_v51 = vmul.f32 %v6660_v11, %v5876_v21  ;;  %2893 = vrot.lane.b32.xlu0 %v7858_v59, %s6691_s30  ;;  %v2758_v63 = vpop.f32.mrb[71].mxu0  ;;  %v6671_v21 = vld [vmem:[%s8487_s1 + $0x48] sm:$0xff] }
 0xb33   :  { %v2845_v17 = vmul.f32 %v6662_v3, %v2758_v63  ;;  %v2836_v35 = vmul.f32 %v6671_v21, %v7792_v14 }
 0xb34   :  { %v7878_v10 = vadd.f32 %v2846_v51, %v2830_v18  ;;  %v6673_v51 = vld [vmem:[%s8487_s1 + $0x40] sm:$0xff] }
 0xb35   :  { %v7880_v19 = vadd.f32 %v2845_v17, %v2829_v56  ;;  %v5879_v0 = vpop.f32.mrb[72].mxu0  ;;  %v2835_v63 = vmul.f32 %v6673_v51, %v7794_v26  ;;  %v6676_v26 = vld [vmem:[%s8488_s2 + $0x58] sm:$0xff]  ;;  %v6686_v51 = vld [vmem:[%s8488_s2 + $0x70] sm:$0xff] }
 0xb36   :  { %v2848_v6 = vmul.f32 %v6664_v25, %v5879_v0  ;;  %2891 = vrot.lane.b32.xlu0 %v7860_v50, %s6691_s30  ;;  %v2768_v34 = vpop.f32.mrb[73].mxu0  ;;  %v6675_v0 = vld [vmem:[%s8487_s1 + $0x58] sm:$0xff] }
 0xb37   :  { %v2847_v13 = vmul.f32 %v6666_v28, %v2768_v34  ;;  %v2838_v16 = vmul.f32 %v6675_v0, %v7802_v43 }
 0xb38   :  { %v7898_v57 = vadd.f32 %v2848_v6, %v2832_v4  ;;  %v6677_v6 = vld [vmem:[%s8487_s1 + $0x50] sm:$0xff] }
 0xb39   :  { %v7900_v38 = vadd.f32 %v2847_v13, %v2831_v41  ;;  %v5882_v62 = vpop.f32.mrb[74].mxu0  ;;  %v2837_v34 = vmul.f32 %v6677_v6, %v7804_v54  ;;  %v6680_v54 = vld [vmem:[%s8488_s2 + $0x68] sm:$0xff] }
 0xb3a   :  { %v2850_v32 = vmul.f32 %v6668_v52, %v5882_v62  ;;  %2897 = vrot.lane.b32.xlu0 %v7878_v10, %s6691_s30  ;;  %v2778_v33 = vpop.f32.mrb[75].mxu0  ;;  %v6679_v62 = vld [vmem:[%s8487_s1 + $0x68] sm:$0xff] }
 0xb3b   :  { %v2849_v53 = vmul.f32 %v6670_v49, %v2778_v33  ;;  %v2840_v30 = vmul.f32 %v6679_v62, %v7812_v7 }
 0xb3c   :  { %v7918_v40 = vadd.f32 %v2850_v32, %v2834_v12  ;;  %v6681_v32 = vld [vmem:[%s8487_s1 + $0x60] sm:$0xff] }
 0xb3d   :  { %v7920_v61 = vadd.f32 %v2849_v53, %v2833_v55  ;;  %v2839_v33 = vmul.f32 %v6681_v32, %v7814_v20  ;;  %v6684_v20 = vld [vmem:[%s8488_s2 + $0x78] sm:$0xff] }
 0xb3e   :  { %2895 = vrot.lane.b32.xlu0 %v7880_v19, %s6691_s30 }
 0xb3f   :  { %v5885_v47 = vpop.f32.mrb[76].mxu0 }
 0xb40   :  { %v2852_v18 = vmul.f32 %v6672_v48, %v5885_v47  ;;  %v2788_v11 = vpop.f32.mrb[77].mxu0  ;;  %v6683_v47 = vld [vmem:[%s8487_s1 + $0x78] sm:$0xff] }
 0xb41   :  { %v2851_v56 = vmul.f32 %v6674_v37, %v2788_v11  ;;  %v2842_v21 = vmul.f32 %v6683_v47, %v7822_v9 }
 0xb42   :  { %v7938_v3 = vadd.f32 %v2852_v18, %v2836_v35  ;;  %2901 = vrot.lane.b32.xlu0 %v7898_v57, %s6691_s30  ;;  %v6685_v18 = vld [vmem:[%s8487_s1 + $0x70] sm:$0xff] }
 0xb43   :  { %v7942_v14 = vadd.f32 %v2851_v56, %v2835_v63  ;;  %v5888_v17 = vpop.f32.mrb[78].mxu0  ;;  %v2841_v11 = vmul.f32 %v6685_v18, %v7824_v29  ;;  %v2942_v29 = vpop.permute.xlu1 %2941 }
 0xb44   :  { %v2854_v4 = vmul.f32 %v6676_v26, %v5888_v17  ;;  %v2798_v25 = vpop.f32.mrb[79].mxu0 }
 0xb45   :  { %v2853_v41 = vmul.f32 %v6678_v27, %v2798_v25 }
 0xb46   :  { %v7958_v28 = vadd.f32 %v2854_v4, %v2838_v16  ;;  %2899 = vrot.lane.b32.xlu0 %v7900_v38, %s6691_s30 }
 0xb47   :  { %v7962_v43 = vadd.f32 %v2853_v41, %v2837_v34  ;;  %v5891_v13 = vpop.f32.mrb[80].mxu0  ;;  %v2940_v56 = vpop.permute.xlu1 %2939 }
 0xb48   :  { %v2856_v12 = vmul.f32 %v6680_v54, %v5891_v13  ;;  %v2808_v52 = vpop.f32.mrb[81].mxu0 }
 0xb49   :  { %v2855_v55 = vmul.f32 %v6682_v42, %v2808_v52 }
 0xb4a   :  { %v7978_v49 = vadd.f32 %v2856_v12, %v2840_v30  ;;  %2905 = vrot.lane.b32.xlu0 %v7918_v40, %s6691_s30 }
 0xb4b   :  { %v7982_v7 = vadd.f32 %v2855_v55, %v2839_v33  ;;  %v5894_v53 = vpop.f32.mrb[82].mxu0  ;;  %v2946_v17 = vpop.permute.xlu1 %2945 }
 0xb4c   :  { %v2858_v35 = vmul.f32 %v6684_v20, %v5894_v53  ;;  %v2818_v48 = vpop.f32.mrb[83].mxu0 }
 0xb4d   :  { %v2857_v63 = vmul.f32 %v6686_v51, %v2818_v48 }
 0xb4e   :  { %v7998_v37 = vadd.f32 %v2858_v35, %v2842_v21  ;;  %2903 = vrot.lane.b32.xlu0 %v7920_v61, %s6691_s30 }
 0xb4f   :  { %v8002_v9 = vadd.f32 %v2857_v63, %v2841_v11  ;;  %v2944_v0 = vpop.permute.xlu1 %2943 }
 0xb52   :  { %2909 = vrot.lane.b32.xlu0 %v7938_v3, %s6691_s30 }
 0xb53   :  { %v2950_v16 = vpop.permute.xlu1 %2949 }
 0xb56   :  { %2907 = vrot.lane.b32.xlu0 %v7942_v14, %s6691_s30 }
 0xb57   :  { %v2948_v26 = vpop.permute.xlu1 %2947 }
 0xb5a   :  { %2913 = vrot.lane.b32.xlu0 %v7958_v28, %s6691_s30 }
 0xb5b   :  { %v2954_v34 = vpop.permute.xlu1 %2953 }
 0xb5e   :  { %2911 = vrot.lane.b32.xlu0 %v7962_v43, %s6691_s30 }
 0xb5f   :  { %v2952_v13 = vpop.permute.xlu1 %2951 }
 0xb62   :  { %2917 = vrot.lane.b32.xlu0 %v7978_v49, %s6691_s30 }
 0xb63   :  { %v2958_v52 = vpop.permute.xlu1 %2957 }
 0xb66   :  { %2915 = vrot.lane.b32.xlu0 %v7982_v7, %s6691_s30 }
 0xb67   :  { %v2956_v55 = vpop.permute.xlu1 %2955 }
 0xb6a   :  { %2919 = vrot.lane.b32.xlu0 %v8002_v9, %s6691_s30 }
 0xb6b   :  { %v2962_v20 = vpop.permute.xlu1 %2961 }
 0xb6e   :  { %2921 = vrot.lane.b32.xlu0 %v7998_v37, %s6691_s30 }
 0xb6f   :  { %v2960_v18 = vpop.permute.xlu1 %2959 }
 0xba4   :  { %v2894_v4 = vpop.permute.xlu0 %2893 }
 0xba5   :  { %v2988_v27 = vsel %vm145_vm0, %v2894_v4, %v2942_v29 }
 0xba8   :  { %v2892_v25 = vpop.permute.xlu0 %2891 }
 0xba9   :  { %v2987_v6 = vsel %vm145_vm0, %v2892_v25, %v2940_v56  ;;  %v2966_v56 = vpop.permute.xlu1 %2965 }
 0xbaa   :  { %5911 = vmatprep.mubr.msk.f32.mxu1 %vm323_vm1, %v2987_v6 }
 0xbab   :  { %5912 = vmatmul.mubr.msk.f32.vlgmr.msra.gmra.mrb[84].mxu1 %vm323_vm1, %v2988_v27 }
 0xbac   :  { %v2898_v41 = vpop.permute.xlu0 %2897 }
 0xbad   :  { %v2990_v54 = vsel %vm145_vm0, %v2898_v41, %v2946_v17 }
 0xbb0   :  { %v2896_v62 = vpop.permute.xlu0 %2895 }
 0xbb1   :  { %v2989_v30 = vsel %vm145_vm0, %v2896_v62, %v2944_v0 }
 0xbb2   :  { %5914 = vmatprep.mubr.msk.f32.mxu1 %vm323_vm1, %v2989_v30 }
 0xbb3   :  { %5915 = vmatmul.mubr.msk.f32.gmra.mrb[86].mxu1 %vm323_vm1, %v2990_v54 }
 0xbb4   :  { %v2902_v12 = vpop.permute.xlu0 %2901 }
 0xbb5   :  { %v2992_v42 = vsel %vm145_vm0, %v2902_v12, %v2950_v16 }
 0xbb8   :  { %v2900_v32 = vpop.permute.xlu0 %2899 }
 0xbb9   :  { %v2991_v33 = vsel %vm145_vm0, %v2900_v32, %v2948_v26  ;;  %v2964_v26 = vpop.permute.xlu1 %2963 }
 0xbba   :  { %5917 = vmatprep.mubr.msk.f32.mxu1 %vm323_vm1, %v2991_v33 }
 0xbbb   :  { %5918 = vmatmul.mubr.msk.f32.gmra.mrb[88].mxu1 %vm323_vm1, %v2992_v42 }
 0xbbc   :  { %v2906_v53 = vpop.permute.xlu0 %2905 }
 0xbbd   :  { %v2994_v35 = vsel %vm145_vm0, %v2906_v53, %v2954_v34  ;;  %v2968_v41 = vpop.permute.xlu1 %2967 }
 0xbc0   :  { %v2904_v47 = vpop.permute.xlu0 %2903 }
 0xbc1   :  { %v2993_v21 = vsel %vm145_vm0, %v2904_v47, %v2952_v13 }
 0xbc2   :  { %5920 = vmatprep.mubr.msk.f32.mxu1 %vm323_vm1, %v2993_v21 }
 0xbc3   :  { %5921 = vmatmul.mubr.msk.f32.gmra.mrb[90].mxu1 %vm323_vm1, %v2994_v35 }
 0xbc4   :  { %v2910_v48 = vpop.permute.xlu0 %2909 }
 0xbc5   :  { %v2996_v63 = vsel %vm145_vm0, %v2910_v48, %v2958_v52  ;;  %v2970_v52 = vpop.permute.xlu1 %2969 }
 0xbc8   :  { %v2908_v11 = vpop.permute.xlu0 %2907 }
 0xbc9   :  { %v2995_v51 = vsel %vm145_vm0, %v2908_v11, %v2956_v55 }
 0xbca   :  { %5923 = vmatprep.mubr.msk.f32.mxu1 %vm323_vm1, %v2995_v51 }
 0xbcb   :  { %5924 = vmatmul.mubr.msk.f32.gmra.mrb[92].mxu1 %vm323_vm1, %v2996_v63 }
 0xbcc   :  { %v2914_v29 = vpop.permute.xlu0 %2913 }
 0xbcd   :  { %v2998_v16 = vsel %vm145_vm0, %v2914_v29, %v2962_v20 }
 0xbd0   :  { %v2912_v17 = vpop.permute.xlu0 %2911 }
 0xbd1   :  { %v2997_v0 = vsel %vm145_vm0, %v2912_v17, %v2960_v18 }
 0xbd2   :  { %5926 = vmatprep.mubr.msk.f32.mxu1 %vm323_vm1, %v2997_v0 }
 0xbd3   :  { %5927 = vmatmul.mubr.msk.f32.gmra.mrb[94].mxu1 %vm323_vm1, %v2998_v16 }
 0xbd4   :  { %v2918_v4 = vpop.permute.xlu0 %2917 }
 0xbd5   :  { %v3000_v13 = vsel %vm145_vm0, %v2918_v4, %v2966_v56 }
 0xbd8   :  { %v2916_v25 = vpop.permute.xlu0 %2915 }
 0xbd9   :  { %v8045_v34 = vsel %vm145_vm0, %v2916_v25, %v2964_v26 }
 0xbda   :  { %5929 = vmatprep.mubr.msk.f32.mxu1 %vm323_vm1, %v8045_v34 }
 0xbdb   :  { %5930 = vmatmul.mubr.msk.f32.gmra.mrb[96].mxu1 %vm323_vm1, %v3000_v13 }
 0xbdc   :  { %v2920_v62 = vpop.permute.xlu0 %2919 }
 0xbdd   :  { %v8052_v12 = vsel %vm145_vm0, %v2920_v62, %v2968_v41 }
 0xbde   :  { %5932 = vmatprep.mubr.msk.f32.mxu1 %vm323_vm1, %v8052_v12 }
 0xbe0   :  { %v2922_v32 = vpop.permute.xlu0 %2921 }
 0xbe1   :  { %v3002_v55 = vsel %vm145_vm0, %v2922_v32, %v2970_v52 }
 0xbe2   :  { %5933 = vmatmul.mubr.msk.f32.gmra.mrb[98].mxu1 %vm323_vm1, %v3002_v55 }
 0xc7e   :  { %v5913_v53 = vpop.f32.mrb[84].mxu1 }
 0xc7f   :  { %v8058_v47 = vsub.f32 %v2988_v27, %v5913_v53  ;;  %v3117_v20 = vpop.f32.mrb[85].mxu1 }
 0xc80   :  { %v8060_v48 = vsub.f32 %v2987_v6, %v3117_v20 }
 0xc81   :  { %v3213_v11 = vmul.f32 %v8058_v47, %v8058_v47 }
 0xc82   :  { %v3212_v18 = vmul.f32 %v8060_v48, %v8060_v48 }
 0xc84   :  { %5951 = vmatprep.mubr.msk.f32.mxu0 %vm323_vm1, %v3212_v18 }
 0xc85   :  { %5952 = vmatmul.mubr.msk.f32.vlgmr.msra.gmra.mrb[84].mxu0 %vm323_vm1, %v3213_v11 }
 0xc86   :  { %v5916_v29 = vpop.f32.mrb[86].mxu1 }
 0xc87   :  { %v8068_v56 = vsub.f32 %v2990_v54, %v5916_v29  ;;  %v3127_v17 = vpop.f32.mrb[87].mxu1 }
 0xc88   :  { %v8070_v26 = vsub.f32 %v2989_v30, %v3127_v17 }
 0xc89   :  { %v3215_v27 = vmul.f32 %v8068_v56, %v8068_v56 }
 0xc8a   :  { %v3214_v6 = vmul.f32 %v8070_v26, %v8070_v26 }
 0xc8c   :  { %5954 = vmatprep.mubr.msk.f32.mxu0 %vm323_vm1, %v3214_v6 }
 0xc8d   :  { %5955 = vmatmul.mubr.msk.f32.gmra.mrb[86].mxu0 %vm323_vm1, %v3215_v27 }
 0xc8e   :  { %v5919_v4 = vpop.f32.mrb[88].mxu1 }
 0xc8f   :  { %v8078_v25 = vsub.f32 %v2992_v42, %v5919_v4  ;;  %v3137_v41 = vpop.f32.mrb[89].mxu1 }
 0xc90   :  { %v8080_v62 = vsub.f32 %v2991_v33, %v3137_v41 }
 0xc91   :  { %v3217_v54 = vmul.f32 %v8078_v25, %v8078_v25 }
 0xc92   :  { %v3216_v30 = vmul.f32 %v8080_v62, %v8080_v62 }
 0xc94   :  { %5957 = vmatprep.mubr.msk.f32.mxu0 %vm323_vm1, %v3216_v30 }
 0xc95   :  { %5958 = vmatmul.mubr.msk.f32.gmra.mrb[88].mxu0 %vm323_vm1, %v3217_v54 }
 0xc96   :  { %v5922_v52 = vpop.f32.mrb[90].mxu1 }
 0xc97   :  { %v8088_v32 = vsub.f32 %v2994_v35, %v5922_v52  ;;  %v3147_v53 = vpop.f32.mrb[91].mxu1 }
 0xc98   :  { %v8090_v20 = vsub.f32 %v2993_v21, %v3147_v53 }
 0xc99   :  { %v3219_v42 = vmul.f32 %v8088_v32, %v8088_v32 }
 0xc9a   :  { %v3218_v33 = vmul.f32 %v8090_v20, %v8090_v20 }
 0xc9c   :  { %5960 = vmatprep.mubr.msk.f32.mxu0 %vm323_vm1, %v3218_v33 }
 0xc9d   :  { %5961 = vmatmul.mubr.msk.f32.gmra.mrb[90].mxu0 %vm323_vm1, %v3219_v42 }
 0xc9e   :  { %v5925_v18 = vpop.f32.mrb[92].mxu1 }
 0xc9f   :  { %v8098_v11 = vsub.f32 %v2996_v63, %v5925_v18  ;;  %v3157_v29 = vpop.f32.mrb[93].mxu1 }
 0xca0   :  { %v8100_v17 = vsub.f32 %v2995_v51, %v3157_v29 }
 0xca1   :  { %v3221_v35 = vmul.f32 %v8098_v11, %v8098_v11 }
 0xca2   :  { %v3220_v21 = vmul.f32 %v8100_v17, %v8100_v17 }
 0xca4   :  { %5963 = vmatprep.mubr.msk.f32.mxu0 %vm323_vm1, %v3220_v21 }
 0xca5   :  { %5964 = vmatmul.mubr.msk.f32.gmra.mrb[92].mxu0 %vm323_vm1, %v3221_v35 }
 0xca6   :  { %v5928_v6 = vpop.f32.mrb[94].mxu1 }
 0xca7   :  { %v8108_v27 = vsub.f32 %v2998_v16, %v5928_v6  ;;  %v3167_v4 = vpop.f32.mrb[95].mxu1 }
 0xca8   :  { %v8110_v41 = vsub.f32 %v2997_v0, %v3167_v4 }
 0xca9   :  { %v3223_v63 = vmul.f32 %v8108_v27, %v8108_v27 }
 0xcaa   :  { %v3222_v51 = vmul.f32 %v8110_v41, %v8110_v41 }
 0xcac   :  { %5966 = vmatprep.mubr.msk.f32.mxu0 %vm323_vm1, %v3222_v51 }
 0xcad   :  { %5967 = vmatmul.mubr.msk.f32.gmra.mrb[94].mxu0 %vm323_vm1, %v3223_v63 }
 0xcae   :  { %v5931_v30 = vpop.f32.mrb[96].mxu1 }
 0xcaf   :  { %v8118_v54 = vsub.f32 %v3000_v13, %v5931_v30  ;;  %v3177_v52 = vpop.f32.mrb[97].mxu1 }
 0xcb0   :  { %v8121_v16 = vsub.f32 %v8045_v34, %v3177_v52 }
 0xcb1   :  { %v3225_v53 = vmul.f32 %v8118_v54, %v8118_v54 }
 0xcb2   :  { %v3224_v0 = vmul.f32 %v8121_v16, %v8121_v16 }
 0xcb4   :  { %5969 = vmatprep.mubr.msk.f32.mxu0 %vm323_vm1, %v3224_v0 }
 0xcb5   :  { %v5934_v33 = vpop.f32.mrb[98].mxu1  ;;  %5970 = vmatmul.mubr.msk.f32.gmra.mrb[96].mxu0 %vm323_vm1, %v3225_v53 }
 0xcb6   :  { %v8129_v42 = vsub.f32 %v3002_v55, %v5934_v33  ;;  %v3187_v18 = vpop.f32.mrb[99].mxu1 }
 0xcb7   :  { %v8132_v13 = vsub.f32 %v8052_v12, %v3187_v18 }
 0xcb8   :  { %v3227_v29 = vmul.f32 %v8129_v42, %v8129_v42 }
 0xcb9   :  { %v3226_v34 = vmul.f32 %v8132_v13, %v8132_v13 }
 0xcbb   :  { %5972 = vmatprep.mubr.msk.f32.mxu0 %vm323_vm1, %v3226_v34 }
 0xcbc   :  { %5973 = vmatmul.mubr.msk.f32.gmra.mrb[98].mxu0 %vm323_vm1, %v3227_v29 }
 0xd58   :  { %v5953_v21 = vpop.f32.mrb[84].mxu0 }
 0xd59   :  { %v3348_v35 = vadd.f32 1e-05, %v5953_v21  ;;  %v3342_v6 = vpop.f32.mrb[85].mxu0 }
 0xd5a   :  { %v3343_v4 = vadd.f32 1e-05, %v3342_v6 }
 0xd5b   :  { %6587 = vrsqrt.f32 %v3348_v35 }
 0xd5c   :  { %6589 = vrsqrt.f32 %v3343_v4 }
 0xd60   :  { %v5956_v55 = vpop.f32.mrb[86].mxu0 }
 0xd61   :  { %v3358_v51 = vadd.f32 1e-05, %v5956_v55  ;;  %v3352_v12 = vpop.f32.mrb[87].mxu0 }
 0xd62   :  { %v3353_v63 = vadd.f32 1e-05, %v3352_v12 }
 0xd63   :  { %6591 = vrsqrt.f32 %v3358_v51 }
 0xd64   :  { %6593 = vrsqrt.f32 %v3353_v63 }
 0xd65   :  { %v6588_v30 = vpop.eup %6587 }
 0xd66   :  { %v6590_v52 = vpop.eup %6589  ;;  %v8141_v0 = vmul.f32 %v6588_v30, %v8058_v47 }
 0xd67   :  { %v8144_v53 = vmul.f32 %v6590_v52, %v8060_v48 }
 0xd68   :  { %v5959_v33 = vpop.f32.mrb[88].mxu0 }
 0xd69   :  { %v3368_v18 = vadd.f32 1e-05, %v5959_v33  ;;  %v3362_v34 = vpop.f32.mrb[89].mxu0  ;;  %v6483_v29 = vpack.i.bf16 %v8141_v0, %v8144_v53 }
 0xd6a   :  { %v3363_v21 = vadd.f32 1e-05, %v3362_v34 }
 0xd6b   :  { %6595 = vrsqrt.f32 %v3368_v18  ;;  %6484 = vrot.lane.b32.xlu0 %v6483_v29, %s6691_s30 }
 0xd6c   :  { %6597 = vrsqrt.f32 %v3363_v21 }
 0xd6d   :  { %v6592_v35 = vpop.eup %6591 }
 0xd6e   :  { %v6594_v6 = vpop.eup %6593  ;;  %v8150_v4 = vmul.f32 %v6592_v35, %v8068_v56 }
 0xd6f   :  { %v8153_v47 = vmul.f32 %v6594_v6, %v8070_v26 }
 0xd70   :  { %v5962_v48 = vpop.f32.mrb[90].mxu0 }
 0xd71   :  { %v3378_v55 = vadd.f32 1e-05, %v5962_v48  ;;  %v3372_v51 = vpop.f32.mrb[91].mxu0  ;;  %v6488_v12 = vpack.i.bf16 %v8150_v4, %v8153_v47 }
 0xd72   :  { %v3373_v63 = vadd.f32 1e-05, %v3372_v51 }
 0xd73   :  { %6599 = vrsqrt.f32 %v3378_v55  ;;  %6489 = vrot.lane.b32.xlu1 %v6488_v12, %s6691_s30 }
 0xd74   :  { %6601 = vrsqrt.f32 %v3373_v63 }
 0xd75   :  { %v6596_v30 = vpop.eup %6595 }
 0xd76   :  { %v6598_v52 = vpop.eup %6597  ;;  %v8159_v33 = vmul.f32 %v6596_v30, %v8078_v25 }
 0xd77   :  { %v3441_v56 = vmul.f32 %v6598_v52, %v8080_v62 }
 0xd78   :  { %v5965_v26 = vpop.f32.mrb[92].mxu0 }
 0xd79   :  { %v3388_v18 = vadd.f32 1e-05, %v5965_v26  ;;  %v3382_v34 = vpop.f32.mrb[93].mxu0  ;;  %v6493_v29 = vpack.i.bf16 %v8159_v33, %v3441_v56 }
 0xd7a   :  { %v3383_v21 = vadd.f32 1e-05, %v3382_v34 }
 0xd7b   :  { %6603 = vrsqrt.f32 %v3388_v18  ;;  %6494 = vrot.lane.b32.xlu0 %v6493_v29, %s6691_s30 }
 0xd7c   :  { %6605 = vrsqrt.f32 %v3383_v21 }
 0xd7d   :  { %v6600_v35 = vpop.eup %6599 }
 0xd7e   :  { %v6602_v6 = vpop.eup %6601  ;;  %v3444_v48 = vmul.f32 %v6600_v35, %v8088_v32 }
 0xd7f   :  { %v3443_v55 = vmul.f32 %v6602_v6, %v8090_v20 }
 0xd80   :  { %v5968_v25 = vpop.f32.mrb[94].mxu0 }
 0xd81   :  { %v3398_v51 = vadd.f32 1e-05, %v5968_v25  ;;  %v3392_v12 = vpop.f32.mrb[95].mxu0  ;;  %v6498_v62 = vpack.i.bf16 %v3444_v48, %v3443_v55 }
 0xd82   :  { %v3393_v63 = vadd.f32 1e-05, %v3392_v12 }
 0xd83   :  { %6607 = vrsqrt.f32 %v3398_v51  ;;  %6499 = vrot.lane.b32.xlu1 %v6498_v62, %s6691_s30 }
 0xd84   :  { %6609 = vrsqrt.f32 %v3393_v63 }
 0xd85   :  { %v6604_v30 = vpop.eup %6603 }
 0xd86   :  { %v6606_v52 = vpop.eup %6605  ;;  %v3446_v26 = vmul.f32 %v6604_v30, %v8098_v11 }
 0xd87   :  { %v3445_v18 = vmul.f32 %v6606_v52, %v8100_v17 }
 0xd88   :  { %v5971_v34 = vpop.f32.mrb[96].mxu0 }
 0xd89   :  { %v3408_v29 = vadd.f32 1e-05, %v5971_v34  ;;  %v3402_v32 = vpop.f32.mrb[97].mxu0  ;;  %v6503_v21 = vpack.i.bf16 %v3446_v26, %v3445_v18 }
 0xd8a   :  { %v3403_v20 = vadd.f32 1e-05, %v3402_v32 }
 0xd8b   :  { %6611 = vrsqrt.f32 %v3408_v29  ;;  %6504 = vrot.lane.b32.xlu0 %v6503_v21, %s6691_s30 }
 0xd8c   :  { %6613 = vrsqrt.f32 %v3403_v20 }
 0xd8d   :  { %v6608_v35 = vpop.eup %6607 }
 0xd8e   :  { %v6610_v6 = vpop.eup %6609  ;;  %v3448_v25 = vmul.f32 %v6608_v35, %v8108_v27 }
 0xd8f   :  { %v5974_v51 = vpop.f32.mrb[98].mxu0  ;;  %v3447_v12 = vmul.f32 %v6610_v6, %v8110_v41 }
 0xd90   :  { %v3418_v62 = vadd.f32 1e-05, %v5974_v51  ;;  %v3412_v11 = vpop.f32.mrb[99].mxu0 }
 0xd91   :  { %v3413_v63 = vadd.f32 1e-05, %v3412_v11  ;;  %v6508_v17 = vpack.i.bf16 %v3448_v25, %v3447_v12 }
 0xd92   :  { %6615 = vrsqrt.f32 %v3418_v62 }
 0xd93   :  { %6617 = vrsqrt.f32 %v3413_v63  ;;  %6509 = vrot.lane.b32.xlu1 %v6508_v17, %s6691_s30 }
 0xd95   :  { %v6612_v30 = vpop.eup %6611 }
 0xd96   :  { %v6614_v52 = vpop.eup %6613  ;;  %v3450_v34 = vmul.f32 %v6612_v30, %v8118_v54 }
 0xd97   :  { %v3449_v29 = vmul.f32 %v6614_v52, %v8121_v16 }
 0xd99   :  { %v6513_v32 = vpack.i.bf16 %v3450_v34, %v3449_v29 }
 0xd9b   :  { %6514 = vrot.lane.b32.xlu0 %v6513_v32, %s6691_s30 }
 0xd9c   :  { %v6616_v27 = vpop.eup %6615 }
 0xd9d   :  { %v6618_v21 = vpop.eup %6617  ;;  %v3452_v41 = vmul.f32 %v6616_v27, %v8129_v42 }
 0xd9e   :  { %v3451_v20 = vmul.f32 %v6618_v21, %v8132_v13 }
 0xda0   :  { %v6518_v35 = vpack.i.bf16 %v3452_v41, %v3451_v20 }
 0xda2   :  { %6519 = vrot.lane.b32.xlu1 %v6518_v35, %s6691_s30 }
 0xdb9   :  { %3453 = vxpose.xlu0.b32.start [1/8] (short) (narrow) %v8144_v53, 32 }
 0xdbd   :  { %3454 = vxpose.xlu0.b32.cont [2/8] (short) (narrow) %v8141_v0, 32 }
 0xdc1   :  { %3455 = vxpose.xlu0.b32.cont [3/8] (short) (narrow) %v8153_v47, 32 }
 0xdc5   :  { %3456 = vxpose.xlu0.b32.cont [4/8] (short) (narrow) %v8150_v4, 32 }
 0xdc9   :  { %3457 = vxpose.xlu0.b32.cont [5/8] (short) (narrow) %v3441_v56, 32 }
 0xdcb   :  { %3739 = vxpose.xlu1.b32.start [1/8] (short) (narrow) %v3445_v18, 32 }
 0xdcd   :  { %3458 = vxpose.xlu0.b32.cont [6/8] (short) (narrow) %v8159_v33, 32 }
 0xdcf   :  { %3740 = vxpose.xlu1.b32.cont [2/8] (short) (narrow) %v3446_v26, 32 }
 0xdd1   :  { %3459 = vxpose.xlu0.b32.cont [7/8] (short) (narrow) %v3443_v55, 32 }
 0xdd3   :  { %3741 = vxpose.xlu1.b32.cont [3/8] (short) (narrow) %v3447_v12, 32 }
 0xdd5   :  { %3460 = vxpose.xlu0.b32.end [8/8] (short) (narrow) %v3444_v48, 32 }
 0xdd7   :  { %3742 = vxpose.xlu1.b32.cont [4/8] (short) (narrow) %v3448_v25, 32 }
 0xddb   :  { %3743 = vxpose.xlu1.b32.cont [5/8] (short) (narrow) %v3449_v29, 32 }
 0xddd   :  { %v6485_v54 = vpop.permute.xlu0 %6484 }
 0xdde   :  { %v6487_v16 = vunpack.i.h.bf16 %v6485_v54  ;;  %v6486_v42 = vunpack.i.l.bf16 %v6485_v54 }
 0xddf   :  { %3744 = vxpose.xlu1.b32.cont [6/8] (short) (narrow) %v3450_v34, 32 }
 0xde0   :  { %v6355_v13 = vpack.c.bf16 %v6487_v16, %v6486_v42 }
 0xde2   :  { %6356 = vmatprep.subr.bf16.mxu1 %v6355_v13 }
 0xde3   :  { %3745 = vxpose.xlu1.b32.cont [7/8] (short) (narrow) %v3451_v20, 32  ;;  %6358 = vmatpush3.bf16.msra.mxu1 %v6355_v13 }
 0xde5   :  { %v6490_v0 = vpop.permute.xlu1 %6489 }
 0xde6   :  { %v6492_v53 = vunpack.i.h.bf16 %v6490_v0  ;;  %v6491_v4 = vunpack.i.l.bf16 %v6490_v0 }
 0xde7   :  { %3746 = vxpose.xlu1.b32.end [8/8] (short) (narrow) %v3452_v41, 32 }
 0xde8   :  { %v6359_v47 = vpack.c.bf16 %v6492_v53, %v6491_v4 }
 0xdea   :  { %6360 = vmatprep.subr.bf16.mxu1 %v6359_v47 }
 0xdeb   :  { %6362 = vmatpush3.bf16.msra.mxu1 %v6359_v47 }
 0xded   :  { %v6495_v33 = vpop.permute.xlu0 %6494 }
 0xdee   :  { %v6497_v56 = vunpack.i.h.bf16 %v6495_v33  ;;  %v6496_v48 = vunpack.i.l.bf16 %v6495_v33  ;;  %v2422_v33 = vld [vmem:[%s8484_s6 + $0xd8] sm:$0xff] }
 0xdf0   :  { %v6363_v55 = vpack.c.bf16 %v6497_v56, %v6496_v48  ;;  %v2424_v56 = vld [vmem:[%s8484_s6 + $0xe8] sm:$0xff] }
 0xdf2   :  { %6364 = vmatprep.subr.bf16.mxu1 %v6363_v55 }
 0xdf3   :  { %6366 = vmatpush3.bf16.msra.mxu1 %v6363_v55  ;;  %v2425_v55 = vld [vmem:[%s8484_s6 + $0xf0] sm:$0xff] }
 0xdf5   :  { %v6500_v26 = vpop.permute.xlu1 %6499 }
 0xdf6   :  { %v6502_v18 = vunpack.i.h.bf16 %v6500_v26  ;;  %v6501_v6 = vunpack.i.l.bf16 %v6500_v26  ;;  %v6407_v26 = vpack.c.bf16 %v2425_v55, %v2424_v56  ;;  %v2429_v56 = vld [vmem:[%s8484_s6 + $0x110] sm:$0xff]  ;;  %v2430_v55 = vld [vmem:[%s8484_s6 + $0x118] sm:$0xff] }
 0xdf8   :  { %v6367_v25 = vpack.c.bf16 %v6502_v18, %v6501_v6  ;;  %v6687_v6 = vld [vmem:[%s8489_s5 + $0x8] sm:$0xff] }
 0xdfa   :  { %6368 = vmatprep.subr.bf16.mxu1 %v6367_v25 }
 0xdfb   :  { %6370 = vmatpush3.bf16.msra.mxu1 %v6367_v25 }
 0xdfd   :  { %v6505_v51 = vpop.permute.xlu0 %6504 }
 0xdfe   :  { %v6507_v12 = vunpack.i.h.bf16 %v6505_v51  ;;  %v6506_v62 = vunpack.i.l.bf16 %v6505_v51 }
 0xe00   :  { %v6379_v11 = vpack.c.bf16 %v6507_v12, %v6506_v62  ;;  %v6688_v12 = vld [vmem:[%s8489_s5] sm:$0xff] }
 0xe02   :  { %6380 = vmatprep.subr.bf16.mxu0 %v6379_v11 }
 0xe03   :  { %6382 = vmatpush3.bf16.msra.mxu0 %v6379_v11 }
 0xe05   :  { %v6510_v63 = vpop.permute.xlu1 %6509 }
 0xe06   :  { %v6512_v17 = vunpack.i.h.bf16 %v6510_v63  ;;  %v6511_v30 = vunpack.i.l.bf16 %v6510_v63 }
 0xe08   :  { %v6383_v52 = vpack.c.bf16 %v6512_v17, %v6511_v30  ;;  %v6689_v17 = vld [vmem:[%s8489_s5 + $0x18] sm:$0xff] }
 0xe0a   :  { %6384 = vmatprep.subr.bf16.mxu0 %v6383_v52 }
 0xe0b   :  { %6386 = vmatpush3.bf16.msra.mxu0 %v6383_v52 }
 0xe0d   :  { %v6515_v34 = vpop.permute.xlu0 %6514 }
 0xe0e   :  { %v6517_v29 = vunpack.i.h.bf16 %v6515_v34  ;;  %v6516_v32 = vunpack.i.l.bf16 %v6515_v34  ;;  %v6690_v34 = vld [vmem:[%s8489_s5 + $0x10] sm:$0xff] }
 0xe10   :  { %v6387_v27 = vpack.c.bf16 %v6517_v29, %v6516_v32 }
 0xe12   :  { %6388 = vmatprep.subr.bf16.mxu0 %v6387_v27 }
 0xe13   :  { %6390 = vmatpush3.bf16.msra.mxu0 %v6387_v27 }
 0xe14   :  { %v6520_v21 = vpop.permute.xlu1 %6519 }
 0xe15   :  { %v6522_v41 = vunpack.i.h.bf16 %v6520_v21  ;;  %v6521_v20 = vunpack.i.l.bf16 %v6520_v21 }
 0xe17   :  { %v6391_v35 = vpack.c.bf16 %v6522_v41, %v6521_v20 }
 0xe19   :  { %6392 = vmatprep.subr.bf16.mxu0 %v6391_v35 }
 0xe1a   :  { %6394 = vmatpush3.bf16.msra.mxu0 %v6391_v35 }
 0xe39   :  { %v3469_v54 = vpop.trf.xlu0 }
 0xe3a   :  { %5991 = vmatprep.mubr.msk.f32.mxu1 %vm323_vm1, %v3469_v54 }
 0xe3d   :  { %v3470_v16 = vpop.trf.xlu0 }
 0xe3e   :  { %5992 = vmatmul.mubr.msk.f32.vlgmr.msra.gmra.mrb[100].mxu1 %vm323_vm1, %v3470_v16 }
 0xe41   :  { %v3471_v42 = vpop.trf.xlu0 }
 0xe42   :  { %5994 = vmatprep.mubr.msk.f32.mxu1 %vm323_vm1, %v3471_v42 }
 0xe45   :  { %v3472_v13 = vpop.trf.xlu0 }
 0xe46   :  { %5995 = vmatmul.mubr.msk.f32.gmra.mrb[102].mxu1 %vm323_vm1, %v3472_v13 }
 0xe47   :  { %6005 = vmatprep.mubr.msk.f32.mxu1 %vm145_vm0, %v7860_v50  ;;  %v2423_v50 = vld [vmem:[%s8484_s6 + $0xe0] sm:$0xff] }
 0xe48   :  { %v6403_v48 = vpack.c.bf16 %v2423_v50, %v2422_v33  ;;  %v2428_v50 = vld [vmem:[%s8484_s6 + $0x108] sm:$0xff] }
 0xe4a   :  { %6404 = vmatprep.subr.bf16.mxu0 %v6403_v48 }
 0xe4b   :  { %v3755_v0 = vpop.trf.xlu1 }
 0xe4c   :  { %6033 = vmatprep.mubr.msk.f32.mxu0 %vm323_vm1, %v3755_v0 }
 0xe4f   :  { %v3756_v53 = vpop.trf.xlu1 }
 0xe50   :  { %6034 = vmatmul.mubr.msk.f32.vlgmr.msra.gmra.mrb[100].mxu0 %vm323_vm1, %v3756_v53 }
 0xe51   :  { %6406 = vmatpush3.bf16.msra.mxu0 %v6403_v48  ;;  %v6415_v48 = vpack.c.bf16 %v2429_v56, %v2428_v50  ;;  %v8386_v50 = vld [vmem:[%s8484_s6 + $0x160] ss:$0 sm:$0xff] }
 0xe52   :  { %6408 = vmatprep.subr.bf16.mxu0 %v6407_v26 }
 0xe53   :  { %v3757_v4 = vpop.trf.xlu1 }
 0xe54   :  { %6036 = vmatprep.mubr.msk.f32.mxu0 %vm323_vm1, %v3757_v4 }
 0xe55   :  { %6410 = vmatpush3.bf16.msra.mxu0 %v6407_v26  ;;  %v2431_v26 = vld [vmem:[%s8484_s6 + $0x120] sm:$0xff] }
 0xe57   :  { %v3758_v47 = vpop.trf.xlu1 }
 0xe58   :  { %6037 = vmatmul.mubr.msk.f32.gmra.mrb[102].mxu0 %vm323_vm1, %v3758_v47 }
 0xf11   :  { %v5993_v18 = vpop.f32.mrb[100].mxu1 }
 0xf12   :  { %v3615_v25 = vmul.f32 %v6687_v6, %v5993_v18  ;;  %v3595_v51 = vpop.f32.mrb[101].mxu1  ;;  %v6419_v18 = vpack.c.bf16 %v2431_v26, %v2430_v55 }
 0xf13   :  { %v3614_v62 = vmul.f32 %v6688_v12, %v3595_v51 }
 0xf14   :  { %6420 = vmatprep.subr.bf16.mxu0 %v6419_v18 }
 0xf15   :  { %v6371_v11 = vpack.c.bf16 %v3615_v25, %v3614_v62 }
 0xf17   :  { %6372 = vmatprep.subr.bf16.mxu1 %v6371_v11 }
 0xf18   :  { %6374 = vmatpush3.bf16.msra.mxu1 %v6371_v11 }
 0xf19   :  { %v5996_v63 = vpop.f32.mrb[102].mxu1 }
 0xf1a   :  { %v3617_v30 = vmul.f32 %v6689_v17, %v5996_v63  ;;  %v3605_v52 = vpop.f32.mrb[103].mxu1 }
 0xf1b   :  { %v3616_v29 = vmul.f32 %v6690_v34, %v3605_v52 }
 0xf1d   :  { %v6375_v32 = vpack.c.bf16 %v3617_v30, %v3616_v29 }
 0xf1f   :  { %6376 = vmatprep.subr.bf16.mxu1 %v6375_v32 }
 0xf20   :  { %6378 = vmatpush3.bf16.msra.mxu1 %v6375_v32 }
 0xf23   :  { %6006 = vmatmul.mubr.msk.f32.vlgmr.msra.gmra.mrb[104].mxu1 %vm145_vm0, %v7858_v59  ;;  %v6035_v27 = vpop.f32.mrb[100].mxu0 }
 0xf24   :  { %v3901_v21 = vmul.f32 %v6687_v6, %v6035_v27  ;;  %6008 = vmatprep.mubr.msk.f32.mxu1 %vm145_vm0, %v7880_v19  ;;  %v3881_v41 = vpop.f32.mrb[101].mxu0  ;;  %v5024_v6 = vld [vmem:[%s8484_s6 + $0x158] ss:$0 sm:$0xff] }
 0xf25   :  { %v3900_v20 = vmul.f32 %v6688_v12, %v3881_v41 }
 0xf27   :  { %v6395_v35 = vpack.c.bf16 %v3901_v21, %v3900_v20  ;;  %6009 = vmatmul.mubr.msk.f32.gmra.mrb[106].mxu1 %vm145_vm0, %v7878_v10  ;;  %v2426_v10 = vld [vmem:[%s8484_s6 + $0xf8] sm:$0xff] }
 0xf28   :  { %6011 = vmatprep.mubr.msk.f32.mxu1 %vm145_vm0, %v7900_v38 }
 0xf29   :  { %6396 = vmatprep.subr.bf16.mxu1 %v6395_v35 }
 0xf2a   :  { %6398 = vmatpush3.bf16.msra.mxu1 %v6395_v35 }
 0xf2b   :  { %6012 = vmatmul.mubr.msk.f32.gmra.mrb[108].mxu1 %vm145_vm0, %v7898_v57  ;;  %v6038_v59 = vpop.f32.mrb[102].mxu0  ;;  %v2427_v57 = vld [vmem:[%s8484_s6 + $0x100] sm:$0xff] }
 0xf2c   :  { %v3903_v54 = vmul.f32 %v6689_v17, %v6038_v59  ;;  %6014 = vmatprep.mubr.msk.f32.mxu1 %vm145_vm0, %v7920_v61  ;;  %v3891_v19 = vpop.f32.mrb[103].mxu0  ;;  %v6411_v38 = vpack.c.bf16 %v2427_v57, %v2426_v10 }
 0xf2d   :  { %v3902_v16 = vmul.f32 %v6690_v34, %v3891_v19 }
 0xf2f   :  { %v6399_v42 = vpack.c.bf16 %v3903_v54, %v3902_v16  ;;  %6015 = vmatmul.mubr.msk.f32.gmra.mrb[110].mxu1 %vm145_vm0, %v7918_v40 }
 0xf30   :  { %6047 = vmatprep.mubr.msk.f32.mxu1 %vm145_vm0, %v7942_v14 }
 0xf31   :  { %6400 = vmatprep.subr.bf16.mxu1 %v6399_v42 }
 0xf32   :  { %6402 = vmatpush3.bf16.msra.mxu1 %v6399_v42 }
 0xf33   :  { %6412 = vmatprep.subr.bf16.mxu1 %v6411_v38 }
 0xf35   :  { %6048 = vmatmul.mubr.msk.f32.vlgmr.msra.gmra.mrb[112].mxu1 %vm145_vm0, %v7938_v3 }
 0xf36   :  { %6050 = vmatprep.mubr.msk.f32.mxu1 %vm145_vm0, %v7962_v43  ;;  %6414 = vmatpush3.bf16.msra.mxu1 %v6411_v38 }
 0xf37   :  { %6416 = vmatprep.subr.bf16.mxu1 %v6415_v48 }
 0xf39   :  { %6051 = vmatmul.mubr.msk.f32.gmra.mrb[114].mxu1 %vm145_vm0, %v7958_v28 }
 0xf3a   :  { %6053 = vmatprep.mubr.msk.f32.mxu1 %vm145_vm0, %v7982_v7  ;;  %6418 = vmatpush3.bf16.msra.mxu1 %v6415_v48 }
 0xf3d   :  { %6054 = vmatmul.mubr.msk.f32.gmra.mrb[116].mxu1 %vm145_vm0, %v7978_v49 }
 0xf3e   :  { %6056 = vmatprep.mubr.msk.f32.mxu1 %vm145_vm0, %v8002_v9 }
 0xf41   :  { %6057 = vmatmul.mubr.msk.f32.gmra.mrb[118].mxu1 %vm145_vm0, %v7998_v37 }
 0xff6   :  { %v6007_v40 = vpop.f32.mrb[104].mxu1 }
 0xff7   :  { %v3700_v61 = vpop.f32.mrb[105].mxu1 }
 0xff8   :  { %6067 = vmatprep.mubr.msk.f32.mxu0 %vm145_vm0, %v3700_v61 }
 0xff9   :  { %6068 = vmatmul.mubr.msk.f32.vlgmr.msra.gmra.mrb[104].mxu0 %vm145_vm0, %v6007_v40 }
 0xffa   :  { %v6010_v3 = vpop.f32.mrb[106].mxu1  ;;  %6422 = vmatpush3.bf16.msra.mxu0 %v6419_v18 }
 0xffb   :  { %v3710_v14 = vpop.f32.mrb[107].mxu1 }
 0xffc   :  { %6070 = vmatprep.mubr.msk.f32.mxu0 %vm145_vm0, %v3710_v14 }
 0xffd   :  { %6071 = vmatmul.mubr.msk.f32.gmra.mrb[106].mxu0 %vm145_vm0, %v6010_v3 }
 0xffe   :  { %v6013_v28 = vpop.f32.mrb[108].mxu1 }
 0xfff   :  { %v3720_v43 = vpop.f32.mrb[109].mxu1 }
0x1000   :  { %6073 = vmatprep.mubr.msk.f32.mxu0 %vm145_vm0, %v3720_v43 }
0x1001   :  { %6074 = vmatmul.mubr.msk.f32.gmra.mrb[108].mxu0 %vm145_vm0, %v6013_v28 }
0x1002   :  { %v6016_v49 = vpop.f32.mrb[110].mxu1 }
0x1003   :  { %v3730_v7 = vpop.f32.mrb[111].mxu1 }
0x1004   :  { %6076 = vmatprep.mubr.msk.f32.mxu0 %vm145_vm0, %v3730_v7 }
0x1005   :  { %6077 = vmatmul.mubr.msk.f32.gmra.mrb[110].mxu0 %vm145_vm0, %v6016_v49 }
0x1008   :  { %v6049_v37 = vpop.f32.mrb[112].mxu1 }
0x1009   :  { %v3986_v9 = vpop.f32.mrb[113].mxu1 }
0x100a   :  { %6079 = vmatprep.mubr.msk.f32.mxu0 %vm145_vm0, %v3986_v9 }
0x100b   :  { %6080 = vmatmul.mubr.msk.f32.gmra.mrb[112].mxu0 %vm145_vm0, %v6049_v37 }
0x100c   :  { %v6052_v13 = vpop.f32.mrb[114].mxu1 }
0x100d   :  { %v3996_v0 = vpop.f32.mrb[115].mxu1 }
0x100e   :  { %6082 = vmatprep.mubr.msk.f32.mxu0 %vm145_vm0, %v3996_v0 }
0x100f   :  { %6083 = vmatmul.mubr.msk.f32.gmra.mrb[114].mxu0 %vm145_vm0, %v6052_v13 }
0x1010   :  { %v6055_v53 = vpop.f32.mrb[116].mxu1 }
0x1011   :  { %v4006_v4 = vpop.f32.mrb[117].mxu1 }
0x1012   :  { %6085 = vmatprep.mubr.msk.f32.mxu0 %vm145_vm0, %v4006_v4  ;;  %v2436_v4 = vld [vmem:[%s8484_s6 + $0x148] sm:$0xff] }
0x1013   :  { %6086 = vmatmul.mubr.msk.f32.gmra.mrb[116].mxu0 %vm145_vm0, %v6055_v53 }
0x1014   :  { %v6058_v47 = vpop.f32.mrb[118].mxu1 }
0x1015   :  { %v4016_v33 = vpop.f32.mrb[119].mxu1 }
0x1016   :  { %6088 = vmatprep.mubr.msk.f32.mxu0 %vm145_vm0, %v4016_v33 }
0x1017   :  { %6089 = vmatmul.mubr.msk.f32.gmra.mrb[118].mxu0 %vm145_vm0, %v6058_v47  ;;  %v2437_v47 = vld [vmem:[%s8484_s6 + $0x150] sm:$0xff] }
0x1018   :  { %v6431_v33 = vpack.c.bf16 %v2437_v47, %v2436_v4 }
0x10cc   :  { %v6069_v25 = vpop.f32.mrb[104].mxu0 }
0x10cd   :  { %v4149_v51 = vadd.f32 %v6069_v25, %v5024_v6  ;;  %v4143_v12 = vpop.f32.mrb[105].mxu0 }
0x10ce   :  { %v4144_v62 = vadd.f32 %v5024_v6, %v4143_v12 }
0x10cf   :  { %v8289_v17 = vadd.f32 %v4149_v51, %v7654_v15 }
0x10d0   :  { %v8286_v11 = vadd.f32 %v4144_v62, %v7651_v31  ;;  %v6072_v63 = vpop.f32.mrb[106].mxu0 }
0x10d1   :  { %v4159_v30 = vadd.f32 %v6072_v63, %v5024_v6  ;;  %v4153_v52 = vpop.f32.mrb[107].mxu0 }
0x10d2   :  { %v4154_v34 = vadd.f32 %v5024_v6, %v4153_v52  ;;  %6099 = vmatprep.mubr.msk.f32.mxu1 %vm145_vm0, %v8286_v11 }
0x10d3   :  { %6100 = vmatmul.mubr.msk.f32.vlgmr.msra.gmra.mrb[120].mxu1 %vm145_vm0, %v8289_v17  ;;  %v8299_v31 = vadd.f32 %v4159_v30, %v7667_v2 }
0x10d4   :  { %v8296_v29 = vadd.f32 %v4154_v34, %v7663_v46  ;;  %v6075_v32 = vpop.f32.mrb[108].mxu0 }
0x10d5   :  { %v4169_v27 = vadd.f32 %v6075_v32, %v5024_v6  ;;  %v4163_v21 = vpop.f32.mrb[109].mxu0 }
0x10d6   :  { %v4164_v15 = vadd.f32 %v5024_v6, %v4163_v21  ;;  %6102 = vmatprep.mubr.msk.f32.mxu1 %vm145_vm0, %v8296_v29 }
0x10d7   :  { %6103 = vmatmul.mubr.msk.f32.gmra.mrb[122].mxu1 %vm145_vm0, %v8299_v31  ;;  %v8309_v46 = vadd.f32 %v4169_v27, %v7681_v58 }
0x10d8   :  { %v8306_v41 = vadd.f32 %v4164_v15, %v7677_v1  ;;  %v6078_v20 = vpop.f32.mrb[110].mxu0 }
0x10d9   :  { %v4179_v35 = vadd.f32 %v6078_v20, %v5024_v6  ;;  %v4173_v59 = vpop.f32.mrb[111].mxu0 }
0x10da   :  { %v4174_v2 = vadd.f32 %v5024_v6, %v4173_v59  ;;  %6105 = vmatprep.mubr.msk.f32.mxu1 %vm145_vm0, %v8306_v41 }
0x10db   :  { %6106 = vmatmul.mubr.msk.f32.gmra.mrb[124].mxu1 %vm145_vm0, %v8309_v46  ;;  %v8319_v19 = vadd.f32 %v4179_v35, %v7695_v22 }
0x10dc   :  { %v8316_v54 = vadd.f32 %v4174_v2, %v7691_v39 }
0x10de   :  { %v6081_v1 = vpop.f32.mrb[112].mxu0  ;;  %6108 = vmatprep.mubr.msk.f32.mxu1 %vm145_vm0, %v8316_v54 }
0x10df   :  { %v4189_v58 = vadd.f32 %v6081_v1, %v5024_v6  ;;  %v4183_v16 = vpop.f32.mrb[113].mxu0  ;;  %6109 = vmatmul.mubr.msk.f32.gmra.mrb[126].mxu1 %vm145_vm0, %v8319_v19 }
0x10e0   :  { %v4184_v42 = vadd.f32 %v5024_v6, %v4183_v16 }
0x10e1   :  { %v8329_v39 = vadd.f32 %v4189_v58, %v7709_v8 }
0x10e2   :  { %v8326_v10 = vadd.f32 %v4184_v42, %v7706_v44  ;;  %v6084_v57 = vpop.f32.mrb[114].mxu0 }
0x10e3   :  { %v4199_v38 = vadd.f32 %v6084_v57, %v5024_v6  ;;  %v4193_v22 = vpop.f32.mrb[115].mxu0 }
0x10e4   :  { %v4194_v40 = vadd.f32 %v5024_v6, %v4193_v22  ;;  %6111 = vmatprep.mubr.msk.f32.mxu1 %vm145_vm0, %v8326_v10 }
0x10e5   :  { %6112 = vmatmul.mubr.msk.f32.gmra.mrb[128].mxu1 %vm145_vm0, %v8329_v39  ;;  %v8339_v44 = vadd.f32 %v4199_v38, %v7721_v23 }
0x10e6   :  { %v8336_v61 = vadd.f32 %v4194_v40, %v7718_v24  ;;  %v6087_v3 = vpop.f32.mrb[116].mxu0 }
0x10e7   :  { %v4209_v14 = vadd.f32 %v6087_v3, %v5024_v6  ;;  %v4203_v28 = vpop.f32.mrb[117].mxu0 }
0x10e8   :  { %v4204_v8 = vadd.f32 %v5024_v6, %v4203_v28  ;;  %6114 = vmatprep.mubr.msk.f32.mxu1 %vm145_vm0, %v8336_v61 }
0x10e9   :  { %6115 = vmatmul.mubr.msk.f32.gmra.mrb[130].mxu1 %vm145_vm0, %v8339_v44  ;;  %v8349_v24 = vadd.f32 %v4209_v14, %v7733_v36  ;;  %v2433_v36 = vld [vmem:[%s8484_s6 + $0x130] sm:$0xff] }
0x10ea   :  { %v8346_v43 = vadd.f32 %v4204_v8, %v7730_v5  ;;  %v6090_v49 = vpop.f32.mrb[118].mxu0  ;;  %v2432_v5 = vld [vmem:[%s8484_s6 + $0x128] sm:$0xff] }
0x10eb   :  { %v4219_v7 = vadd.f32 %v6090_v49, %v5024_v6  ;;  %v4213_v37 = vpop.f32.mrb[119].mxu0  ;;  %v6423_v0 = vpack.c.bf16 %v2433_v36, %v2432_v5 }
0x10ec   :  { %v4214_v23 = vadd.f32 %v5024_v6, %v4213_v37  ;;  %6117 = vmatprep.mubr.msk.f32.mxu1 %vm145_vm0, %v8346_v43 }
0x10ed   :  { %6118 = vmatmul.mubr.msk.f32.gmra.mrb[132].mxu1 %vm145_vm0, %v8349_v24  ;;  %v8359_v13 = vadd.f32 %v4219_v7, %v7745_v60  ;;  %6424 = vmatprep.subr.bf16.mxu0 %v6423_v0  ;;  %v2435_v60 = vld [vmem:[%s8484_s6 + $0x140] sm:$0xff] }
0x10ee   :  { %v8356_v9 = vadd.f32 %v4214_v23, %v7742_v45  ;;  %6426 = vmatpush3.bf16.msra.mxu0 %v6423_v0  ;;  %v2434_v45 = vld [vmem:[%s8484_s6 + $0x138] sm:$0xff] }
0x10ef   :  { %v6427_v53 = vpack.c.bf16 %v2435_v60, %v2434_v45 }
0x10f0   :  { %6120 = vmatprep.mubr.msk.f32.mxu1 %vm145_vm0, %v8356_v9 }
0x10f1   :  { %6121 = vmatmul.mubr.msk.f32.gmra.mrb[134].mxu1 %vm145_vm0, %v8359_v13  ;;  %6428 = vmatprep.subr.bf16.mxu0 %v6427_v53 }
0x10f2   :  { %6430 = vmatpush3.bf16.msra.mxu0 %v6427_v53 }
0x10f3   :  { %6432 = vmatprep.subr.bf16.mxu0 %v6431_v33 }
0x10f6   :  { %6434 = vmatpush3.bf16.msra.mxu0 %v6431_v33 }
0x11a6   :  { %v6101_v56 = vpop.f32.mrb[120].mxu1 }
0x11a7   :  { %v4362_v48 = vadd.f32 %v6101_v56, %v8386_v50  ;;  %v4356_v55 = vpop.f32.mrb[121].mxu1 }
0x11a8   :  { %v4357_v26 = vadd.f32 %v8386_v50, %v4356_v55 }
0x11a9   :  { %v4452_v18 = vmul.f32 0.70710677, %v4362_v48  ;;  %v4436_v40 = vmul.f32 0.5, %v4362_v48 }
0x11aa   :  { %v4451_v6 = vmul.f32 0.70710677, %v4357_v26  ;;  %v6104_v25 = vpop.f32.mrb[122].mxu1  ;;  %v4435_v38 = vmul.f32 0.5, %v4357_v26 }
0x11ab   :  { %6619 = verf.f32 %v4452_v18  ;;  %v4372_v51 = vadd.f32 %v6104_v25, %v8386_v50  ;;  %v4366_v12 = vpop.f32.mrb[123].mxu1 }
0x11ac   :  { %6621 = verf.f32 %v4451_v6  ;;  %v4367_v62 = vadd.f32 %v8386_v50, %v4366_v12 }
0x11ad   :  { %v4454_v63 = vmul.f32 0.70710677, %v4372_v51  ;;  %v4438_v60 = vmul.f32 0.5, %v4372_v51 }
0x11ae   :  { %v4453_v30 = vmul.f32 0.70710677, %v4367_v62  ;;  %v6107_v52 = vpop.f32.mrb[124].mxu1  ;;  %v4437_v36 = vmul.f32 0.5, %v4367_v62 }
0x11af   :  { %6623 = verf.f32 %v4454_v63  ;;  %v4382_v34 = vadd.f32 %v6107_v52, %v8386_v50  ;;  %v4376_v32 = vpop.f32.mrb[125].mxu1 }
0x11b0   :  { %6625 = verf.f32 %v4453_v30  ;;  %v4377_v27 = vadd.f32 %v8386_v50, %v4376_v32 }
0x11b1   :  { %v4456_v21 = vmul.f32 0.70710677, %v4382_v34  ;;  %v4440_v51 = vmul.f32 0.5, %v4382_v34 }
0x11b2   :  { %v4455_v15 = vmul.f32 0.70710677, %v4377_v27  ;;  %v6110_v20 = vpop.f32.mrb[126].mxu1  ;;  %v4439_v25 = vmul.f32 0.5, %v4377_v27 }
0x11b3   :  { %6627 = verf.f32 %v4456_v21  ;;  %v8395_v35 = vadd.f32 %v6110_v20, %v8386_v50  ;;  %v4386_v59 = vpop.f32.mrb[127].mxu1 }
0x11b4   :  { %6629 = verf.f32 %v4455_v15  ;;  %v4387_v2 = vadd.f32 %v8386_v50, %v4386_v59 }
0x11b5   :  { %v6620_v1 = vpop.eup %6619  ;;  %v4458_v58 = vmul.f32 0.70710677, %v8395_v35  ;;  %v4442_v34 = vmul.f32 0.5, %v8395_v35 }
0x11b6   :  { %v6622_v16 = vpop.eup %6621  ;;  %v4484_v42 = vadd.f32 1.0, %v6620_v1  ;;  %v4457_v57 = vmul.f32 0.70710677, %v4387_v2 }
0x11b7   :  { %v4483_v22 = vadd.f32 1.0, %v6622_v16  ;;  %6631 = verf.f32 %v4458_v58  ;;  %v4441_v58 = vmul.f32 0.5, %v4387_v2 }
0x11b8   :  { %6633 = verf.f32 %v4457_v57  ;;  %v6113_v3 = vpop.f32.mrb[128].mxu1  ;;  %v4500_v37 = vmul.f32 %v4484_v42, %v4436_v40 }
0x11b9   :  { %v6624_v14 = vpop.eup %6623  ;;  %v4499_v28 = vmul.f32 %v4483_v22, %v4435_v38  ;;  %v8400_v8 = vadd.f32 %v6113_v3, %v8386_v50  ;;  %v4396_v49 = vpop.f32.mrb[129].mxu1 }
0x11ba   :  { %v6626_v7 = vpop.eup %6625  ;;  %v4486_v23 = vadd.f32 1.0, %v6624_v14  ;;  %v4397_v5 = vadd.f32 %v8386_v50, %v4396_v49 }
0x11bb   :  { %v4485_v0 = vadd.f32 1.0, %v6626_v7  ;;  %v4460_v45 = vmul.f32 0.70710677, %v8400_v8  ;;  %6139 = vmatprep.mubr.msk.f32.mxu0 %vm323_vm1, %v4499_v28 }
0x11bc   :  { %v4459_v53 = vmul.f32 0.70710677, %v4397_v5  ;;  %v6116_v4 = vpop.f32.mrb[130].mxu1  ;;  %6140 = vmatmul.mubr.msk.f32.vlgmr.msra.gmra.mrb[120].mxu0 %vm323_vm1, %v4500_v37  ;;  %v4502_v26 = vmul.f32 %v4486_v23, %v4438_v60  ;;  %v4443_v23 = vmul.f32 0.5, %v4397_v5 }
0x11bd   :  { %v6628_v47 = vpop.eup %6627  ;;  %v4501_v33 = vmul.f32 %v4485_v0, %v4437_v36  ;;  %6635 = verf.f32 %v4460_v45  ;;  %v4412_v56 = vadd.f32 %v6116_v4, %v8386_v50  ;;  %v4406_v48 = vpop.f32.mrb[131].mxu1  ;;  %v4444_v0 = vmul.f32 0.5, %v8400_v8 }
0x11be   :  { %v6630_v55 = vpop.eup %6629  ;;  %v4488_v18 = vadd.f32 1.0, %v6628_v47  ;;  %6637 = verf.f32 %v4459_v53  ;;  %v4407_v6 = vadd.f32 %v8386_v50, %v4406_v48 }
0x11bf   :  { %v4487_v12 = vadd.f32 1.0, %v6630_v55  ;;  %v4462_v62 = vmul.f32 0.70710677, %v4412_v56  ;;  %6142 = vmatprep.mubr.msk.f32.mxu0 %vm323_vm1, %v4501_v33  ;;  %v4446_v48 = vmul.f32 0.5, %v4412_v56 }
0x11c0   :  { %v4461_v63 = vmul.f32 0.70710677, %v4407_v6  ;;  %v6119_v30 = vpop.f32.mrb[132].mxu1  ;;  %6143 = vmatmul.mubr.msk.f32.gmra.mrb[122].mxu0 %vm323_vm1, %v4502_v26  ;;  %v4504_v59 = vmul.f32 %v4488_v18, %v4440_v51  ;;  %v4445_v47 = vmul.f32 0.5, %v4407_v6 }
0x11c1   :  { %v6632_v52 = vpop.eup %6631  ;;  %v4503_v32 = vmul.f32 %v4487_v12, %v4439_v25  ;;  %6639 = verf.f32 %v4462_v62  ;;  %v4422_v21 = vadd.f32 %v6119_v30, %v8386_v50  ;;  %v4416_v15 = vpop.f32.mrb[133].mxu1 }
0x11c2   :  { %v6634_v20 = vpop.eup %6633  ;;  %v4490_v1 = vadd.f32 1.0, %v6632_v52  ;;  %6641 = verf.f32 %v4461_v63  ;;  %v4417_v27 = vadd.f32 %v8386_v50, %v4416_v15 }
0x11c3   :  { %v4489_v16 = vadd.f32 1.0, %v6634_v20  ;;  %v4464_v42 = vmul.f32 0.70710677, %v4422_v21  ;;  %6145 = vmatprep.mubr.msk.f32.mxu0 %vm323_vm1, %v4503_v32  ;;  %v4448_v62 = vmul.f32 0.5, %v4422_v21  ;;  %v5058_v21 = vld [vmem:[%s8484_s6 + $0x168] ss:$0 sm:$0xff] }
0x11c4   :  { %v4463_v57 = vmul.f32 0.70710677, %v4417_v27  ;;  %v6122_v38 = vpop.f32.mrb[134].mxu1  ;;  %6146 = vmatmul.mubr.msk.f32.gmra.mrb[124].mxu0 %vm323_vm1, %v4504_v59  ;;  %v4506_v14 = vmul.f32 %v4490_v1, %v4442_v34  ;;  %v4447_v12 = vmul.f32 0.5, %v4417_v27 }
0x11c5   :  { %v4505_v22 = vmul.f32 %v4489_v16, %v4441_v58  ;;  %6643 = verf.f32 %v4464_v42  ;;  %v4432_v40 = vadd.f32 %v6122_v38, %v8386_v50  ;;  %v4426_v3 = vpop.f32.mrb[135].mxu1 }
0x11c6   :  { %6645 = verf.f32 %v4463_v57  ;;  %v4427_v28 = vadd.f32 %v8386_v50, %v4426_v3 }
0x11c7   :  { %v6636_v2 = vpop.eup %6635  ;;  %v4466_v49 = vmul.f32 0.70710677, %v4432_v40  ;;  %6148 = vmatprep.mubr.msk.f32.mxu0 %vm323_vm1, %v4505_v22  ;;  %v4450_v15 = vmul.f32 0.5, %v4432_v40 }
0x11c8   :  { %v6638_v7 = vpop.eup %6637  ;;  %v4492_v37 = vadd.f32 1.0, %v6636_v2  ;;  %v4465_v35 = vmul.f32 0.70710677, %v4427_v28  ;;  %6149 = vmatmul.mubr.msk.f32.gmra.mrb[126].mxu0 %vm323_vm1, %v4506_v14  ;;  %v4449_v56 = vmul.f32 0.5, %v4427_v28 }
0x11c9   :  { %v4491_v36 = vadd.f32 1.0, %v6638_v7  ;;  %6647 = verf.f32 %v4466_v49 }
0x11ca   :  { %6649 = verf.f32 %v4465_v35  ;;  %v4508_v4 = vmul.f32 %v4492_v37, %v4444_v0 }
0x11cb   :  { %v6640_v45 = vpop.eup %6639  ;;  %v4507_v60 = vmul.f32 %v4491_v36, %v4443_v23 }
0x11cc   :  { %v6642_v53 = vpop.eup %6641  ;;  %v4494_v50 = vadd.f32 1.0, %v6640_v45 }
0x11cd   :  { %v4493_v33 = vadd.f32 1.0, %v6642_v53  ;;  %6151 = vmatprep.mubr.msk.f32.mxu0 %vm323_vm1, %v4507_v60 }
0x11ce   :  { %6152 = vmatmul.mubr.msk.f32.gmra.mrb[128].mxu0 %vm323_vm1, %v4508_v4  ;;  %v4510_v18 = vmul.f32 %v4494_v50, %v4446_v48 }
0x11cf   :  { %v6644_v55 = vpop.eup %6643  ;;  %v4509_v26 = vmul.f32 %v4493_v33, %v4445_v47 }
0x11d0   :  { %v6646_v5 = vpop.eup %6645  ;;  %v4496_v25 = vadd.f32 1.0, %v6644_v55 }
0x11d1   :  { %v4495_v8 = vadd.f32 1.0, %v6646_v5  ;;  %6154 = vmatprep.mubr.msk.f32.mxu0 %vm323_vm1, %v4509_v26 }
0x11d2   :  { %6155 = vmatmul.mubr.msk.f32.gmra.mrb[130].mxu0 %vm323_vm1, %v4510_v18  ;;  %v4512_v30 = vmul.f32 %v4496_v25, %v4448_v62 }
0x11d3   :  { %v6648_v51 = vpop.eup %6647  ;;  %v4511_v6 = vmul.f32 %v4495_v8, %v4447_v12 }
0x11d4   :  { %v6650_v63 = vpop.eup %6649  ;;  %v4498_v52 = vadd.f32 1.0, %v6648_v51 }
0x11d5   :  { %v4497_v32 = vadd.f32 1.0, %v6650_v63  ;;  %6157 = vmatprep.mubr.msk.f32.mxu0 %vm323_vm1, %v4511_v6 }
0x11d6   :  { %6158 = vmatmul.mubr.msk.f32.gmra.mrb[132].mxu0 %vm323_vm1, %v4512_v30  ;;  %v4514_v59 = vmul.f32 %v4498_v52, %v4450_v15 }
0x11d7   :  { %v4513_v20 = vmul.f32 %v4497_v32, %v4449_v56 }
0x11d9   :  { %6160 = vmatprep.mubr.msk.f32.mxu0 %vm323_vm1, %v4513_v20 }
0x11da   :  { %6161 = vmatmul.mubr.msk.f32.gmra.mrb[134].mxu0 %vm323_vm1, %v4514_v59 }
0x128f   :  { %v6141_v1 = vpop.f32.mrb[120].mxu0 }
0x1290   :  { %v4639_v27 = vadd.f32 %v6141_v1, %v5058_v21  ;;  %v4633_v58 = vpop.f32.mrb[121].mxu0 }
0x1291   :  { %v4634_v16 = vadd.f32 %v5058_v21, %v4633_v58 }
0x1293   :  { %v6144_v42 = vpop.f32.mrb[122].mxu0  ;;  %v4712_v63 = vadd.f32 %v4634_v16, %v8286_v11 }
0x1294   :  { %v4649_v34 = vadd.f32 %v6144_v42, %v5058_v21  ;;  %v4643_v57 = vpop.f32.mrb[123].mxu0 }
0x1295   :  { %v4644_v38 = vadd.f32 %v5058_v21, %v4643_v57 }
0x1296   :  { %v4715_v22 = vadd.f32 %v4649_v34, %v8299_v31 }
0x1297   :  { %v4714_v40 = vadd.f32 %v4644_v38, %v8296_v29  ;;  %v6147_v3 = vpop.f32.mrb[124].mxu0 }
0x1298   :  { %v4659_v14 = vadd.f32 %v6147_v3, %v5058_v21  ;;  %4732 = vrot.lane.b32.xlu1 %v4715_v22, %s6693_s17  ;;  %v4653_v28 = vpop.f32.mrb[125].mxu0 }
0x1299   :  { %v4654_v2 = vadd.f32 %v5058_v21, %v4653_v28  ;;  %4730 = vrot.lane.b32.xlu0 %v4714_v40, %s6693_s17 }
0x129a   :  { %v4717_v49 = vadd.f32 %v4659_v14, %v8309_v46 }
0x129b   :  { %v4716_v7 = vadd.f32 %v4654_v2, %v8306_v41  ;;  %v6150_v37 = vpop.f32.mrb[126].mxu0 }
0x129c   :  { %v4669_v35 = vadd.f32 %v6150_v37, %v5058_v21  ;;  %4740 = vrot.lane.b32.xlu1 %v4717_v49, %s6692_s8  ;;  %v4663_v23 = vpop.f32.mrb[127].mxu0 }
0x129d   :  { %v4664_v31 = vadd.f32 %v5058_v21, %v4663_v23  ;;  %4738 = vrot.lane.b32.xlu0 %v4716_v7, %s6692_s8 }
0x129e   :  { %v4719_v29 = vadd.f32 %v4669_v35, %v8319_v19 }
0x129f   :  { %v4718_v36 = vadd.f32 %v4664_v31, %v8316_v54 }
0x12a0   :  { %4748 = vrot.lane.b32.xlu1 %v4719_v29, %s6691_s30 }
0x12a1   :  { %v6153_v0 = vpop.f32.mrb[128].mxu0  ;;  %4746 = vrot.lane.b32.xlu0 %v4718_v36, %s6691_s30 }
0x12a2   :  { %v4679_v46 = vadd.f32 %v6153_v0, %v5058_v21  ;;  %v4673_v45 = vpop.f32.mrb[129].mxu0 }
0x12a3   :  { %v4674_v41 = vadd.f32 %v5058_v21, %v4673_v45 }
0x12a5   :  { %v6156_v60 = vpop.f32.mrb[130].mxu0 }
0x12a6   :  { %v4689_v53 = vadd.f32 %v6156_v60, %v5058_v21  ;;  %v4683_v4 = vpop.f32.mrb[131].mxu0 }
0x12a7   :  { %v4684_v50 = vadd.f32 %v5058_v21, %v4683_v4 }
0x12a8   :  { %v4723_v47 = vadd.f32 %v4689_v53, %v8339_v44 }
0x12a9   :  { %v4722_v33 = vadd.f32 %v4684_v50, %v8336_v61  ;;  %v6159_v48 = vpop.f32.mrb[132].mxu0 }
0x12aa   :  { %v4699_v19 = vadd.f32 %v6159_v48, %v5058_v21  ;;  %4763 = vrot.lane.b32.xlu1 %v4723_v47, %s6693_s17  ;;  %v4693_v54 = vpop.f32.mrb[133].mxu0 }
0x12ab   :  { %v4694_v55 = vadd.f32 %v5058_v21, %v4693_v54  ;;  %4761 = vrot.lane.b32.xlu0 %v4722_v33, %s6693_s17 }
0x12ac   :  { %v4725_v26 = vadd.f32 %v4699_v19, %v8349_v24 }
0x12ad   :  { %v4724_v5 = vadd.f32 %v4694_v55, %v8346_v43  ;;  %v6162_v18 = vpop.f32.mrb[134].mxu0  ;;  %v4713_v43 = vadd.f32 %v4639_v27, %v8289_v17  ;;  %v4720_v27 = vadd.f32 %v4674_v41, %v8326_v10 }
0x12ae   :  { %v4709_v25 = vadd.f32 %v6162_v18, %v5058_v21  ;;  %4771 = vrot.lane.b32.xlu1 %v4725_v26, %s6692_s8  ;;  %v4703_v12 = vpop.f32.mrb[135].mxu0 }
0x12af   :  { %v4704_v44 = vadd.f32 %v5058_v21, %v4703_v12  ;;  %4769 = vrot.lane.b32.xlu0 %v4724_v5, %s6692_s8  ;;  %v4721_v21 = vadd.f32 %v4679_v46, %v8329_v39 }
0x12b0   :  { %v4727_v61 = vadd.f32 %v4709_v25, %v8359_v13 }
0x12b1   :  { %v4726_v8 = vadd.f32 %v4704_v44, %v8356_v9 }
0x12b2   :  { %4779 = vrot.lane.b32.xlu1 %v4727_v61, %s6691_s30 }
0x12b3   :  { %4777 = vrot.lane.b32.xlu0 %v4726_v8, %s6691_s30 }
0x130a   :  { %v4733_v62 = vpop.permute.xlu1 %4732 }
0x130b   :  { %v4731_v24 = vpop.permute.xlu0 %4730  ;;  %v4753_v30 = vsel %vm145_vm0, %v4713_v43, %v4733_v62 }
0x130c   :  { %v4752_v52 = vsel %vm145_vm0, %v4712_v63, %v4731_v24 }
0x130e   :  { %v4741_v51 = vpop.permute.xlu1 %4740 }
0x130f   :  { %v4739_v6 = vpop.permute.xlu0 %4738  ;;  %v4755_v13 = vsel %vm323_vm1, %v4753_v30, %v4741_v51 }
0x1310   :  { %v4754_v56 = vsel %vm323_vm1, %v4752_v52, %v4739_v6 }
0x1312   :  { %v4749_v9 = vpop.permute.xlu1 %4748 }
0x1313   :  { %v4758_v32 = vsel %vm4756_vm2, %v4755_v13, %v4749_v9  ;;  %v4747_v15 = vpop.permute.xlu0 %4746 }
0x1314   :  { %4790 = vst [vmem:[%s8490_s7 + $0x8] sm:$0xff] %v4758_v32  ;;  %v4757_v17 = vsel %vm4756_vm2, %v4754_v56, %v4747_v15 }
0x1315   :  { %4789 = vst [vmem:[%s8490_s7] sm:$0xff] %v4757_v17 }
0x131c   :  { %v4764_v11 = vpop.permute.xlu1 %4763 }
0x131d   :  { %v4762_v20 = vpop.permute.xlu0 %4761  ;;  %v4784_v58 = vsel %vm145_vm0, %v4721_v21, %v4764_v11 }
0x131e   :  { %v4783_v16 = vsel %vm145_vm0, %v4720_v27, %v4762_v20 }
0x1320   :  { %v4772_v59 = vpop.permute.xlu1 %4771 }
0x1321   :  { %v4770_v1 = vpop.permute.xlu0 %4769  ;;  %v4786_v42 = vsel %vm323_vm1, %v4784_v58, %v4772_v59 }
0x1322   :  { %v4785_v57 = vsel %vm323_vm1, %v4783_v16, %v4770_v1 }
0x1324   :  { %v4780_v34 = vpop.permute.xlu1 %4779 }
0x1325   :  { %v4788_v38 = vsel %vm4756_vm2, %v4786_v42, %v4780_v34  ;;  %v4778_v22 = vpop.permute.xlu0 %4777 }
0x1326   :  { %4792 = vst [vmem:[%s8490_s7 + $0x18] sm:$0xff] %v4788_v38  ;;  %v4787_v39 = vsel %vm4756_vm2, %v4785_v57, %v4778_v22 }
0x1327   :  { %4791 = vst [vmem:[%s8490_s7 + $0x10] sm:$0xff] %v4787_v39 }

</bundles_post_ra>
